<compile_context>
chip_gen: v7x
topology: tpu7x:2x2x1
jax: 0.10.0
libtpu: 0.0.40
codegen_flags: <defaults>
</compile_context>

<pallas_src>
import functools

import numpy as np

import jax
import jax.numpy as jnp
from jax import lax
from jax.experimental import pallas as pl
from jax.experimental.pallas import tpu as pltpu

_VMEM_LIMIT = 32 * 1024 * 1024  # actual usage ~2 MiB; safe on v5e/v6e/v7x


def _round_up(x, m):
    return (x + m - 1) // m * m


def _conv_out(n, kernel_size, stride):
    return (n - (kernel_size - 1) - 1) // stride + 1


def conv2d_size_calc(w, h, kernel_size, stride):
    return _conv_out(w, kernel_size, stride), _conv_out(h, kernel_size, stride)


# ----------------------------------------------------------------------------
# The single fused Pallas kernel
# ----------------------------------------------------------------------------
def _duelcnn_fused_kernel(p1_ref, w1_ref, b1_ref, w2_ref, b2_ref, w3_ref,
                          b3_ref, wh1_ref, bh1_ref, wh2_ref, bh2_ref,
                          q_ref, h3_ref, *, out_size):
    """Whole DuelCNN forward on VMEM-resident data.

    p1_ref : (M1, 256) bf16  conv1 im2col rows, slot-major duplicated ordering
    w*_ref : BN-folded conv weights (bf16), b*_ref : folded shifts (f32)
    wh*_ref: packed dueling-head weights (bf16), bh*_ref: biases (f32)
    q_ref  : (batch, out_size) f32 Q-values
    h3_ref : (M3, 64) f32 conv3 features, row = (spatial_pos, batch)
    """
    f32 = jnp.float32

    # ----- conv1 + BN + ReLU: one matmul over all (duplicated) output rows --
    h1 = jnp.dot(p1_ref[...], w1_ref[...], preferred_element_type=f32)
    h1 = jnp.maximum(h1 + b1_ref[...], 0.0).astype(jnp.bfloat16)

    # ----- conv2 + BN + ReLU: contract over the 16 (kh,kw) filter slots -----
    c1 = w1_ref.shape[1]                     # 32
    n_slots2 = w2_ref.shape[0] // c1         # 16
    m2 = h1.shape[0] // n_slots2             # 72  (9 * 8)
    w2 = w2_ref[...]
    acc2 = jnp.dot(h1[0:m2, :], w2[0:c1, :], preferred_element_type=f32)
    for s in range(1, n_slots2):
        acc2 = acc2 + jnp.dot(h1[s * m2:(s + 1) * m2, :],
                              w2[s * c1:(s + 1) * c1, :],
                              preferred_element_type=f32)
    h2 = jnp.maximum(acc2 + b2_ref[...], 0.0).astype(jnp.bfloat16)

    # ----- conv3 + BN + ReLU: 9 filter slots ---------------------------------
    c2 = w2_ref.shape[1]                     # 64
    n_slots3 = w3_ref.shape[0] // c2         # 9
    m3 = h2.shape[0] // n_slots3             # 8  (4 positions * batch 2)
    w3 = w3_ref[...]
    acc3 = jnp.dot(h2[0:m3, :], w3[0:c2, :], preferred_element_type=f32)
    for s in range(1, n_slots3):
        acc3 = acc3 + jnp.dot(h2[s * m3:(s + 1) * m3, :],
                              w3[s * c2:(s + 1) * c2, :],
                              preferred_element_type=f32)
    h3 = jnp.maximum(acc3 + b3_ref[...], 0.0)
    h3_ref[...] = h3                         # returned (wrapper relayouts to NCHW flatten)

    # ----- dueling head (A/V linear1 + LeakyReLU + linear2 + combine) -------
    c3 = w3_ref.shape[1]                     # 64
    h3b = h3.astype(jnp.bfloat16)
    wh1 = wh1_ref[...]
    n_pos = wh1.shape[0] // c3               # conv3 spatial positions (4)
    batch = m3 // n_pos
    acc = jnp.dot(h3b[0:batch, :], wh1[0:c3, :], preferred_element_type=f32)
    for p in range(1, n_pos):
        acc = acc + jnp.dot(h3b[p * batch:(p + 1) * batch, :],
                            wh1[p * c3:(p + 1) * c3, :],
                            preferred_element_type=f32)
    hh = acc + bh1_ref[...]
    hh = jnp.where(hh >= 0.0, hh, 0.01 * hh).astype(jnp.bfloat16)  # LeakyReLU(0.01)

    y = jnp.dot(hh, wh2_ref[...], preferred_element_type=f32) + bh2_ref[...]
    a = y[:, :out_size]
    v = y[:, out_size:out_size + 1]
    a_mean = jnp.sum(a) / a.size             # Ax.mean() over ALL elements (as in PyTorch ref)
    q_ref[...] = (v + (a - a_mean)).astype(q_ref.dtype)


def _duelcnn_pallas(p1, pk, out_size, batch):
    n_slots2 = pk["w2f"].shape[0] // pk["w1f"].shape[1]
    n_slots3 = pk["w3f"].shape[0] // pk["w2f"].shape[1]
    m3 = p1.shape[0] // (n_slots2 * n_slots3)
    c3 = pk["w3f"].shape[1]
    kern = functools.partial(_duelcnn_fused_kernel, out_size=out_size)
    return pl.pallas_call(
        kern,
        out_shape=(jax.ShapeDtypeStruct((batch, out_size), jnp.float32),
                   jax.ShapeDtypeStruct((m3, c3), jnp.float32)),
        compiler_params=pltpu.CompilerParams(vmem_limit_bytes=_VMEM_LIMIT),
    )(p1, pk["w1f"], pk["b1f"], pk["w2f"], pk["b2f"], pk["w3f"], pk["b3f"],
      pk["wh1"], pk["bh1"], pk["wh2"], pk["bh2"])


# ----------------------------------------------------------------------------
# One-time parameter packing (hoisted out of the per-step path)
# ----------------------------------------------------------------------------
def _fold_conv_ci_major(w_oihw, bias, bn, eps):
    """Fold eval-mode BN; K rows ordered (ci, kh, kw) — matches
    lax.conv_general_dilated_patches feature ordering (used for conv1)."""
    cout = w_oihw.shape[0]
    scale = bn["gamma"] * lax.rsqrt(bn["var"] + eps)
    w2d = (w_oihw.reshape(cout, -1).T * scale[None, :]).astype(jnp.bfloat16)
    shift = ((bias - bn["mean"]) * scale + bn["beta"]).reshape(1, cout)
    return w2d, shift.astype(jnp.float32)


def _fold_conv_slot_major(w_oihw, bias, bn, eps):
    """Fold eval-mode BN; K rows ordered (kh, kw, ci) — matches the in-kernel
    filter-slot-major patch layout (used for conv2 / conv3)."""
    cout = w_oihw.shape[0]
    scale = bn["gamma"] * lax.rsqrt(bn["var"] + eps)
    w2d = jnp.transpose(w_oihw, (2, 3, 1, 0)).reshape(-1, cout)
    w2d = (w2d * scale[None, :]).astype(jnp.bfloat16)
    shift = ((bias - bn["mean"]) * scale + bn["beta"]).reshape(1, cout)
    return w2d, shift.astype(jnp.float32)


def _build_row_map(batch, oh1, ow1, oh3, ow3):
    """Row map duplicating / reordering conv1's im2col rows so that all later
    patch gathers inside the kernel are contiguous static slices.

    conv3 rows: r3 = p*batch + b,      p = i3*ow3 + j3
    conv2 rows: r2 = s3*M3 + r3,       s3 = kh3*3 + kw3   (conv3 filter slot)
    conv1 rows: r1 = s2*M2 + r2,       s2 = kh2*4 + kw2   (conv2 filter slot)
    """
    n_pos = oh3 * ow3
    m3 = n_pos * batch
    m2 = 9 * m3
    m1 = 16 * m2
    rm = np.empty((m1,), np.int32)
    for s2 in range(16):
        kh2, kw2 = divmod(s2, 4)
        for s3 in range(9):
            kh3, kw3 = divmod(s3, 3)
            for p in range(n_pos):
                i3, j3 = divmod(p, ow3)
                for b in range(batch):
                    r1 = s2 * m2 + s3 * m3 + p * batch + b
                    i1 = 2 * (i3 + kh3) + kh2     # conv2 stride 2 over conv1 grid
                    j1 = 2 * (j3 + kw3) + kw2
                    rm[r1] = b * (oh1 * ow1) + i1 * ow1 + j1
    return rm


def prepare_params(params, h, w, batch, eps=1e-5):
    oh1, ow1 = _conv_out(h, 8, 4), _conv_out(w, 8, 4)
    oh2, ow2 = _conv_out(oh1, 4, 2), _conv_out(ow1, 4, 2)
    oh3, ow3 = _conv_out(oh2, 3, 1), _conv_out(ow2, 3, 1)
    n_pos = oh3 * ow3
    c3 = params["conv3_w"].shape[0]
    out_size = params["Alinear2_w"].shape[1]
    assert params["Alinear1_w"].shape[0] == n_pos * c3

    w1f, b1f = _fold_conv_ci_major(params["conv1_w"], params["conv1_b"],
                                   params["bn1"], eps)
    w2f, b2f = _fold_conv_slot_major(params["conv2_w"], params["conv2_b"],
                                     params["bn2"], eps)
    w3f, b3f = _fold_conv_slot_major(params["conv3_w"], params["conv3_b"],
                                     params["bn3"], eps)

    # Head layer 1: concat A|V and bake the NCHW-flatten permutation into the
    # row order (kernel feeds features as (spatial_pos major, channel minor)).
    wh1 = jnp.concatenate([params["Alinear1_w"], params["Vlinear1_w"]], axis=1)
    perm = (np.arange(c3)[None, :] * n_pos + np.arange(n_pos)[:, None]).reshape(-1)
    wh1 = wh1[perm, :].astype(jnp.bfloat16)
    bh1 = jnp.concatenate([params["Alinear1_b"], params["Vlinear1_b"]])[None, :]
    bh1 = bh1.astype(jnp.float32)

    # Head layer 2: block-diagonal pack, padded to a 128-lane output.
    n2 = _round_up(out_size + 1, 128)
    wh2 = jnp.zeros((256, n2), jnp.float32)
    wh2 = wh2.at[:128, :out_size].set(params["Alinear2_w"])
    wh2 = wh2.at[128:, out_size].set(params["Vlinear2_w"][:, 0])
    wh2 = wh2.astype(jnp.bfloat16)
    bh2 = jnp.zeros((1, n2), jnp.float32)
    bh2 = bh2.at[0, :out_size].set(params["Alinear2_b"])
    bh2 = bh2.at[0, out_size].set(params["Vlinear2_b"][0])

    row_map = jnp.asarray(_build_row_map(batch, oh1, ow1, oh3, ow3))
    return dict(w1f=w1f, b1f=b1f, w2f=w2f, b2f=b2f, w3f=w3f, b3f=b3f,
                wh1=wh1, bh1=bh1, wh2=wh2, bh2=bh2, row_map=row_map)


# ----------------------------------------------------------------------------
# Parameters (deterministic synthetic init — shapes from DuelCNN.__init__)
# ----------------------------------------------------------------------------
def init_params(key, h, w, output_size):
    convw, convh = conv2d_size_calc(w, h, 8, 4)
    convw, convh = conv2d_size_calc(convw, convh, 4, 2)
    convw, convh = conv2d_size_calc(convw, convh, 3, 1)
    linear_in = convw * convh * 64

    keys = iter(jax.random.split(key, 32))   # 26 draws needed; 32 is safe

    def nrm(shape, s=0.05):
        return s * jax.random.normal(next(keys), shape, dtype=jnp.float32)

    def bn(c):
        return dict(
            gamma=1.0 + 0.1 * jax.random.normal(next(keys), (c,), jnp.float32),
            beta=0.1 * jax.random.normal(next(keys), (c,), jnp.float32),
            mean=0.1 * jax.random.normal(next(keys), (c,), jnp.float32),
            var=1.0 + 0.1 * jnp.abs(jax.random.normal(next(keys), (c,), jnp.float32)),
        )

    return dict(
        conv1_w=nrm((32, 4, 8, 8)),   conv1_b=nrm((32,)),  bn1=bn(32),
        conv2_w=nrm((64, 32, 4, 4)),  conv2_b=nrm((64,)),  bn2=bn(64),
        conv3_w=nrm((64, 64, 3, 3)),  conv3_b=nrm((64,)),  bn3=bn(64),
        Alinear1_w=nrm((linear_in, 128)), Alinear1_b=nrm((128,)),
        Alinear2_w=nrm((128, output_size)), Alinear2_b=nrm((output_size,)),
        Vlinear1_w=nrm((linear_in, 128)), Vlinear1_b=nrm((128,)),
        Vlinear2_w=nrm((128, 1)), Vlinear2_b=nrm((1,)),
    )


# ----------------------------------------------------------------------------
# Per-step forward pass (matches DuelCNN.forward)
# ----------------------------------------------------------------------------
def duel_cnn_forward(packed, x_nchw, *, out_size):
    n = x_nchw.shape[0]
    # NCHW -> NHWC, bf16 operands (f32 MXU accumulation inside the kernel).
    x = jnp.transpose(x_nchw, (0, 2, 3, 1)).astype(jnp.bfloat16)

    # conv1 im2col (feature order (ci, kh, kw)) + slot-major row duplication.
    patches = lax.conv_general_dilated_patches(
        x, (8, 8), (4, 4), "VALID",
        dimension_numbers=("NHWC", "HWIO", "NHWC"))
    _, oh1, ow1, k1 = patches.shape
    p1 = jnp.take(patches.reshape(n * oh1 * ow1, k1), packed["row_map"], axis=0)

    # Entire network (3 convs + dueling head) in ONE Pallas kernel.
    q, h3 = _duelcnn_pallas(p1, packed, out_size, n)

    # x.view(N, -1): NCHW-flatten of the conv3 features (tiny 2 KB relayout).
    c3 = h3.shape[1]
    n_pos = h3.shape[0] // n
    x_flat = jnp.transpose(h3.reshape(n_pos, n, c3), (1, 2, 0)).reshape(n, c3 * n_pos)
    return q, x_flat


# ----------------------------------------------------------------------------
if __name__ == "__main__":
    H = W = 48          # small spatial size consistent with the conv stack
    BATCH = 2
    OUTPUT_SIZE = 6     # Pong action space

    key = jax.random.PRNGKey(0)
    k_params, k_x = jax.random.split(key)

    params = init_params(k_params, H, W, OUTPUT_SIZE)
    packed = prepare_params(params, H, W, BATCH)   # one-time packing, not per step
    x = jax.random.normal(k_x, (BATCH, 4, H, W), dtype=jnp.float32)

    fwd = jax.jit(functools.partial(duel_cnn_forward, out_size=OUTPUT_SIZE))
    q, feats = fwd(packed, x)
    jax.block_until_ready((q, feats))

    assert q.shape == (BATCH, OUTPUT_SIZE) and q.dtype == jnp.float32
    assert feats.shape == (BATCH, 2 * 2 * 64) and feats.dtype == jnp.float32
    print("KERNEL_OK")
</pallas_src>

<mosaic_0001>
module attributes {stable_mosaic.version = 11 : i64} {
  func.func @_duelcnn_fused_kernel(%arg0: memref<1152x256xbf16, #tpu.memory_space<vmem>>, %arg1: memref<256x32xbf16, #tpu.memory_space<vmem>>, %arg2: memref<1x32xf32, #tpu.memory_space<vmem>>, %arg3: memref<512x64xbf16, #tpu.memory_space<vmem>>, %arg4: memref<1x64xf32, #tpu.memory_space<vmem>>, %arg5: memref<576x64xbf16, #tpu.memory_space<vmem>>, %arg6: memref<1x64xf32, #tpu.memory_space<vmem>>, %arg7: memref<256x256xbf16, #tpu.memory_space<vmem>>, %arg8: memref<1x256xf32, #tpu.memory_space<vmem>>, %arg9: memref<256x128xbf16, #tpu.memory_space<vmem>>, %arg10: memref<1x128xf32, #tpu.memory_space<vmem>>, %arg11: memref<2x6xf32, #tpu.memory_space<vmem>>, %arg12: memref<8x64xf32, #tpu.memory_space<vmem>>) attributes {dimension_semantics = [], scalar_prefetch = 0 : i64, scratch_operands = 0 : i64, tpu.core_type = #tpu.core_type<tc>} {
    %c0 = arith.constant 0 : index
    %c0_0 = arith.constant 0 : index
    %0 = vector.load %arg0[%c0, %c0_0] : memref<1152x256xbf16, #tpu.memory_space<vmem>>, vector<1152x256xbf16>
    %c0_1 = arith.constant 0 : index
    %c0_2 = arith.constant 0 : index
    %1 = vector.load %arg1[%c0_1, %c0_2] : memref<256x32xbf16, #tpu.memory_space<vmem>>, vector<256x32xbf16>
    %cst = arith.constant dense<0.000000e+00> : vector<1152x32xf32>
    %2 = tpu.matmul %0, %1, %cst {dimension_numbers = #tpu.dot_dimension_numbers<[1], [0], [0], [1], [0, 0, 1, 1], [], []>} : vector<1152x256xbf16>, vector<256x32xbf16>, vector<1152x32xf32> -> vector<1152x32xf32>
    %c0_3 = arith.constant 0 : index
    %c0_4 = arith.constant 0 : index
    %3 = vector.load %arg2[%c0_3, %c0_4] : memref<1x32xf32, #tpu.memory_space<vmem>>, vector<1x32xf32>
    %4 = vector.broadcast %3 : vector<1x32xf32> to vector<1152x32xf32>
    %5 = arith.addf %2, %4 : vector<1152x32xf32>
    %cst_5 = arith.constant 0.000000e+00 : f32
    %6 = vector.broadcast %cst_5 : f32 to vector<1152x32xf32>
    %7 = arith.maximumf %5, %6 : vector<1152x32xf32>
    %8 = arith.truncf %7 : vector<1152x32xf32> to vector<1152x32xbf16>
    %c0_6 = arith.constant 0 : index
    %c0_7 = arith.constant 0 : index
    %9 = vector.load %arg3[%c0_6, %c0_7] : memref<512x64xbf16, #tpu.memory_space<vmem>>, vector<512x64xbf16>
    %10 = vector.extract_strided_slice %8 {offsets = [0, 0], sizes = [72, 32], strides = [1, 1]} : vector<1152x32xbf16> to vector<72x32xbf16>
    %11 = vector.extract_strided_slice %9 {offsets = [0, 0], sizes = [32, 64], strides = [1, 1]} : vector<512x64xbf16> to vector<32x64xbf16>
    %cst_8 = arith.constant dense<0.000000e+00> : vector<72x64xf32>
    %12 = tpu.matmul %10, %11, %cst_8 {dimension_numbers = #tpu.dot_dimension_numbers<[1], [0], [0], [1], [0, 0, 1, 1], [], []>} : vector<72x32xbf16>, vector<32x64xbf16>, vector<72x64xf32> -> vector<72x64xf32>
    %13 = vector.extract_strided_slice %8 {offsets = [72, 0], sizes = [72, 32], strides = [1, 1]} : vector<1152x32xbf16> to vector<72x32xbf16>
    %14 = vector.extract_strided_slice %9 {offsets = [32, 0], sizes = [32, 64], strides = [1, 1]} : vector<512x64xbf16> to vector<32x64xbf16>
    %cst_9 = arith.constant dense<0.000000e+00> : vector<72x64xf32>
    %15 = tpu.matmul %13, %14, %cst_9 {dimension_numbers = #tpu.dot_dimension_numbers<[1], [0], [0], [1], [0, 0, 1, 1], [], []>} : vector<72x32xbf16>, vector<32x64xbf16>, vector<72x64xf32> -> vector<72x64xf32>
    %16 = arith.addf %12, %15 : vector<72x64xf32>
    %17 = vector.extract_strided_slice %8 {offsets = [144, 0], sizes = [72, 32], strides = [1, 1]} : vector<1152x32xbf16> to vector<72x32xbf16>
    %18 = vector.extract_strided_slice %9 {offsets = [64, 0], sizes = [32, 64], strides = [1, 1]} : vector<512x64xbf16> to vector<32x64xbf16>
    %cst_10 = arith.constant dense<0.000000e+00> : vector<72x64xf32>
    %19 = tpu.matmul %17, %18, %cst_10 {dimension_numbers = #tpu.dot_dimension_numbers<[1], [0], [0], [1], [0, 0, 1, 1], [], []>} : vector<72x32xbf16>, vector<32x64xbf16>, vector<72x64xf32> -> vector<72x64xf32>
    %20 = arith.addf %16, %19 : vector<72x64xf32>
    %21 = vector.extract_strided_slice %8 {offsets = [216, 0], sizes = [72, 32], strides = [1, 1]} : vector<1152x32xbf16> to vector<72x32xbf16>
    %22 = vector.extract_strided_slice %9 {offsets = [96, 0], sizes = [32, 64], strides = [1, 1]} : vector<512x64xbf16> to vector<32x64xbf16>
    %cst_11 = arith.constant dense<0.000000e+00> : vector<72x64xf32>
    %23 = tpu.matmul %21, %22, %cst_11 {dimension_numbers = #tpu.dot_dimension_numbers<[1], [0], [0], [1], [0, 0, 1, 1], [], []>} : vector<72x32xbf16>, vector<32x64xbf16>, vector<72x64xf32> -> vector<72x64xf32>
    %24 = arith.addf %20, %23 : vector<72x64xf32>
    %25 = vector.extract_strided_slice %8 {offsets = [288, 0], sizes = [72, 32], strides = [1, 1]} : vector<1152x32xbf16> to vector<72x32xbf16>
    %26 = vector.extract_strided_slice %9 {offsets = [128, 0], sizes = [32, 64], strides = [1, 1]} : vector<512x64xbf16> to vector<32x64xbf16>
    %cst_12 = arith.constant dense<0.000000e+00> : vector<72x64xf32>
    %27 = tpu.matmul %25, %26, %cst_12 {dimension_numbers = #tpu.dot_dimension_numbers<[1], [0], [0], [1], [0, 0, 1, 1], [], []>} : vector<72x32xbf16>, vector<32x64xbf16>, vector<72x64xf32> -> vector<72x64xf32>
    %28 = arith.addf %24, %27 : vector<72x64xf32>
    %29 = vector.extract_strided_slice %8 {offsets = [360, 0], sizes = [72, 32], strides = [1, 1]} : vector<1152x32xbf16> to vector<72x32xbf16>
    %30 = vector.extract_strided_slice %9 {offsets = [160, 0], sizes = [32, 64], strides = [1, 1]} : vector<512x64xbf16> to vector<32x64xbf16>
    %cst_13 = arith.constant dense<0.000000e+00> : vector<72x64xf32>
    %31 = tpu.matmul %29, %30, %cst_13 {dimension_numbers = #tpu.dot_dimension_numbers<[1], [0], [0], [1], [0, 0, 1, 1], [], []>} : vector<72x32xbf16>, vector<32x64xbf16>, vector<72x64xf32> -> vector<72x64xf32>
    %32 = arith.addf %28, %31 : vector<72x64xf32>
    %33 = vector.extract_strided_slice %8 {offsets = [432, 0], sizes = [72, 32], strides = [1, 1]} : vector<1152x32xbf16> to vector<72x32xbf16>
    %34 = vector.extract_strided_slice %9 {offsets = [192, 0], sizes = [32, 64], strides = [1, 1]} : vector<512x64xbf16> to vector<32x64xbf16>
    %cst_14 = arith.constant dense<0.000000e+00> : vector<72x64xf32>
    %35 = tpu.matmul %33, %34, %cst_14 {dimension_numbers = #tpu.dot_dimension_numbers<[1], [0], [0], [1], [0, 0, 1, 1], [], []>} : vector<72x32xbf16>, vector<32x64xbf16>, vector<72x64xf32> -> vector<72x64xf32>
    %36 = arith.addf %32, %35 : vector<72x64xf32>
    %37 = vector.extract_strided_slice %8 {offsets = [504, 0], sizes = [72, 32], strides = [1, 1]} : vector<1152x32xbf16> to vector<72x32xbf16>
    %38 = vector.extract_strided_slice %9 {offsets = [224, 0], sizes = [32, 64], strides = [1, 1]} : vector<512x64xbf16> to vector<32x64xbf16>
    %cst_15 = arith.constant dense<0.000000e+00> : vector<72x64xf32>
    %39 = tpu.matmul %37, %38, %cst_15 {dimension_numbers = #tpu.dot_dimension_numbers<[1], [0], [0], [1], [0, 0, 1, 1], [], []>} : vector<72x32xbf16>, vector<32x64xbf16>, vector<72x64xf32> -> vector<72x64xf32>
    %40 = arith.addf %36, %39 : vector<72x64xf32>
    %41 = vector.extract_strided_slice %8 {offsets = [576, 0], sizes = [72, 32], strides = [1, 1]} : vector<1152x32xbf16> to vector<72x32xbf16>
    %42 = vector.extract_strided_slice %9 {offsets = [256, 0], sizes = [32, 64], strides = [1, 1]} : vector<512x64xbf16> to vector<32x64xbf16>
    %cst_16 = arith.constant dense<0.000000e+00> : vector<72x64xf32>
    %43 = tpu.matmul %41, %42, %cst_16 {dimension_numbers = #tpu.dot_dimension_numbers<[1], [0], [0], [1], [0, 0, 1, 1], [], []>} : vector<72x32xbf16>, vector<32x64xbf16>, vector<72x64xf32> -> vector<72x64xf32>
    %44 = arith.addf %40, %43 : vector<72x64xf32>
    %45 = vector.extract_strided_slice %8 {offsets = [648, 0], sizes = [72, 32], strides = [1, 1]} : vector<1152x32xbf16> to vector<72x32xbf16>
    %46 = vector.extract_strided_slice %9 {offsets = [288, 0], sizes = [32, 64], strides = [1, 1]} : vector<512x64xbf16> to vector<32x64xbf16>
    %cst_17 = arith.constant dense<0.000000e+00> : vector<72x64xf32>
    %47 = tpu.matmul %45, %46, %cst_17 {dimension_numbers = #tpu.dot_dimension_numbers<[1], [0], [0], [1], [0, 0, 1, 1], [], []>} : vector<72x32xbf16>, vector<32x64xbf16>, vector<72x64xf32> -> vector<72x64xf32>
    %48 = arith.addf %44, %47 : vector<72x64xf32>
    %49 = vector.extract_strided_slice %8 {offsets = [720, 0], sizes = [72, 32], strides = [1, 1]} : vector<1152x32xbf16> to vector<72x32xbf16>
    %50 = vector.extract_strided_slice %9 {offsets = [320, 0], sizes = [32, 64], strides = [1, 1]} : vector<512x64xbf16> to vector<32x64xbf16>
    %cst_18 = arith.constant dense<0.000000e+00> : vector<72x64xf32>
    %51 = tpu.matmul %49, %50, %cst_18 {dimension_numbers = #tpu.dot_dimension_numbers<[1], [0], [0], [1], [0, 0, 1, 1], [], []>} : vector<72x32xbf16>, vector<32x64xbf16>, vector<72x64xf32> -> vector<72x64xf32>
    %52 = arith.addf %48, %51 : vector<72x64xf32>
    %53 = vector.extract_strided_slice %8 {offsets = [792, 0], sizes = [72, 32], strides = [1, 1]} : vector<1152x32xbf16> to vector<72x32xbf16>
    %54 = vector.extract_strided_slice %9 {offsets = [352, 0], sizes = [32, 64], strides = [1, 1]} : vector<512x64xbf16> to vector<32x64xbf16>
    %cst_19 = arith.constant dense<0.000000e+00> : vector<72x64xf32>
    %55 = tpu.matmul %53, %54, %cst_19 {dimension_numbers = #tpu.dot_dimension_numbers<[1], [0], [0], [1], [0, 0, 1, 1], [], []>} : vector<72x32xbf16>, vector<32x64xbf16>, vector<72x64xf32> -> vector<72x64xf32>
    %56 = arith.addf %52, %55 : vector<72x64xf32>
    %57 = vector.extract_strided_slice %8 {offsets = [864, 0], sizes = [72, 32], strides = [1, 1]} : vector<1152x32xbf16> to vector<72x32xbf16>
    %58 = vector.extract_strided_slice %9 {offsets = [384, 0], sizes = [32, 64], strides = [1, 1]} : vector<512x64xbf16> to vector<32x64xbf16>
    %cst_20 = arith.constant dense<0.000000e+00> : vector<72x64xf32>
    %59 = tpu.matmul %57, %58, %cst_20 {dimension_numbers = #tpu.dot_dimension_numbers<[1], [0], [0], [1], [0, 0, 1, 1], [], []>} : vector<72x32xbf16>, vector<32x64xbf16>, vector<72x64xf32> -> vector<72x64xf32>
    %60 = arith.addf %56, %59 : vector<72x64xf32>
    %61 = vector.extract_strided_slice %8 {offsets = [936, 0], sizes = [72, 32], strides = [1, 1]} : vector<1152x32xbf16> to vector<72x32xbf16>
    %62 = vector.extract_strided_slice %9 {offsets = [416, 0], sizes = [32, 64], strides = [1, 1]} : vector<512x64xbf16> to vector<32x64xbf16>
    %cst_21 = arith.constant dense<0.000000e+00> : vector<72x64xf32>
    %63 = tpu.matmul %61, %62, %cst_21 {dimension_numbers = #tpu.dot_dimension_numbers<[1], [0], [0], [1], [0, 0, 1, 1], [], []>} : vector<72x32xbf16>, vector<32x64xbf16>, vector<72x64xf32> -> vector<72x64xf32>
    %64 = arith.addf %60, %63 : vector<72x64xf32>
    %65 = vector.extract_strided_slice %8 {offsets = [1008, 0], sizes = [72, 32], strides = [1, 1]} : vector<1152x32xbf16> to vector<72x32xbf16>
    %66 = vector.extract_strided_slice %9 {offsets = [448, 0], sizes = [32, 64], strides = [1, 1]} : vector<512x64xbf16> to vector<32x64xbf16>
    %cst_22 = arith.constant dense<0.000000e+00> : vector<72x64xf32>
    %67 = tpu.matmul %65, %66, %cst_22 {dimension_numbers = #tpu.dot_dimension_numbers<[1], [0], [0], [1], [0, 0, 1, 1], [], []>} : vector<72x32xbf16>, vector<32x64xbf16>, vector<72x64xf32> -> vector<72x64xf32>
    %68 = arith.addf %64, %67 : vector<72x64xf32>
    %69 = vector.extract_strided_slice %8 {offsets = [1080, 0], sizes = [72, 32], strides = [1, 1]} : vector<1152x32xbf16> to vector<72x32xbf16>
    %70 = vector.extract_strided_slice %9 {offsets = [480, 0], sizes = [32, 64], strides = [1, 1]} : vector<512x64xbf16> to vector<32x64xbf16>
    %cst_23 = arith.constant dense<0.000000e+00> : vector<72x64xf32>
    %71 = tpu.matmul %69, %70, %cst_23 {dimension_numbers = #tpu.dot_dimension_numbers<[1], [0], [0], [1], [0, 0, 1, 1], [], []>} : vector<72x32xbf16>, vector<32x64xbf16>, vector<72x64xf32> -> vector<72x64xf32>
    %72 = arith.addf %68, %71 : vector<72x64xf32>
    %c0_24 = arith.constant 0 : index
    %c0_25 = arith.constant 0 : index
    %73 = vector.load %arg4[%c0_24, %c0_25] : memref<1x64xf32, #tpu.memory_space<vmem>>, vector<1x64xf32>
    %74 = vector.broadcast %73 : vector<1x64xf32> to vector<72x64xf32>
    %75 = arith.addf %72, %74 : vector<72x64xf32>
    %cst_26 = arith.constant 0.000000e+00 : f32
    %76 = vector.broadcast %cst_26 : f32 to vector<72x64xf32>
    %77 = arith.maximumf %75, %76 : vector<72x64xf32>
    %78 = arith.truncf %77 : vector<72x64xf32> to vector<72x64xbf16>
    %c0_27 = arith.constant 0 : index
    %c0_28 = arith.constant 0 : index
    %79 = vector.load %arg5[%c0_27, %c0_28] : memref<576x64xbf16, #tpu.memory_space<vmem>>, vector<576x64xbf16>
    %80 = vector.extract_strided_slice %78 {offsets = [0, 0], sizes = [8, 64], strides = [1, 1]} : vector<72x64xbf16> to vector<8x64xbf16>
    %81 = vector.extract_strided_slice %79 {offsets = [0, 0], sizes = [64, 64], strides = [1, 1]} : vector<576x64xbf16> to vector<64x64xbf16>
    %cst_29 = arith.constant dense<0.000000e+00> : vector<8x64xf32>
    %82 = tpu.matmul %80, %81, %cst_29 {dimension_numbers = #tpu.dot_dimension_numbers<[1], [0], [0], [1], [0, 0, 1, 1], [], []>} : vector<8x64xbf16>, vector<64x64xbf16>, vector<8x64xf32> -> vector<8x64xf32>
    %83 = vector.extract_strided_slice %78 {offsets = [8, 0], sizes = [8, 64], strides = [1, 1]} : vector<72x64xbf16> to vector<8x64xbf16>
    %84 = vector.extract_strided_slice %79 {offsets = [64, 0], sizes = [64, 64], strides = [1, 1]} : vector<576x64xbf16> to vector<64x64xbf16>
    %cst_30 = arith.constant dense<0.000000e+00> : vector<8x64xf32>
    %85 = tpu.matmul %83, %84, %cst_30 {dimension_numbers = #tpu.dot_dimension_numbers<[1], [0], [0], [1], [0, 0, 1, 1], [], []>} : vector<8x64xbf16>, vector<64x64xbf16>, vector<8x64xf32> -> vector<8x64xf32>
    %86 = arith.addf %82, %85 : vector<8x64xf32>
    %87 = vector.extract_strided_slice %78 {offsets = [16, 0], sizes = [8, 64], strides = [1, 1]} : vector<72x64xbf16> to vector<8x64xbf16>
    %88 = vector.extract_strided_slice %79 {offsets = [128, 0], sizes = [64, 64], strides = [1, 1]} : vector<576x64xbf16> to vector<64x64xbf16>
    %cst_31 = arith.constant dense<0.000000e+00> : vector<8x64xf32>
    %89 = tpu.matmul %87, %88, %cst_31 {dimension_numbers = #tpu.dot_dimension_numbers<[1], [0], [0], [1], [0, 0, 1, 1], [], []>} : vector<8x64xbf16>, vector<64x64xbf16>, vector<8x64xf32> -> vector<8x64xf32>
    %90 = arith.addf %86, %89 : vector<8x64xf32>
    %91 = vector.extract_strided_slice %78 {offsets = [24, 0], sizes = [8, 64], strides = [1, 1]} : vector<72x64xbf16> to vector<8x64xbf16>
    %92 = vector.extract_strided_slice %79 {offsets = [192, 0], sizes = [64, 64], strides = [1, 1]} : vector<576x64xbf16> to vector<64x64xbf16>
    %cst_32 = arith.constant dense<0.000000e+00> : vector<8x64xf32>
    %93 = tpu.matmul %91, %92, %cst_32 {dimension_numbers = #tpu.dot_dimension_numbers<[1], [0], [0], [1], [0, 0, 1, 1], [], []>} : vector<8x64xbf16>, vector<64x64xbf16>, vector<8x64xf32> -> vector<8x64xf32>
    %94 = arith.addf %90, %93 : vector<8x64xf32>
    %95 = vector.extract_strided_slice %78 {offsets = [32, 0], sizes = [8, 64], strides = [1, 1]} : vector<72x64xbf16> to vector<8x64xbf16>
    %96 = vector.extract_strided_slice %79 {offsets = [256, 0], sizes = [64, 64], strides = [1, 1]} : vector<576x64xbf16> to vector<64x64xbf16>
    %cst_33 = arith.constant dense<0.000000e+00> : vector<8x64xf32>
    %97 = tpu.matmul %95, %96, %cst_33 {dimension_numbers = #tpu.dot_dimension_numbers<[1], [0], [0], [1], [0, 0, 1, 1], [], []>} : vector<8x64xbf16>, vector<64x64xbf16>, vector<8x64xf32> -> vector<8x64xf32>
    %98 = arith.addf %94, %97 : vector<8x64xf32>
    %99 = vector.extract_strided_slice %78 {offsets = [40, 0], sizes = [8, 64], strides = [1, 1]} : vector<72x64xbf16> to vector<8x64xbf16>
    %100 = vector.extract_strided_slice %79 {offsets = [320, 0], sizes = [64, 64], strides = [1, 1]} : vector<576x64xbf16> to vector<64x64xbf16>
    %cst_34 = arith.constant dense<0.000000e+00> : vector<8x64xf32>
    %101 = tpu.matmul %99, %100, %cst_34 {dimension_numbers = #tpu.dot_dimension_numbers<[1], [0], [0], [1], [0, 0, 1, 1], [], []>} : vector<8x64xbf16>, vector<64x64xbf16>, vector<8x64xf32> -> vector<8x64xf32>
    %102 = arith.addf %98, %101 : vector<8x64xf32>
    %103 = vector.extract_strided_slice %78 {offsets = [48, 0], sizes = [8, 64], strides = [1, 1]} : vector<72x64xbf16> to vector<8x64xbf16>
    %104 = vector.extract_strided_slice %79 {offsets = [384, 0], sizes = [64, 64], strides = [1, 1]} : vector<576x64xbf16> to vector<64x64xbf16>
    %cst_35 = arith.constant dense<0.000000e+00> : vector<8x64xf32>
    %105 = tpu.matmul %103, %104, %cst_35 {dimension_numbers = #tpu.dot_dimension_numbers<[1], [0], [0], [1], [0, 0, 1, 1], [], []>} : vector<8x64xbf16>, vector<64x64xbf16>, vector<8x64xf32> -> vector<8x64xf32>
    %106 = arith.addf %102, %105 : vector<8x64xf32>
    %107 = vector.extract_strided_slice %78 {offsets = [56, 0], sizes = [8, 64], strides = [1, 1]} : vector<72x64xbf16> to vector<8x64xbf16>
    %108 = vector.extract_strided_slice %79 {offsets = [448, 0], sizes = [64, 64], strides = [1, 1]} : vector<576x64xbf16> to vector<64x64xbf16>
    %cst_36 = arith.constant dense<0.000000e+00> : vector<8x64xf32>
    %109 = tpu.matmul %107, %108, %cst_36 {dimension_numbers = #tpu.dot_dimension_numbers<[1], [0], [0], [1], [0, 0, 1, 1], [], []>} : vector<8x64xbf16>, vector<64x64xbf16>, vector<8x64xf32> -> vector<8x64xf32>
    %110 = arith.addf %106, %109 : vector<8x64xf32>
    %111 = vector.extract_strided_slice %78 {offsets = [64, 0], sizes = [8, 64], strides = [1, 1]} : vector<72x64xbf16> to vector<8x64xbf16>
    %112 = vector.extract_strided_slice %79 {offsets = [512, 0], sizes = [64, 64], strides = [1, 1]} : vector<576x64xbf16> to vector<64x64xbf16>
    %cst_37 = arith.constant dense<0.000000e+00> : vector<8x64xf32>
    %113 = tpu.matmul %111, %112, %cst_37 {dimension_numbers = #tpu.dot_dimension_numbers<[1], [0], [0], [1], [0, 0, 1, 1], [], []>} : vector<8x64xbf16>, vector<64x64xbf16>, vector<8x64xf32> -> vector<8x64xf32>
    %114 = arith.addf %110, %113 : vector<8x64xf32>
    %c0_38 = arith.constant 0 : index
    %c0_39 = arith.constant 0 : index
    %115 = vector.load %arg6[%c0_38, %c0_39] : memref<1x64xf32, #tpu.memory_space<vmem>>, vector<1x64xf32>
    %116 = vector.broadcast %115 : vector<1x64xf32> to vector<8x64xf32>
    %117 = arith.addf %114, %116 : vector<8x64xf32>
    %cst_40 = arith.constant 0.000000e+00 : f32
    %118 = vector.broadcast %cst_40 : f32 to vector<8x64xf32>
    %119 = arith.maximumf %117, %118 : vector<8x64xf32>
    %c0_41 = arith.constant 0 : index
    %c0_42 = arith.constant 0 : index
    %120 = vector.load %arg12[%c0_41, %c0_42] : memref<8x64xf32, #tpu.memory_space<vmem>>, vector<8x64xf32>
    tpu.vector_store %arg12[%c0_41, %c0_42], %119 {strides = array<i32>} : memref<8x64xf32, #tpu.memory_space<vmem>>, vector<8x64xf32>,
    %121 = arith.truncf %119 : vector<8x64xf32> to vector<8x64xbf16>
    %c0_43 = arith.constant 0 : index
    %c0_44 = arith.constant 0 : index
    %122 = vector.load %arg7[%c0_43, %c0_44] : memref<256x256xbf16, #tpu.memory_space<vmem>>, vector<256x256xbf16>
    %123 = vector.extract_strided_slice %121 {offsets = [0, 0], sizes = [2, 64], strides = [1, 1]} : vector<8x64xbf16> to vector<2x64xbf16>
    %124 = vector.extract_strided_slice %122 {offsets = [0, 0], sizes = [64, 256], strides = [1, 1]} : vector<256x256xbf16> to vector<64x256xbf16>
    %cst_45 = arith.constant dense<0.000000e+00> : vector<2x256xf32>
    %125 = tpu.matmul %123, %124, %cst_45 {dimension_numbers = #tpu.dot_dimension_numbers<[1], [0], [0], [1], [0, 0, 1, 1], [], []>} : vector<2x64xbf16>, vector<64x256xbf16>, vector<2x256xf32> -> vector<2x256xf32>
    %126 = vector.extract_strided_slice %121 {offsets = [2, 0], sizes = [2, 64], strides = [1, 1]} : vector<8x64xbf16> to vector<2x64xbf16>
    %127 = vector.extract_strided_slice %122 {offsets = [64, 0], sizes = [64, 256], strides = [1, 1]} : vector<256x256xbf16> to vector<64x256xbf16>
    %cst_46 = arith.constant dense<0.000000e+00> : vector<2x256xf32>
    %128 = tpu.matmul %126, %127, %cst_46 {dimension_numbers = #tpu.dot_dimension_numbers<[1], [0], [0], [1], [0, 0, 1, 1], [], []>} : vector<2x64xbf16>, vector<64x256xbf16>, vector<2x256xf32> -> vector<2x256xf32>
    %129 = arith.addf %125, %128 : vector<2x256xf32>
    %130 = vector.extract_strided_slice %121 {offsets = [4, 0], sizes = [2, 64], strides = [1, 1]} : vector<8x64xbf16> to vector<2x64xbf16>
    %131 = vector.extract_strided_slice %122 {offsets = [128, 0], sizes = [64, 256], strides = [1, 1]} : vector<256x256xbf16> to vector<64x256xbf16>
    %cst_47 = arith.constant dense<0.000000e+00> : vector<2x256xf32>
    %132 = tpu.matmul %130, %131, %cst_47 {dimension_numbers = #tpu.dot_dimension_numbers<[1], [0], [0], [1], [0, 0, 1, 1], [], []>} : vector<2x64xbf16>, vector<64x256xbf16>, vector<2x256xf32> -> vector<2x256xf32>
    %133 = arith.addf %129, %132 : vector<2x256xf32>
    %134 = vector.extract_strided_slice %121 {offsets = [6, 0], sizes = [2, 64], strides = [1, 1]} : vector<8x64xbf16> to vector<2x64xbf16>
    %135 = vector.extract_strided_slice %122 {offsets = [192, 0], sizes = [64, 256], strides = [1, 1]} : vector<256x256xbf16> to vector<64x256xbf16>
    %cst_48 = arith.constant dense<0.000000e+00> : vector<2x256xf32>
    %136 = tpu.matmul %134, %135, %cst_48 {dimension_numbers = #tpu.dot_dimension_numbers<[1], [0], [0], [1], [0, 0, 1, 1], [], []>} : vector<2x64xbf16>, vector<64x256xbf16>, vector<2x256xf32> -> vector<2x256xf32>
    %137 = arith.addf %133, %136 : vector<2x256xf32>
    %c0_49 = arith.constant 0 : index
    %c0_50 = arith.constant 0 : index
    %138 = vector.load %arg8[%c0_49, %c0_50] : memref<1x256xf32, #tpu.memory_space<vmem>>, vector<1x256xf32>
    %139 = vector.broadcast %138 : vector<1x256xf32> to vector<2x256xf32>
    %140 = arith.addf %137, %139 : vector<2x256xf32>
    %cst_51 = arith.constant 0.000000e+00 : f32
    %141 = vector.broadcast %cst_51 : f32 to vector<2x256xf32>
    %142 = arith.cmpf oge, %140, %141 : vector<2x256xf32>
    %cst_52 = arith.constant 0.00999999977 : f32
    %143 = vector.broadcast %cst_52 : f32 to vector<2x256xf32>
    %144 = arith.mulf %143, %140 : vector<2x256xf32>
    %145 = arith.select %142, %140, %144 : vector<2x256xi1>, vector<2x256xf32>
    %146 = arith.truncf %145 : vector<2x256xf32> to vector<2x256xbf16>
    %c0_53 = arith.constant 0 : index
    %c0_54 = arith.constant 0 : index
    %147 = vector.load %arg9[%c0_53, %c0_54] : memref<256x128xbf16, #tpu.memory_space<vmem>>, vector<256x128xbf16>
    %cst_55 = arith.constant dense<0.000000e+00> : vector<2x128xf32>
    %148 = tpu.matmul %146, %147, %cst_55 {dimension_numbers = #tpu.dot_dimension_numbers<[1], [0], [0], [1], [0, 0, 1, 1], [], []>} : vector<2x256xbf16>, vector<256x128xbf16>, vector<2x128xf32> -> vector<2x128xf32>
    %c0_56 = arith.constant 0 : index
    %c0_57 = arith.constant 0 : index
    %149 = vector.load %arg10[%c0_56, %c0_57] : memref<1x128xf32, #tpu.memory_space<vmem>>, vector<1x128xf32>
    %150 = vector.broadcast %149 : vector<1x128xf32> to vector<2x128xf32>
    %151 = arith.addf %148, %150 : vector<2x128xf32>
    %152 = vector.extract_strided_slice %151 {offsets = [0, 0], sizes = [2, 6], strides = [1, 1]} : vector<2x128xf32> to vector<2x6xf32>
    %153 = vector.extract_strided_slice %151 {offsets = [0, 6], sizes = [2, 1], strides = [1, 1]} : vector<2x128xf32> to vector<2x1xf32>
    %154 = vector.shape_cast %152 : vector<2x6xf32> to vector<1x2x6xf32>
    %cst_58 = arith.constant dense<0.000000e+00> : vector<1xf32>
    %155 = vector.multi_reduction <add>, %154, %cst_58 [1, 2] : vector<1x2x6xf32> to vector<1xf32>
    %156 = vector.shape_cast %155 : vector<1xf32> to vector<1x1x1xf32>
    %157 = vector.extract %156[0, 0, 0] : f32 from vector<1x1x1xf32>
    %cst_59 = arith.constant 1.200000e+01 : f32
    %158 = arith.divf %157, %cst_59 : f32
    %159 = vector.broadcast %158 : f32 to vector<2x6xf32>
    %160 = arith.subf %152, %159 : vector<2x6xf32>
    %161 = vector.broadcast %153 : vector<2x1xf32> to vector<2x6xf32>
    %162 = arith.addf %161, %160 : vector<2x6xf32>
    %c0_60 = arith.constant 0 : index
    %c0_61 = arith.constant 0 : index
    %163 = vector.load %arg11[%c0_60, %c0_61] : memref<2x6xf32, #tpu.memory_space<vmem>>, vector<2x6xf32>
    tpu.vector_store %arg11[%c0_60, %c0_61], %162 {strides = array<i32>} : memref<2x6xf32, #tpu.memory_space<vmem>>, vector<2x6xf32>,
    return
  }
}

</mosaic_0001>

<bundles_post_ra>
// kernel: duel_cnn_forward.1
= control target key start
LH: loop header
LB: loop body
LE: loop exit
PB: predicated region body
PF: predicated region fallthrough
CT: control target
= control target key end

     0   :  { %v6542_v1 = vmov 0   ;;  %s8519_s0 = inlined_call_operand.vmem [shape: bf16[1152,256], index: 0, kind: input, shape index: {}]   ;;  %s8520_s1 = inlined_call_operand.vmem [shape: bf16[256,32], index: 1, kind: input, shape index: {}]   ;;  %s8521_s2 = inlined_call_operand.vmem [shape: f32[1,32], index: 2, kind: input, shape index: {}]   ;;  %s8522_s3 = inlined_call_operand.vmem [shape: bf16[512,64], index: 3, kind: input, shape index: {}]   ;;  %s8523_s4 = inlined_call_operand.vmem [shape: f32[1,64], index: 4, kind: input, shape index: {}]   ;;  %s8524_s5 = inlined_call_operand.vmem [shape: bf16[576,64], index: 5, kind: input, shape index: {}]   ;;  %s8525_s6 = inlined_call_operand.vmem [shape: f32[1,64], index: 6, kind: input, shape index: {}]   ;;  %s8526_s7 = inlined_call_operand.vmem [shape: bf16[256,256], index: 7, kind: input, shape index: {}]   ;;  %s8527_s8 = inlined_call_operand.vmem [shape: f32[1,256], index: 8, kind: input, shape index: {}]   ;;  %s8528_s9 = inlined_call_operand.vmem [shape: bf16[256,128], index: 9, kind: input, shape index: {}]   ;;  %s8529_s10 = inlined_call_operand.vmem [shape: f32[1,128], index: 10, kind: input, shape index: {}]   ;;  %s8530_s11 = inlined_call_operand.hbm [shape: f32[2,6], index: 11, kind: output, shape index: {0}]   ;;  %s8531_s12 = inlined_call_operand.vmem [shape: f32[8,64], index: 12, kind: output, shape index: {1}]  }
   0x1   :  { %v6152_v0 = vld [vmem:[%s8520_s1] sm:$0xff]   ;;  %1041 = vmatprep.subr.bf16.mxu0 %v6542_v1  ;;  %v6153_v2 = vld [vmem:[%s8520_s1 + $0x8] sm:$0xff]   ;;  %v6154_v3 = vld [vmem:[%s8520_s1 + $0x10] sm:$0xff]  }
   0x2   :  { %1042 = vmatpush1.bf16.msra.mxu0 %v6152_v0  ;;  %v6155_v4 = vld [vmem:[%s8520_s1 + $0x18] sm:$0xff]   ;;  %v6156_v5 = vld [vmem:[%s8520_s1 + $0x20] sm:$0xff]   ;;  %v6157_v7 = vld [vmem:[%s8520_s1 + $0x28] sm:$0xff]  }
   0x3   :  { %1043 = vmatprep.subr.bf16.mxu0 %v6542_v1  ;;  %v6170_v6 = vld [vmem:[%s8519_s0 + $0x4] ss:$8 sps:$4 sm:$0xff]   ;;  %v6158_v8 = vld [vmem:[%s8520_s1 + $0x30] sm:$0xff]   ;;  %v6159_v9 = vld [vmem:[%s8520_s1 + $0x38] sm:$0xff]  }
   0x4   :  { %1073 = vmatprep.mubr.bf16.mxu0 %v6170_v6  ;;  %v6160_v10 = vld [vmem:[%s8520_s1 + $0x40] sm:$0xff]   ;;  %v6161_v11 = vld [vmem:[%s8520_s1 + $0x48] sm:$0xff]   ;;  %v6162_v12 = vld [vmem:[%s8520_s1 + $0x50] sm:$0xff]  }
   0x5   :  { %v6163_v13 = vld [vmem:[%s8520_s1 + $0x58] sm:$0xff]   ;;  %v6164_v14 = vld [vmem:[%s8520_s1 + $0x60] sm:$0xff]   ;;  %v6165_v15 = vld [vmem:[%s8520_s1 + $0x68] sm:$0xff]  }
   0x6   :  { %1044 = vmatpush1.bf16.msra.mxu0 %v6153_v2  ;;  %v6166_v16 = vld [vmem:[%s8520_s1 + $0x70] sm:$0xff]   ;;  %v6167_v17 = vld [vmem:[%s8520_s1 + $0x78] sm:$0xff]   ;;  %v6168_v18 = vld [vmem:[%s8519_s0] ss:$8 sps:$4 sm:$0xff]  }
   0x7   :  { %1045 = vmatprep.subr.bf16.mxu0 %v6542_v1  ;;  %v6171_v19 = vld [vmem:[%s8519_s0 + $0x14] ss:$8 sps:$4 sm:$0xff]   ;;  %v6173_v20 = vld [vmem:[%s8519_s0 + $0x10] ss:$8 sps:$4 sm:$0xff]   ;;  %v6174_v21 = vld [vmem:[%s8519_s0 + $0x24] ss:$8 sps:$4 sm:$0xff]  }
   0x8   :  { %v6176_v22 = vld [vmem:[%s8519_s0 + $0x20] ss:$8 sps:$4 sm:$0xff]   ;;  %v6177_v23 = vld [vmem:[%s8519_s0 + $0x34] ss:$8 sps:$4 sm:$0xff]   ;;  %v6179_v24 = vld [vmem:[%s8519_s0 + $0x30] ss:$8 sps:$4 sm:$0xff]  }
   0x9   :  { %v6180_v25 = vld [vmem:[%s8519_s0 + $0x44] ss:$8 sps:$4 sm:$0xff]   ;;  %v6182_v26 = vld [vmem:[%s8519_s0 + $0x40] ss:$8 sps:$4 sm:$0xff]   ;;  %v6183_v27 = vld [vmem:[%s8519_s0 + $0x54] ss:$8 sps:$4 sm:$0xff]  }
   0xa   :  { %1046 = vmatpush1.bf16.msra.mxu0 %v6154_v3  ;;  %v6185_v28 = vld [vmem:[%s8519_s0 + $0x50] ss:$8 sps:$4 sm:$0xff]   ;;  %v6186_v29 = vld [vmem:[%s8519_s0 + $0x64] ss:$8 sps:$4 sm:$0xff]   ;;  %v6188_v30 = vld [vmem:[%s8519_s0 + $0x60] ss:$8 sps:$4 sm:$0xff]  }
   0xb   :  { %1047 = vmatprep.subr.bf16.mxu0 %v6542_v1  ;;  %v6189_v31 = vld [vmem:[%s8519_s0 + $0x74] ss:$8 sps:$4 sm:$0xff]   ;;  %v6191_v32 = vld [vmem:[%s8519_s0 + $0x70] ss:$8 sps:$4 sm:$0xff]   ;;  %v6192_v33 = vld [vmem:[%s8519_s0 + $0x84] ss:$8 sps:$4 sm:$0xff]  }
   0xc   :  { %v6194_v34 = vld [vmem:[%s8519_s0 + $0x80] ss:$8 sps:$4 sm:$0xff]   ;;  %v6195_v35 = vld [vmem:[%s8519_s0 + $0x94] ss:$8 sps:$4 sm:$0xff]   ;;  %v6197_v36 = vld [vmem:[%s8519_s0 + $0x90] ss:$8 sps:$4 sm:$0xff]  }
   0xd   :  { %v6198_v37 = vld [vmem:[%s8519_s0 + $0xa4] ss:$8 sps:$4 sm:$0xff]   ;;  %v6200_v38 = vld [vmem:[%s8519_s0 + $0xa0] ss:$8 sps:$4 sm:$0xff]   ;;  %v6201_v39 = vld [vmem:[%s8519_s0 + $0xb4] ss:$8 sps:$4 sm:$0xff]  }
   0xe   :  { %1048 = vmatpush1.bf16.msra.mxu0 %v6155_v4 }
   0xf   :  { %1049 = vmatprep.subr.bf16.mxu0 %v6542_v1 }
  0x12   :  { %1050 = vmatpush1.bf16.msra.mxu0 %v6156_v5 }
  0x13   :  { %1051 = vmatprep.subr.bf16.mxu0 %v6542_v1 }
  0x16   :  { %1052 = vmatpush1.bf16.msra.mxu0 %v6157_v7 }
  0x17   :  { %1053 = vmatprep.subr.bf16.mxu0 %v6542_v1 }
  0x1a   :  { %1054 = vmatpush1.bf16.msra.mxu0 %v6158_v8 }
  0x1b   :  { %1055 = vmatprep.subr.bf16.mxu0 %v6542_v1 }
  0x1e   :  { %1056 = vmatpush1.bf16.msra.mxu0 %v6159_v9 }
  0x1f   :  { %1057 = vmatprep.subr.bf16.mxu0 %v6542_v1 }
  0x22   :  { %1058 = vmatpush1.bf16.msra.mxu0 %v6160_v10 }
  0x23   :  { %1059 = vmatprep.subr.bf16.mxu0 %v6542_v1 }
  0x26   :  { %1060 = vmatpush1.bf16.msra.mxu0 %v6161_v11 }
  0x27   :  { %1061 = vmatprep.subr.bf16.mxu0 %v6542_v1 }
  0x2a   :  { %1062 = vmatpush1.bf16.msra.mxu0 %v6162_v12 }
  0x2b   :  { %1063 = vmatprep.subr.bf16.mxu0 %v6542_v1 }
  0x2e   :  { %1064 = vmatpush1.bf16.msra.mxu0 %v6163_v13 }
  0x2f   :  { %1065 = vmatprep.subr.bf16.mxu0 %v6542_v1 }
  0x32   :  { %1066 = vmatpush1.bf16.msra.mxu0 %v6164_v14 }
  0x33   :  { %1067 = vmatprep.subr.bf16.mxu0 %v6542_v1 }
  0x36   :  { %1068 = vmatpush1.bf16.msra.mxu0 %v6165_v15 }
  0x37   :  { %1069 = vmatprep.subr.bf16.mxu0 %v6542_v1 }
  0x3a   :  { %1070 = vmatpush1.bf16.msra.mxu0 %v6166_v16 }
  0x3b   :  { %1071 = vmatprep.subr.bf16.mxu0 %v6542_v1 }
  0x3e   :  { %1072 = vmatpush1.bf16.msra.mxu0 %v6167_v17 }
  0x41   :  { %1074 = vmatmul.mubr.bf16.vlgmr.msra.gmra.mrb[0].mxu0 %v6168_v18 }
  0x42   :  { %1081 = vmatprep.mubr.bf16.mxu0 %v6171_v19 }
  0x49   :  { %1082 = vmatmul.mubr.bf16.gmra.mrb[4].mxu0 %v6173_v20 }
  0x4a   :  { %1089 = vmatprep.mubr.bf16.mxu0 %v6174_v21 }
  0x51   :  { %1090 = vmatmul.mubr.bf16.gmra.mrb[8].mxu0 %v6176_v22 }
  0x52   :  { %1097 = vmatprep.mubr.bf16.mxu0 %v6177_v23 }
  0x59   :  { %1098 = vmatmul.mubr.bf16.gmra.mrb[12].mxu0 %v6179_v24 }
  0x5a   :  { %1105 = vmatprep.mubr.bf16.mxu0 %v6180_v25 }
  0x61   :  { %1106 = vmatmul.mubr.bf16.gmra.mrb[16].mxu0 %v6182_v26 }
  0x62   :  { %1113 = vmatprep.mubr.bf16.mxu0 %v6183_v27 }
  0x69   :  { %1114 = vmatmul.mubr.bf16.gmra.mrb[20].mxu0 %v6185_v28 }
  0x6a   :  { %1121 = vmatprep.mubr.bf16.mxu0 %v6186_v29 }
  0x71   :  { %1122 = vmatmul.mubr.bf16.gmra.mrb[24].mxu0 %v6188_v30 }
  0x72   :  { %1129 = vmatprep.mubr.bf16.mxu0 %v6189_v31 }
  0x79   :  { %1130 = vmatmul.mubr.bf16.gmra.mrb[28].mxu0 %v6191_v32 }
  0x7a   :  { %1137 = vmatprep.mubr.bf16.mxu0 %v6192_v33 }
  0x81   :  { %1138 = vmatmul.mubr.bf16.gmra.mrb[32].mxu0 %v6194_v34 }
  0x82   :  { %1145 = vmatprep.mubr.bf16.mxu0 %v6195_v35 }
  0x89   :  { %1146 = vmatmul.mubr.bf16.gmra.mrb[36].mxu0 %v6197_v36 }
  0x8a   :  { %1153 = vmatprep.mubr.bf16.mxu0 %v6198_v37 }
  0x91   :  { %1154 = vmatmul.mubr.bf16.gmra.mrb[40].mxu0 %v6200_v38 }
  0x92   :  { %18 = vsyncpa [#allocation3], 0  ;;  %1161 = vmatprep.mubr.bf16.mxu0 %v6201_v39  ;;  %v6203_v40 = vld [vmem:[%s8519_s0 + $0xb0] ss:$8 sps:$4 sm:$0xff]   ;;  %v6204_v41 = vld [vmem:[%s8519_s0 + $0xc4] ss:$8 sps:$4 sm:$0xff]  }
  0x93   :  { %v6206_v42 = vld [vmem:[%s8519_s0 + $0xc0] ss:$8 sps:$4 sm:$0xff]   ;;  %v6207_v43 = vld [vmem:[%s8519_s0 + $0xd4] ss:$8 sps:$4 sm:$0xff]   ;;  %v6209_v44 = vld [vmem:[%s8519_s0 + $0xd0] ss:$8 sps:$4 sm:$0xff]  }
  0x94   :  { %v6210_v45 = vld [vmem:[%s8519_s0 + $0xe4] ss:$8 sps:$4 sm:$0xff]   ;;  %v6212_v46 = vld [vmem:[%s8519_s0 + $0xe0] ss:$8 sps:$4 sm:$0xff]   ;;  %v6213_v47 = vld [vmem:[%s8519_s0 + $0xf4] ss:$8 sps:$4 sm:$0xff]  }
  0x95   :  { %v6215_v48 = vld [vmem:[%s8519_s0 + $0xf0] ss:$8 sps:$4 sm:$0xff]   ;;  %v6216_v49 = vld [vmem:[%s8519_s0 + $0x104] ss:$8 sps:$4 sm:$0xff]   ;;  %v6218_v50 = vld [vmem:[%s8519_s0 + $0x100] ss:$8 sps:$4 sm:$0xff]  }
  0x96   :  { %v6219_v51 = vld [vmem:[%s8519_s0 + $0x114] ss:$8 sps:$4 sm:$0xff]   ;;  %v6543_v53 = vmov 0.0   ;;  %v6221_v55 = vld [vmem:[%s8519_s0 + $0x110] ss:$8 sps:$4 sm:$0xff]   ;;  %vm6544_vm0 = vmmov 0  }
  0x97   :  { %v6249_v52 = vld [vmem:[%s8522_s3 + $0x10] sm:$0xff]   ;;  %5652 = vmatprep.subr.bf16.mxu1 %v6543_v53  ;;  %6036 = vmatprep.subr.bf16.mxu0 %v6543_v53  ;;  %v6250_v54 = vld [vmem:[%s8522_s3 + $0x18] sm:$0xff]   ;;  %v6222_v56 = vld [vmem:[%s8519_s0 + $0x124] ss:$8 sps:$4 sm:$0xff]   ;;  %vm1935_vm1 = vcmask 1043456   ;;  %vm1957_vm2 = vcmask 261120  }
  0x98   :  { %5653 = vmatpush3.bf16.msra.mxu1 %v6249_v52  ;;  %5656 = vmatprep.mubr.msk.bf16.mxu1 %vm6544_vm0, %v6543_v53  ;;  %v6224_v57 = vld [vmem:[%s8519_s0 + $0x120] ss:$8 sps:$4 sm:$0xff]   ;;  %v6225_v58 = vld [vmem:[%s8519_s0 + $0x134] ss:$8 sps:$4 sm:$0xff]   ;;  %v6227_v59 = vld [vmem:[%s8519_s0 + $0x130] ss:$8 sps:$4 sm:$0xff]  }
  0x99   :  { %1162 = vmatmul.mubr.bf16.gmra.mrb[44].mxu0 %v6203_v40  ;;  %5654 = vmatprep.subr.bf16.mxu1 %v6543_v53  ;;  %v6228_v60 = vld [vmem:[%s8519_s0 + $0x144] ss:$8 sps:$4 sm:$0xff]   ;;  %v6230_v61 = vld [vmem:[%s8519_s0 + $0x140] ss:$8 sps:$4 sm:$0xff]   ;;  %v6231_v62 = vld [vmem:[%s8519_s0 + $0x154] ss:$8 sps:$4 sm:$0xff]  }
  0x9a   :  { %1169 = vmatprep.mubr.bf16.mxu0 %v6204_v41  ;;  %v6233_v63 = vld [vmem:[%s8519_s0 + $0x150] ss:$8 sps:$4 sm:$0xff]   ;;  %v6234_v0 = vld [vmem:[%s8519_s0 + $0x164] ss:$8 sps:$4 sm:$0xff]   ;;  %v6236_v2 = vld [vmem:[%s8519_s0 + $0x160] ss:$8 sps:$4 sm:$0xff]  }
  0x9b   :  { %v6237_v3 = vld [vmem:[%s8519_s0 + $0x174] ss:$8 sps:$4 sm:$0xff]   ;;  %v6239_v4 = vld [vmem:[%s8519_s0 + $0x170] ss:$8 sps:$4 sm:$0xff]   ;;  %v6240_v5 = vld [vmem:[%s8519_s0 + $0x184] ss:$8 sps:$4 sm:$0xff]  }
  0x9c   :  { %5655 = vmatpush3.bf16.msra.mxu1 %v6250_v54  ;;  %v6242_v6 = vld [vmem:[%s8519_s0 + $0x180] ss:$8 sps:$4 sm:$0xff]   ;;  %v6243_v7 = vld [vmem:[%s8519_s0 + $0x194] ss:$8 sps:$4 sm:$0xff]   ;;  %v6245_v8 = vld [vmem:[%s8519_s0 + $0x190] ss:$8 sps:$4 sm:$0xff]  }
  0x9d   :  { %5676 = vmatprep.subr.bf16.mxu1 %v6543_v53  ;;  %v6246_v9 = vld [vmem:[%s8519_s0 + $0x1a4] ss:$8 sps:$4 sm:$0xff]   ;;  %v6248_v10 = vld [vmem:[%s8519_s0 + $0x1a0] ss:$8 sps:$4 sm:$0xff]   ;;  %v6252_v11 = vld [vmem:[%s8519_s0 + $0x1b4] ss:$8 sps:$4 sm:$0xff]  }
  0x9e   :  { %v6856_v12 = vld [vmem:[%s8521_s2] ss:$0 sm:$0xff]  ;;  %v6254_v16 = vld [vmem:[%s8519_s0 + $0x1b0] ss:$8 sps:$4 sm:$0xff]   ;;  %v6255_v18 = vld [vmem:[%s8519_s0 + $0x1c4] ss:$8 sps:$4 sm:$0xff]  }
  0x9f   :  { %v6257_v27 = vld [vmem:[%s8519_s0 + $0x1c0] ss:$8 sps:$4 sm:$0xff]   ;;  %v6259_v29 = vld [vmem:[%s8519_s0 + $0x1d4] ss:$8 sps:$4 sm:$0xff]   ;;  %v6261_v38 = vld [vmem:[%s8519_s0 + $0x1d0] ss:$8 sps:$4 sm:$0xff]  }
  0xa0   :  { %v6262_v40 = vld [vmem:[%s8519_s0 + $0x1e4] ss:$8 sps:$4 sm:$0xff]   ;;  %vm3882_vm3 = vcmask 523264   ;;  %vm5059_vm6 = vcmask 41984   ;;  %s6546_s16 = smov [#allocation2]  }
  0xa1   :  { %1170 = vmatmul.mubr.bf16.gmra.mrb[48].mxu0 %v6206_v42 }
  0xa2   :  { %1177 = vmatprep.mubr.bf16.mxu0 %v6207_v43 }
  0xa9   :  { %1178 = vmatmul.mubr.bf16.gmra.mrb[52].mxu0 %v6209_v44 }
  0xaa   :  { %1185 = vmatprep.mubr.bf16.mxu0 %v6210_v45 }
  0xb1   :  { %1186 = vmatmul.mubr.bf16.gmra.mrb[56].mxu0 %v6212_v46 }
  0xb2   :  { %1193 = vmatprep.mubr.bf16.mxu0 %v6213_v47 }
  0xb9   :  { %1194 = vmatmul.mubr.bf16.gmra.mrb[60].mxu0 %v6215_v48 }
  0xba   :  { %1201 = vmatprep.mubr.bf16.mxu0 %v6216_v49  ;;  %v6264_v49 = vld [vmem:[%s8519_s0 + $0x1e0] ss:$8 sps:$4 sm:$0xff]  }
  0xc1   :  { %1202 = vmatmul.mubr.bf16.gmra.mrb[64].mxu0 %v6218_v50 }
  0xc2   :  { %1209 = vmatprep.mubr.bf16.mxu0 %v6219_v51  ;;  %v6265_v51 = vld [vmem:[%s8519_s0 + $0x1f4] ss:$8 sps:$4 sm:$0xff]  }
  0xc9   :  { %1210 = vmatmul.mubr.bf16.gmra.mrb[68].mxu0 %v6221_v55 }
  0xca   :  { %1217 = vmatprep.mubr.bf16.mxu0 %v6222_v56 }
  0xd1   :  { %1218 = vmatmul.mubr.bf16.gmra.mrb[72].mxu0 %v6224_v57 }
  0xd2   :  { %1225 = vmatprep.mubr.bf16.mxu0 %v6225_v58 }
  0xd9   :  { %1226 = vmatmul.mubr.bf16.gmra.mrb[76].mxu0 %v6227_v59 }
  0xda   :  { %1233 = vmatprep.mubr.bf16.mxu0 %v6228_v60 }
  0xe1   :  { %1234 = vmatmul.mubr.bf16.gmra.mrb[80].mxu0 %v6230_v61  ;;  %v6267_v61 = vld [vmem:[%s8519_s0 + $0x1f0] ss:$8 sps:$4 sm:$0xff]  }
  0xe2   :  { %1241 = vmatprep.mubr.bf16.mxu0 %v6231_v62 }
  0xe9   :  { %1242 = vmatmul.mubr.bf16.gmra.mrb[84].mxu0 %v6233_v63  ;;  %v6269_v63 = vld [vmem:[%s8519_s0 + $0x204] ss:$8 sps:$4 sm:$0xff]  }
  0xea   :  { %1249 = vmatprep.mubr.bf16.mxu0 %v6234_v0 }
  0xf1   :  { %1250 = vmatmul.mubr.bf16.gmra.mrb[88].mxu0 %v6236_v2 }
  0xf2   :  { %1257 = vmatprep.mubr.bf16.mxu0 %v6237_v3 }
  0xf9   :  { %1258 = vmatmul.mubr.bf16.gmra.mrb[92].mxu0 %v6239_v4 }
  0xfa   :  { %1265 = vmatprep.mubr.bf16.mxu0 %v6240_v5 }
 0x101   :  { %1266 = vmatmul.mubr.bf16.gmra.mrb[96].mxu0 %v6242_v6 }
 0x102   :  { %1273 = vmatprep.mubr.bf16.mxu0 %v6243_v7 }
 0x109   :  { %1274 = vmatmul.mubr.bf16.gmra.mrb[100].mxu0 %v6245_v8 }
 0x10a   :  { %1281 = vmatprep.mubr.bf16.mxu0 %v6246_v9  ;;  %v6271_v9 = vld [vmem:[%s8519_s0 + $0x200] ss:$8 sps:$4 sm:$0xff]  }
 0x111   :  { %1282 = vmatmul.mubr.bf16.gmra.mrb[104].mxu0 %v6248_v10 }
 0x112   :  { %1289 = vmatprep.mubr.bf16.mxu0 %v6252_v11  ;;  %v6272_v11 = vld [vmem:[%s8519_s0 + $0x214] ss:$8 sps:$4 sm:$0xff]  }
 0x114   :  { %v1075_v13 = vpop.f32.mrb[0].mxu0 }
 0x115   :  { %v1076_v14 = vadd.f32 %v6856_v12, %v1075_v13  ;;  %v1077_v15 = vpop.f32.mrb[1].mxu0 }
 0x116   :  { %v1078_v17 = vpop.f32.mrb[2].mxu0 }
 0x117   :  { %v1079_v19 = vadd.f32 %v6856_v12, %v1078_v17  ;;  %v1080_v20 = vpop.f32.mrb[3].mxu0  ;;  %v1650_v21 = vmax.f32 %v1076_v14, 0.0 }
 0x119   :  { %v1651_v22 = vmax.f32 %v1079_v19, 0.0  ;;  %1290 = vmatmul.mubr.bf16.gmra.mrb[108].mxu0 %v6254_v16 }
 0x11a   :  { %1297 = vmatprep.mubr.bf16.mxu0 %v6255_v18 }
 0x11b   :  { %v6866_v23 = vpack.c.bf16 %v1651_v22, %v1650_v21 }
 0x11c   :  { %v1083_v24 = vpop.f32.mrb[4].mxu0 }
 0x11d   :  { %v1084_v25 = vadd.f32 %v6856_v12, %v1083_v24  ;;  %v1085_v26 = vpop.f32.mrb[5].mxu0  ;;  %v6251_v24 = vld [vmem:[%s8522_s3] sm:$0xff]  }
 0x11e   :  { %v1086_v28 = vpop.f32.mrb[6].mxu0  ;;  %v6274_v26 = vld [vmem:[%s8519_s0 + $0x210] ss:$8 sps:$4 sm:$0xff]  }
 0x11f   :  { %v1087_v30 = vadd.f32 %v6856_v12, %v1086_v28  ;;  %v1088_v31 = vpop.f32.mrb[7].mxu0  ;;  %v1652_v32 = vmax.f32 %v1084_v25, 0.0 }
 0x121   :  { %v1653_v33 = vmax.f32 %v1087_v30, 0.0  ;;  %1298 = vmatmul.mubr.bf16.gmra.mrb[112].mxu0 %v6257_v27  ;;  %v6276_v30 = vld [vmem:[%s8519_s0 + $0x224] ss:$8 sps:$4 sm:$0xff]  }
 0x122   :  { %1305 = vmatprep.mubr.bf16.mxu0 %v6259_v29 }
 0x123   :  { %v6876_v34 = vpack.c.bf16 %v1653_v33, %v1652_v32  ;;  %v6258_v33 = vld [vmem:[%s8522_s3 + $0x8] sm:$0xff]  }
 0x124   :  { %v1091_v35 = vpop.f32.mrb[8].mxu0 }
 0x125   :  { %v1092_v36 = vadd.f32 %v6856_v12, %v1091_v35  ;;  %v1093_v37 = vpop.f32.mrb[9].mxu0 }
 0x126   :  { %v1094_v39 = vpop.f32.mrb[10].mxu0 }
 0x127   :  { %v1095_v41 = vadd.f32 %v6856_v12, %v1094_v39  ;;  %v1096_v42 = vpop.f32.mrb[11].mxu0  ;;  %v1654_v43 = vmax.f32 %v1092_v36, 0.0 }
 0x129   :  { %v1655_v44 = vmax.f32 %v1095_v41, 0.0  ;;  %1306 = vmatmul.mubr.bf16.gmra.mrb[116].mxu0 %v6261_v38  ;;  %v6278_v41 = vld [vmem:[%s8519_s0 + $0x220] ss:$8 sps:$4 sm:$0xff]  }
 0x12a   :  { %1313 = vmatprep.mubr.bf16.mxu0 %v6262_v40 }
 0x12b   :  { %v6886_v45 = vpack.c.bf16 %v1655_v44, %v1654_v43 }
 0x12c   :  { %v1099_v46 = vpop.f32.mrb[12].mxu0 }
 0x12d   :  { %v1100_v47 = vadd.f32 %v6856_v12, %v1099_v46  ;;  %v1101_v48 = vpop.f32.mrb[13].mxu0  ;;  %v6279_v46 = vld [vmem:[%s8519_s0 + $0x234] ss:$8 sps:$4 sm:$0xff]  }
 0x12e   :  { %v1102_v50 = vpop.f32.mrb[14].mxu0 }
 0x12f   :  { %v1103_v52 = vadd.f32 %v6856_v12, %v1102_v50  ;;  %v1104_v54 = vpop.f32.mrb[15].mxu0  ;;  %v1656_v55 = vmax.f32 %v1100_v47, 0.0 }
 0x131   :  { %v1657_v56 = vmax.f32 %v1103_v52, 0.0  ;;  %1314 = vmatmul.mubr.bf16.gmra.mrb[120].mxu0 %v6264_v49 }
 0x132   :  { %1321 = vmatprep.mubr.bf16.mxu0 %v6265_v51 }
 0x133   :  { %v6896_v57 = vpack.c.bf16 %v1657_v56, %v1656_v55  ;;  %v6281_v56 = vld [vmem:[%s8519_s0 + $0x230] ss:$8 sps:$4 sm:$0xff]  }
 0x134   :  { %v1107_v58 = vpop.f32.mrb[16].mxu0 }
 0x135   :  { %v1108_v59 = vadd.f32 %v6856_v12, %v1107_v58  ;;  %v1109_v60 = vpop.f32.mrb[17].mxu0 }
 0x136   :  { %v1110_v62 = vpop.f32.mrb[18].mxu0 }
 0x137   :  { %v1111_v0 = vadd.f32 %v6856_v12, %v1110_v62  ;;  %v1112_v2 = vpop.f32.mrb[19].mxu0  ;;  %v1658_v3 = vmax.f32 %v1108_v59, 0.0 }
 0x139   :  { %v1659_v4 = vmax.f32 %v1111_v0, 0.0  ;;  %1322 = vmatmul.mubr.bf16.gmra.mrb[124].mxu0 %v6267_v61  ;;  %v6283_v61 = vld [vmem:[%s8519_s0 + $0x244] ss:$8 sps:$4 sm:$0xff]  }
 0x13a   :  { %1329 = vmatprep.mubr.bf16.mxu0 %v6269_v63 }
 0x13b   :  { %v6906_v5 = vpack.c.bf16 %v1659_v4, %v1658_v3 }
 0x13c   :  { %v1115_v6 = vpop.f32.mrb[20].mxu0 }
 0x13d   :  { %v1116_v7 = vadd.f32 %v6856_v12, %v1115_v6  ;;  %v1117_v8 = vpop.f32.mrb[21].mxu0  ;;  %v1936_v22 = vrot.slane %v6906_v5, 4 }
 0x13e   :  { %v1118_v10 = vpop.f32.mrb[22].mxu0  ;;  %v6285_v8 = vld [vmem:[%s8519_s0 + $0x240] ss:$8 sps:$4 sm:$0xff]  }
 0x13f   :  { %v1119_v13 = vadd.f32 %v6856_v12, %v1118_v10  ;;  %v1120_v14 = vpop.f32.mrb[23].mxu0  ;;  %v1660_v15 = vmax.f32 %v1116_v7, 0.0 }
 0x140   :  { %v6286_v14 = vld [vmem:[%s8519_s0 + $0x254] ss:$8 sps:$4 sm:$0xff]  }
 0x141   :  { %v1661_v16 = vmax.f32 %v1119_v13, 0.0  ;;  %1330 = vmatmul.mubr.bf16.gmra.mrb[128].mxu0 %v6271_v9 }
 0x142   :  { %1337 = vmatprep.mubr.bf16.mxu0 %v6272_v11 }
 0x143   :  { %v1799_v17 = vpack.c.bf16 %v1661_v16, %v1660_v15 }
 0x144   :  { %v1123_v18 = vpop.f32.mrb[24].mxu0 }
 0x145   :  { %v1937_v19 = vrot.slane %v1799_v17, 4  ;;  %v1124_v20 = vadd.f32 %v6856_v12, %v1123_v18  ;;  %v1125_v21 = vpop.f32.mrb[25].mxu0 }
 0x146   :  { %v1126_v25 = vpop.f32.mrb[26].mxu0  ;;  %v6288_v21 = vld [vmem:[%s8519_s0 + $0x250] ss:$8 sps:$4 sm:$0xff]  }
 0x147   :  { %v1127_v27 = vadd.f32 %v6856_v12, %v1126_v25  ;;  %v1128_v28 = vpop.f32.mrb[27].mxu0  ;;  %v1938_v29 = vsel %vm1935_vm1, %v1936_v22, %v1937_v19  ;;  %v1662_v31 = vmax.f32 %v1124_v20, 0.0 }
 0x148   :  { %5657 = vmatmul.mubr.msk.bf16.vlgmr.msra.gmra.mrb[0].mxu1 %vm1957_vm2, %v1938_v29 }
 0x149   :  { %v1663_v32 = vmax.f32 %v1127_v27, 0.0  ;;  %5677 = vmatpush3.bf16.msra.mxu1 %v6251_v24  ;;  %5660 = vmatprep.mubr.msk.bf16.mxu1 %vm6544_vm0, %v6543_v53 }
 0x14a   :  { %5678 = vmatprep.subr.bf16.mxu1 %v6543_v53  ;;  %1338 = vmatmul.mubr.bf16.gmra.mrb[132].mxu0 %v6274_v26  ;;  %v6290_v26 = vld [vmem:[%s8519_s0 + $0x264] ss:$8 sps:$4 sm:$0xff]  }
 0x14b   :  { %v1800_v35 = vpack.c.bf16 %v1663_v32, %v1662_v31  ;;  %1345 = vmatprep.mubr.bf16.mxu0 %v6276_v30  ;;  %v6268_v30 = vld [vmem:[%s8522_s3 + $0x20] sm:$0xff]  }
 0x14c   :  { %v1131_v36 = vpop.f32.mrb[28].mxu0 }
 0x14d   :  { %v1939_v37 = vrot.slane %v1800_v35, 4  ;;  %v1132_v38 = vadd.f32 %v6856_v12, %v1131_v36  ;;  %v1133_v39 = vpop.f32.mrb[29].mxu0  ;;  %5679 = vmatpush3.bf16.msra.mxu1 %v6258_v33  ;;  %v6292_v35 = vld [vmem:[%s8519_s0 + $0x260] ss:$8 sps:$4 sm:$0xff]  }
 0x14e   :  { %v1134_v40 = vpop.f32.mrb[30].mxu0  ;;  %5700 = vmatprep.subr.bf16.mxu1 %v6543_v53  ;;  %v6293_v39 = vld [vmem:[%s8519_s0 + $0x274] ss:$8 sps:$4 sm:$0xff]  }
 0x14f   :  { %v1135_v42 = vadd.f32 %v6856_v12, %v1134_v40  ;;  %v1136_v43 = vpop.f32.mrb[31].mxu0  ;;  %v1940_v44 = vsel %vm1935_vm1, %v1937_v19, %v1939_v37  ;;  %v1664_v47 = vmax.f32 %v1132_v38, 0.0  ;;  %v6275_v40 = vld [vmem:[%s8522_s3 + $0x28] sm:$0xff]  }
 0x150   :  { %5661 = vmatmul.mubr.msk.bf16.gmra.mrb[4].mxu1 %vm1957_vm2, %v1940_v44 }
 0x151   :  { %v1665_v48 = vmax.f32 %v1135_v42, 0.0  ;;  %5664 = vmatprep.mubr.msk.bf16.mxu1 %vm6544_vm0, %v6543_v53 }
 0x152   :  { %1346 = vmatmul.mubr.bf16.gmra.mrb[136].mxu0 %v6278_v41 }
 0x153   :  { %v1801_v49 = vpack.c.bf16 %v1665_v48, %v1664_v47  ;;  %1353 = vmatprep.mubr.bf16.mxu0 %v6279_v46  ;;  %v6295_v47 = vld [vmem:[%s8519_s0 + $0x270] ss:$8 sps:$4 sm:$0xff]  }
 0x154   :  { %v1139_v50 = vpop.f32.mrb[32].mxu0 }
 0x155   :  { %v1941_v51 = vrot.slane %v1801_v49, 4  ;;  %v1140_v52 = vadd.f32 %v6856_v12, %v1139_v50  ;;  %v1141_v54 = vpop.f32.mrb[33].mxu0 }
 0x156   :  { %v1142_v55 = vpop.f32.mrb[34].mxu0 }
 0x157   :  { %v1143_v58 = vadd.f32 %v6856_v12, %v1142_v55  ;;  %v1144_v59 = vpop.f32.mrb[35].mxu0  ;;  %v1942_v60 = vsel %vm1935_vm1, %v1939_v37, %v1941_v51  ;;  %v1666_v62 = vmax.f32 %v1140_v52, 0.0 }
 0x158   :  { %5665 = vmatmul.mubr.msk.bf16.gmra.mrb[8].mxu1 %vm1957_vm2, %v1942_v60  ;;  %v6298_v60 = vld [vmem:[%s8519_s0 + $0x280] ss:$8 sps:$4 sm:$0xff]  }
 0x159   :  { %v1667_v63 = vmax.f32 %v1143_v58, 0.0  ;;  %5668 = vmatprep.mubr.msk.bf16.mxu1 %vm6544_vm0, %v6543_v53 }
 0x15a   :  { %1354 = vmatmul.mubr.bf16.gmra.mrb[140].mxu0 %v6281_v56 }
 0x15b   :  { %v1802_v0 = vpack.c.bf16 %v1667_v63, %v1666_v62  ;;  %1361 = vmatprep.mubr.bf16.mxu0 %v6283_v61  ;;  %v6300_v63 = vld [vmem:[%s8519_s0 + $0x294] ss:$8 sps:$4 sm:$0xff]  }
 0x15c   :  { %v1147_v2 = vpop.f32.mrb[36].mxu0 }
 0x15d   :  { %v1943_v3 = vrot.slane %v1802_v0, 4  ;;  %v1148_v4 = vadd.f32 %v6856_v12, %v1147_v2  ;;  %v1149_v6 = vpop.f32.mrb[37].mxu0 }
 0x15e   :  { %v1150_v7 = vpop.f32.mrb[38].mxu0 }
 0x15f   :  { %v1944_v9 = vsel %vm1935_vm1, %v1941_v51, %v1943_v3  ;;  %v1668_v10 = vmax.f32 %v1148_v4, 0.0  ;;  %v1151_v11 = vadd.f32 %v6856_v12, %v1150_v7  ;;  %v1152_v13 = vpop.f32.mrb[39].mxu0  ;;  %v6296_v51 = vld [vmem:[%s8519_s0 + $0x284] ss:$8 sps:$4 sm:$0xff]  }
 0x160   :  { %5669 = vmatmul.mubr.msk.bf16.gmra.mrb[12].mxu1 %vm1957_vm2, %v1944_v9 }
 0x161   :  { %5672 = vmatprep.mubr.msk.bf16.mxu1 %vm6544_vm0, %v6543_v53  ;;  %v1669_v15 = vmax.f32 %v1151_v11, 0.0  ;;  %v6303_v11 = vld [vmem:[%s8519_s0 + $0x2a4] ss:$8 sps:$4 sm:$0xff]  }
 0x162   :  { %1362 = vmatmul.mubr.bf16.gmra.mrb[144].mxu0 %v6285_v8  ;;  %v6302_v8 = vld [vmem:[%s8519_s0 + $0x290] ss:$8 sps:$4 sm:$0xff]  }
 0x163   :  { %v6973_v16 = vpack.c.bf16 %v1669_v15, %v1668_v10  ;;  %1369 = vmatprep.mubr.bf16.mxu0 %v6286_v14 }
 0x164   :  { %v1155_v17 = vpop.f32.mrb[40].mxu0 }
 0x165   :  { %v1156_v18 = vadd.f32 %v6856_v12, %v1155_v17  ;;  %v1157_v19 = vpop.f32.mrb[41].mxu0 }
 0x166   :  { %v1158_v20 = vpop.f32.mrb[42].mxu0 }
 0x167   :  { %v1670_v22 = vmax.f32 %v1156_v18, 0.0  ;;  %v1159_v24 = vadd.f32 %v6856_v12, %v1158_v20  ;;  %v1160_v25 = vpop.f32.mrb[43].mxu0 }
 0x168   :  { %5673 = vmatmul.mubr.msk.bf16.gmra.mrb[16].mxu1 %vm1957_vm2, %v1943_v3 }
 0x169   :  { %5680 = vmatprep.mubr.msk.bf16.mxu1 %vm6544_vm0, %v6543_v53  ;;  %v1671_v27 = vmax.f32 %v1159_v24, 0.0 }
 0x16a   :  { %1370 = vmatmul.mubr.bf16.gmra.mrb[148].mxu0 %v6288_v21 }
 0x16b   :  { %v6986_v28 = vpack.c.bf16 %v1671_v27, %v1670_v22  ;;  %1377 = vmatprep.mubr.bf16.mxu0 %v6290_v26  ;;  %v6305_v22 = vld [vmem:[%s8519_s0 + $0x2a0] ss:$8 sps:$4 sm:$0xff]   ;;  %v6307_v27 = vld [vmem:[%s8519_s0 + $0x2b4] ss:$8 sps:$4 sm:$0xff]  }
 0x16c   :  { %v1163_v29 = vpop.f32.mrb[44].mxu0 }
 0x16d   :  { %v1164_v31 = vadd.f32 %v6856_v12, %v1163_v29  ;;  %v1165_v32 = vpop.f32.mrb[45].mxu0 }
 0x16e   :  { %v1166_v33 = vpop.f32.mrb[46].mxu0  ;;  %v6282_v32 = vld [vmem:[%s8522_s3 + $0x30] sm:$0xff]  }
 0x16f   :  { %v1672_v36 = vmax.f32 %v1164_v31, 0.0  ;;  %v1167_v37 = vadd.f32 %v6856_v12, %v1166_v33  ;;  %v1168_v38 = vpop.f32.mrb[47].mxu0 }
 0x170   :  { %5681 = vmatmul.mubr.msk.bf16.vlgmr.msra.gmra.mrb[20].mxu1 %vm1957_vm2, %v6866_v23 }
 0x171   :  { %5701 = vmatpush3.bf16.msra.mxu1 %v6268_v30  ;;  %5684 = vmatprep.mubr.msk.bf16.mxu1 %vm6544_vm0, %v6543_v53  ;;  %v1673_v41 = vmax.f32 %v1167_v37, 0.0 }
 0x172   :  { %5702 = vmatprep.subr.bf16.mxu1 %v6543_v53  ;;  %1378 = vmatmul.mubr.bf16.gmra.mrb[152].mxu0 %v6292_v35 }
 0x173   :  { %v7007_v42 = vpack.c.bf16 %v1673_v41, %v1672_v36  ;;  %1385 = vmatprep.mubr.bf16.mxu0 %v6293_v39 }
 0x174   :  { %v1171_v43 = vpop.f32.mrb[48].mxu0 }
 0x175   :  { %5703 = vmatpush3.bf16.msra.mxu1 %v6275_v40  ;;  %v1172_v44 = vadd.f32 %v6856_v12, %v1171_v43  ;;  %v1173_v23 = vpop.f32.mrb[49].mxu0  ;;  %v6310_v43 = vld [vmem:[%s8519_s0 + $0x2c4] ss:$8 sps:$4 sm:$0xff]  }
 0x176   :  { %5724 = vmatprep.subr.bf16.mxu1 %v6543_v53  ;;  %v1174_v46 = vpop.f32.mrb[50].mxu0 }
 0x177   :  { %v1674_v48 = vmax.f32 %v1172_v44, 0.0  ;;  %v1175_v49 = vadd.f32 %v6856_v12, %v1174_v46  ;;  %v1176_v50 = vpop.f32.mrb[51].mxu0  ;;  %v6289_v44 = vld [vmem:[%s8522_s3 + $0x38] sm:$0xff]  }
 0x178   :  { %5685 = vmatmul.mubr.msk.bf16.gmra.mrb[24].mxu1 %vm1957_vm2, %v6876_v34 }
 0x179   :  { %5688 = vmatprep.mubr.msk.bf16.mxu1 %vm6544_vm0, %v6543_v53  ;;  %v1675_v52 = vmax.f32 %v1175_v49, 0.0 }
 0x17a   :  { %1386 = vmatmul.mubr.bf16.gmra.mrb[156].mxu0 %v6295_v47 }
 0x17b   :  { %v7022_v54 = vpack.c.bf16 %v1675_v52, %v1674_v48  ;;  %1393 = vmatprep.mubr.bf16.mxu0 %v6296_v51  ;;  %v6312_v51 = vld [vmem:[%s8519_s0 + $0x2c0] ss:$8 sps:$4 sm:$0xff]  }
 0x17c   :  { %v1179_v55 = vpop.f32.mrb[52].mxu0 }
 0x17d   :  { %v1180_v56 = vadd.f32 %v6856_v12, %v1179_v55  ;;  %v1181_v58 = vpop.f32.mrb[53].mxu0 }
 0x17e   :  { %v1182_v59 = vpop.f32.mrb[54].mxu0 }
 0x17f   :  { %v1676_v61 = vmax.f32 %v1180_v56, 0.0  ;;  %v1183_v34 = vadd.f32 %v6856_v12, %v1182_v59  ;;  %v1184_v62 = vpop.f32.mrb[55].mxu0  ;;  %v6314_v59 = vld [vmem:[%s8519_s0 + $0x2d4] ss:$8 sps:$4 sm:$0xff]  }
 0x180   :  { %5689 = vmatmul.mubr.msk.bf16.gmra.mrb[28].mxu1 %vm1957_vm2, %v6886_v45 }
 0x181   :  { %5692 = vmatprep.mubr.msk.bf16.mxu1 %vm6544_vm0, %v6543_v53  ;;  %v1677_v0 = vmax.f32 %v1183_v34, 0.0 }
 0x182   :  { %1394 = vmatmul.mubr.bf16.gmra.mrb[160].mxu0 %v6298_v60 }
 0x183   :  { %v7036_v2 = vpack.c.bf16 %v1677_v0, %v1676_v61  ;;  %1401 = vmatprep.mubr.bf16.mxu0 %v6300_v63 }
 0x184   :  { %v1187_v3 = vpop.f32.mrb[56].mxu0 }
 0x185   :  { %v1188_v4 = vadd.f32 %v6856_v12, %v1187_v3  ;;  %v1189_v6 = vpop.f32.mrb[57].mxu0  ;;  %v2257_v14 = vrot.slane %v7036_v2, 4 }
 0x186   :  { %v1190_v7 = vpop.f32.mrb[58].mxu0 }
 0x187   :  { %v1678_v9 = vmax.f32 %v1188_v4, 0.0  ;;  %v1191_v45 = vadd.f32 %v6856_v12, %v1190_v7  ;;  %v1192_v10 = vpop.f32.mrb[59].mxu0  ;;  %v6316_v4 = vld [vmem:[%s8519_s0 + $0x2d0] ss:$8 sps:$4 sm:$0xff]  }
 0x188   :  { %5693 = vmatmul.mubr.msk.bf16.gmra.mrb[32].mxu1 %vm1957_vm2, %v6896_v57 }
 0x189   :  { %5696 = vmatprep.mubr.msk.bf16.mxu1 %vm6544_vm0, %v6543_v53  ;;  %v1679_v13 = vmax.f32 %v1191_v45, 0.0 }
 0x18a   :  { %1402 = vmatmul.mubr.bf16.gmra.mrb[164].mxu0 %v6302_v8 }
 0x18b   :  { %v1808_v15 = vpack.c.bf16 %v1679_v13, %v1678_v9  ;;  %1409 = vmatprep.mubr.bf16.mxu0 %v6303_v11  ;;  %v6317_v9 = vld [vmem:[%s8519_s0 + $0x2e4] ss:$8 sps:$4 sm:$0xff]  }
 0x18c   :  { %v1195_v17 = vpop.f32.mrb[60].mxu0 }
 0x18d   :  { %v2258_v18 = vrot.slane %v1808_v15, 4  ;;  %v1196_v19 = vadd.f32 %v6856_v12, %v1195_v17  ;;  %v1197_v20 = vpop.f32.mrb[61].mxu0  ;;  %v6319_v17 = vld [vmem:[%s8519_s0 + $0x2e0] ss:$8 sps:$4 sm:$0xff]  }
 0x18e   :  { %v1198_v21 = vpop.f32.mrb[62].mxu0  ;;  %v6321_v20 = vld [vmem:[%s8519_s0 + $0x2f4] ss:$8 sps:$4 sm:$0xff]  }
 0x18f   :  { %v1680_v57 = vmax.f32 %v1196_v19, 0.0  ;;  %v1199_v24 = vadd.f32 %v6856_v12, %v1198_v21  ;;  %v1200_v25 = vpop.f32.mrb[63].mxu0  ;;  %v7057_v26 = vsel %vm1935_vm1, %v2257_v14, %v2258_v18 }
 0x190   :  { %5697 = vmatmul.mubr.msk.bf16.gmra.mrb[36].mxu1 %vm1957_vm2, %v6906_v5  ;;  %v6309_v5 = vld [vmem:[%s8519_s0 + $0x2b0] ss:$8 sps:$4 sm:$0xff]  }
 0x191   :  { %5704 = vmatprep.mubr.msk.bf16.mxu1 %vm6544_vm0, %v6543_v53  ;;  %v1681_v29 = vmax.f32 %v1199_v24, 0.0 }
 0x192   :  { %1410 = vmatmul.mubr.bf16.gmra.mrb[168].mxu0 %v6305_v22 }
 0x193   :  { %v1809_v30 = vpack.c.bf16 %v1681_v29, %v1680_v57  ;;  %1417 = vmatprep.mubr.bf16.mxu0 %v6307_v27  ;;  %v6323_v29 = vld [vmem:[%s8519_s0 + $0x2f0] ss:$8 sps:$4 sm:$0xff]  }
 0x194   :  { %v1203_v31 = vpop.f32.mrb[64].mxu0 }
 0x195   :  { %v2260_v33 = vrot.slane %v1809_v30, 4  ;;  %v1204_v35 = vadd.f32 %v6856_v12, %v1203_v31  ;;  %v1205_v36 = vpop.f32.mrb[65].mxu0 }
 0x196   :  { %v1206_v37 = vpop.f32.mrb[66].mxu0 }
 0x197   :  { %v1682_v38 = vmax.f32 %v1204_v35, 0.0  ;;  %v1207_v39 = vadd.f32 %v6856_v12, %v1206_v37  ;;  %v1208_v40 = vpop.f32.mrb[67].mxu0  ;;  %v7075_v41 = vsel %vm1935_vm1, %v2258_v18, %v2260_v33  ;;  %v6299_v37 = vld [vmem:[%s8522_s3 + $0x40] sm:$0xff]  }
 0x198   :  { %5705 = vmatmul.mubr.msk.bf16.vlgmr.msra.gmra.mrb[40].mxu1 %vm1957_vm2, %v6973_v16 }
 0x199   :  { %5725 = vmatpush3.bf16.msra.mxu1 %v6282_v32  ;;  %5708 = vmatprep.mubr.msk.bf16.mxu1 %vm6544_vm0, %v6543_v53  ;;  %v1683_v23 = vmax.f32 %v1207_v39, 0.0  ;;  %v6324_v32 = vld [vmem:[%s8519_s0 + $0x304] ss:$8 sps:$4 sm:$0xff]  }
 0x19a   :  { %5726 = vmatprep.subr.bf16.mxu1 %v6543_v53  ;;  %1418 = vmatmul.mubr.bf16.gmra.mrb[172].mxu0 %v6309_v5 }
 0x19b   :  { %v1810_v46 = vpack.c.bf16 %v1683_v23, %v1682_v38  ;;  %1425 = vmatprep.mubr.bf16.mxu0 %v6310_v43  ;;  %v6327_v23 = vld [vmem:[%s8519_s0 + $0x314] ss:$8 sps:$4 sm:$0xff]  }
 0x19c   :  { %v1211_v47 = vpop.f32.mrb[68].mxu0 }
 0x19d   :  { %5727 = vmatpush3.bf16.msra.mxu1 %v6289_v44  ;;  %v2262_v48 = vrot.slane %v1810_v46, 4  ;;  %v1212_v49 = vadd.f32 %v6856_v12, %v1211_v47  ;;  %v1213_v16 = vpop.f32.mrb[69].mxu0  ;;  %v6348_v46 = vld [vmem:[%s8524_s5 + $0x20] sm:$0xff]   ;;  %v6306_v47 = vld [vmem:[%s8522_s3 + $0x48] sm:$0xff]  }
 0x19e   :  { %5748 = vmatprep.subr.bf16.mxu1 %v6543_v53  ;;  %v1214_v50 = vpop.f32.mrb[70].mxu0  ;;  %6037 = vmatpush3.bf16.msra.mxu0 %v6348_v46 }
 0x19f   :  { %v1684_v52 = vmax.f32 %v1212_v49, 0.0  ;;  %v1215_v55 = vadd.f32 %v6856_v12, %v1214_v50  ;;  %v1216_v56 = vpop.f32.mrb[71].mxu0  ;;  %v7095_v58 = vsel %vm1935_vm1, %v2260_v33, %v2262_v48  ;;  %6038 = vmatprep.subr.bf16.mxu0 %v6543_v53 }
 0x1a0   :  { %5709 = vmatmul.mubr.msk.bf16.gmra.mrb[44].mxu1 %vm1957_vm2, %v6986_v28 }
 0x1a1   :  { %5712 = vmatprep.mubr.msk.bf16.mxu1 %vm6544_vm0, %v6543_v53  ;;  %v1685_v60 = vmax.f32 %v1215_v55, 0.0 }
 0x1a2   :  { %1426 = vmatmul.mubr.bf16.gmra.mrb[176].mxu0 %v6312_v51 }
 0x1a3   :  { %v7104_v61 = vpack.c.bf16 %v1685_v60, %v1684_v52  ;;  %1433 = vmatprep.mubr.bf16.mxu0 %v6314_v59  ;;  %v6329_v52 = vld [vmem:[%s8519_s0 + $0x310] ss:$8 sps:$4 sm:$0xff]   ;;  %v6331_v60 = vld [vmem:[%s8519_s0 + $0x324] ss:$8 sps:$4 sm:$0xff]  }
 0x1a4   :  { %v1219_v34 = vpop.f32.mrb[72].mxu0 }
 0x1a5   :  { %v2264_v62 = vrot.slane %v7104_v61, 4  ;;  %v1220_v63 = vadd.f32 %v6856_v12, %v1219_v34  ;;  %v1221_v0 = vpop.f32.mrb[73].mxu0  ;;  %v6343_v61 = vld [vmem:[%s8519_s0 + $0x350] ss:$8 sps:$4 sm:$0xff]  }
 0x1a6   :  { %v1222_v3 = vpop.f32.mrb[74].mxu0 }
 0x1a7   :  { %v7114_v28 = vsel %vm1935_vm1, %v2262_v48, %v2264_v62  ;;  %v1686_v6 = vmax.f32 %v1220_v63, 0.0  ;;  %v1223_v7 = vadd.f32 %v6856_v12, %v1222_v3  ;;  %v1224_v8 = vpop.f32.mrb[75].mxu0 }
 0x1a8   :  { %5713 = vmatmul.mubr.msk.bf16.gmra.mrb[48].mxu1 %vm1957_vm2, %v7007_v42 }
 0x1a9   :  { %5716 = vmatprep.mubr.msk.bf16.mxu1 %vm6544_vm0, %v6543_v53  ;;  %v1687_v45 = vmax.f32 %v1223_v7, 0.0  ;;  %v6333_v7 = vld [vmem:[%s8519_s0 + $0x320] ss:$8 sps:$4 sm:$0xff]  }
 0x1aa   :  { %1434 = vmatmul.mubr.bf16.gmra.mrb[180].mxu0 %v6316_v4 }
 0x1ab   :  { %v7124_v10 = vpack.c.bf16 %v1687_v45, %v1686_v6  ;;  %1441 = vmatprep.mubr.bf16.mxu0 %v6317_v9  ;;  %v6334_v45 = vld [vmem:[%s8519_s0 + $0x334] ss:$8 sps:$4 sm:$0xff]  }
 0x1ac   :  { %v1227_v11 = vpop.f32.mrb[76].mxu0 }
 0x1ad   :  { %v1228_v13 = vadd.f32 %v6856_v12, %v1227_v11  ;;  %v1229_v14 = vpop.f32.mrb[77].mxu0 }
 0x1ae   :  { %v1230_v15 = vpop.f32.mrb[78].mxu0 }
 0x1af   :  { %v1688_v18 = vmax.f32 %v1228_v13, 0.0  ;;  %v1231_v42 = vadd.f32 %v6856_v12, %v1230_v15  ;;  %v1232_v19 = vpop.f32.mrb[79].mxu0 }
 0x1b0   :  { %5717 = vmatmul.mubr.msk.bf16.gmra.mrb[52].mxu1 %vm1957_vm2, %v7022_v54 }
 0x1b1   :  { %5720 = vmatprep.mubr.msk.bf16.mxu1 %vm6544_vm0, %v6543_v53  ;;  %v1689_v21 = vmax.f32 %v1231_v42, 0.0 }
 0x1b2   :  { %1442 = vmatmul.mubr.bf16.gmra.mrb[184].mxu0 %v6319_v17 }
 0x1b3   :  { %v7138_v22 = vpack.c.bf16 %v1689_v21, %v1688_v18  ;;  %1449 = vmatprep.mubr.bf16.mxu0 %v6321_v20  ;;  %v6336_v20 = vld [vmem:[%s8519_s0 + $0x330] ss:$8 sps:$4 sm:$0xff]  }
 0x1b4   :  { %v1235_v57 = vpop.f32.mrb[80].mxu0 }
 0x1b5   :  { %v1236_v24 = vadd.f32 %v6856_v12, %v1235_v57  ;;  %v1237_v25 = vpop.f32.mrb[81].mxu0 }
 0x1b6   :  { %v1238_v27 = vpop.f32.mrb[82].mxu0  ;;  %v6338_v25 = vld [vmem:[%s8519_s0 + $0x344] ss:$8 sps:$4 sm:$0xff]  }
 0x1b7   :  { %v1690_v30 = vmax.f32 %v1236_v24, 0.0  ;;  %v1239_v54 = vadd.f32 %v6856_v12, %v1238_v27  ;;  %v1240_v31 = vpop.f32.mrb[83].mxu0 }
 0x1b8   :  { %5721 = vmatmul.mubr.msk.bf16.gmra.mrb[56].mxu1 %vm1957_vm2, %v7036_v2  ;;  %v6326_v2 = vld [vmem:[%s8519_s0 + $0x300] ss:$8 sps:$4 sm:$0xff]  }
 0x1b9   :  { %5728 = vmatprep.mubr.msk.bf16.mxu1 %vm6544_vm0, %v6543_v53  ;;  %v1691_v33 = vmax.f32 %v1239_v54, 0.0 }
 0x1ba   :  { %1450 = vmatmul.mubr.bf16.gmra.mrb[188].mxu0 %v6323_v29 }
 0x1bb   :  { %v7152_v35 = vpack.c.bf16 %v1691_v33, %v1690_v30  ;;  %1457 = vmatprep.mubr.bf16.mxu0 %v6324_v32 }
 0x1bc   :  { %v1243_v36 = vpop.f32.mrb[84].mxu0 }
 0x1bd   :  { %v1244_v5 = vadd.f32 %v6856_v12, %v1243_v36  ;;  %v1245_v38 = vpop.f32.mrb[85].mxu0  ;;  %v6340_v36 = vld [vmem:[%s8519_s0 + $0x340] ss:$8 sps:$4 sm:$0xff]  }
 0x1be   :  { %v1246_v39 = vpop.f32.mrb[86].mxu0 }
 0x1bf   :  { %v1692_v40 = vmax.f32 %v1244_v5, 0.0  ;;  %v1247_v43 = vadd.f32 %v6856_v12, %v1246_v39  ;;  %v1248_v44 = vpop.f32.mrb[87].mxu0  ;;  %v6341_v39 = vld [vmem:[%s8519_s0 + $0x354] ss:$8 sps:$4 sm:$0xff]  }
 0x1c0   :  { %5729 = vmatmul.mubr.msk.bf16.vlgmr.msra.gmra.mrb[60].mxu1 %vm1957_vm2, %v7057_v26  ;;  %v6313_v44 = vld [vmem:[%s8522_s3 + $0x50] sm:$0xff]  }
 0x1c1   :  { %5749 = vmatpush3.bf16.msra.mxu1 %v6299_v37  ;;  %5732 = vmatprep.mubr.msk.bf16.mxu1 %vm6544_vm0, %v6543_v53  ;;  %v1693_v48 = vmax.f32 %v1247_v43, 0.0 }
 0x1c2   :  { %5750 = vmatprep.subr.bf16.mxu1 %v6543_v53  ;;  %1458 = vmatmul.mubr.bf16.gmra.mrb[192].mxu0 %v6326_v2 }
 0x1c3   :  { %v7176_v49 = vpack.c.bf16 %v1693_v48, %v1692_v40  ;;  %1465 = vmatprep.mubr.bf16.mxu0 %v6327_v23 }
 0x1c4   :  { %v1251_v26 = vpop.f32.mrb[88].mxu0 }
 0x1c5   :  { %5751 = vmatpush3.bf16.msra.mxu1 %v6306_v47  ;;  %v1252_v16 = vadd.f32 %v6856_v12, %v1251_v26  ;;  %v1253_v50 = vpop.f32.mrb[89].mxu0 }
 0x1c6   :  { %5772 = vmatprep.subr.bf16.mxu1 %v6543_v53  ;;  %v1254_v51 = vpop.f32.mrb[90].mxu0 }
 0x1c7   :  { %v1694_v55 = vmax.f32 %v1252_v16, 0.0  ;;  %v1255_v56 = vadd.f32 %v6856_v12, %v1254_v51  ;;  %v1256_v59 = vpop.f32.mrb[91].mxu0  ;;  %v6345_v51 = vld [vmem:[%s8519_s0 + $0x364] ss:$8 sps:$4 sm:$0xff]  }
 0x1c8   :  { %5733 = vmatmul.mubr.msk.bf16.gmra.mrb[64].mxu1 %vm1957_vm2, %v7075_v41 }
 0x1c9   :  { %5736 = vmatprep.mubr.msk.bf16.mxu1 %vm6544_vm0, %v6543_v53  ;;  %v1695_v34 = vmax.f32 %v1255_v56, 0.0 }
 0x1ca   :  { %1466 = vmatmul.mubr.bf16.gmra.mrb[196].mxu0 %v6329_v52  ;;  %v6320_v52 = vld [vmem:[%s8522_s3 + $0x58] sm:$0xff]  }
 0x1cb   :  { %v7192_v63 = vpack.c.bf16 %v1695_v34, %v1694_v55  ;;  %1473 = vmatprep.mubr.bf16.mxu0 %v6331_v60 }
 0x1cc   :  { %v1259_v0 = vpop.f32.mrb[92].mxu0 }
 0x1cd   :  { %v1260_v3 = vadd.f32 %v6856_v12, %v1259_v0  ;;  %v1261_v4 = vpop.f32.mrb[93].mxu0  ;;  %v2487_v13 = vrot.slane %v7192_v63, 4 }
 0x1ce   :  { %v1262_v6 = vpop.f32.mrb[94].mxu0 }
 0x1cf   :  { %v1696_v8 = vmax.f32 %v1260_v3, 0.0  ;;  %v1263_v41 = vadd.f32 %v6856_v12, %v1262_v6  ;;  %v1264_v9 = vpop.f32.mrb[95].mxu0  ;;  %v6347_v3 = vld [vmem:[%s8519_s0 + $0x360] ss:$8 sps:$4 sm:$0xff]  }
 0x1d0   :  { %5737 = vmatmul.mubr.msk.bf16.gmra.mrb[68].mxu1 %vm1957_vm2, %v7095_v58 }
 0x1d1   :  { %5740 = vmatprep.mubr.msk.bf16.mxu1 %vm6544_vm0, %v6543_v53  ;;  %v1697_v11 = vmax.f32 %v1263_v41, 0.0  ;;  %v6349_v41 = vld [vmem:[%s8519_s0 + $0x374] ss:$8 sps:$4 sm:$0xff]  }
 0x1d2   :  { %1474 = vmatmul.mubr.bf16.gmra.mrb[200].mxu0 %v6333_v7 }
 0x1d3   :  { %v1817_v14 = vpack.c.bf16 %v1697_v11, %v1696_v8  ;;  %1481 = vmatprep.mubr.bf16.mxu0 %v6334_v45 }
 0x1d4   :  { %v1267_v15 = vpop.f32.mrb[96].mxu0 }
 0x1d5   :  { %v2488_v17 = vrot.slane %v1817_v14, 4  ;;  %v1268_v18 = vadd.f32 %v6856_v12, %v1267_v15  ;;  %v1269_v42 = vpop.f32.mrb[97].mxu0 }
 0x1d6   :  { %v1270_v19 = vpop.f32.mrb[98].mxu0 }
 0x1d7   :  { %v7212_v58 = vsel %vm1935_vm1, %v2487_v13, %v2488_v17  ;;  %v1698_v21 = vmax.f32 %v1268_v18, 0.0  ;;  %v1271_v57 = vadd.f32 %v6856_v12, %v1270_v19  ;;  %v1272_v24 = vpop.f32.mrb[99].mxu0  ;;  %v6353_v19 = vld [vmem:[%s8519_s0 + $0x384] ss:$8 sps:$4 sm:$0xff]  }
 0x1d8   :  { %5741 = vmatmul.mubr.msk.bf16.gmra.mrb[72].mxu1 %vm1957_vm2, %v7114_v28 }
 0x1d9   :  { %5744 = vmatprep.mubr.msk.bf16.mxu1 %vm6544_vm0, %v6543_v53  ;;  %v1699_v27 = vmax.f32 %v1271_v57, 0.0 }
 0x1da   :  { %1482 = vmatmul.mubr.bf16.gmra.mrb[204].mxu0 %v6336_v20 }
 0x1db   :  { %v1818_v29 = vpack.c.bf16 %v1699_v27, %v1698_v21  ;;  %1489 = vmatprep.mubr.bf16.mxu0 %v6338_v25 }
 0x1dc   :  { %v1275_v30 = vpop.f32.mrb[100].mxu0 }
 0x1dd   :  { %v2490_v54 = vrot.slane %v1818_v29, 4  ;;  %v1276_v31 = vadd.f32 %v6856_v12, %v1275_v30  ;;  %v1277_v32 = vpop.f32.mrb[101].mxu0  ;;  %v6355_v29 = vld [vmem:[%s8519_s0 + $0x380] ss:$8 sps:$4 sm:$0xff]  }
 0x1de   :  { %v1278_v33 = vpop.f32.mrb[102].mxu0 }
 0x1df   :  { %v1700_v37 = vmax.f32 %v1276_v31, 0.0  ;;  %v1279_v28 = vadd.f32 %v6856_v12, %v1278_v33  ;;  %v1280_v5 = vpop.f32.mrb[103].mxu0  ;;  %v7228_v38 = vsel %vm1935_vm1, %v2488_v17, %v2490_v54  ;;  %v6351_v17 = vld [vmem:[%s8519_s0 + $0x370] ss:$8 sps:$4 sm:$0xff]   ;;  %v6356_v31 = vld [vmem:[%s8519_s0 + $0x394] ss:$8 sps:$4 sm:$0xff]  }
 0x1e0   :  { %5745 = vmatmul.mubr.msk.bf16.gmra.mrb[76].mxu1 %vm1957_vm2, %v2264_v62 }
 0x1e1   :  { %5752 = vmatprep.mubr.msk.bf16.mxu1 %vm6544_vm0, %v6543_v53  ;;  %v1701_v2 = vmax.f32 %v1279_v28, 0.0 }
 0x1e2   :  { %1490 = vmatmul.mubr.bf16.gmra.mrb[208].mxu0 %v6340_v36 }
 0x1e3   :  { %v1819_v40 = vpack.c.bf16 %v1701_v2, %v1700_v37  ;;  %1497 = vmatprep.mubr.bf16.mxu0 %v6341_v39  ;;  %v6358_v39 = vld [vmem:[%s8519_s0 + $0x390] ss:$8 sps:$4 sm:$0xff]  }
 0x1e4   :  { %v1283_v43 = vpop.f32.mrb[104].mxu0 }
 0x1e5   :  { %v2492_v23 = vrot.slane %v1819_v40, 4  ;;  %v1284_v46 = vadd.f32 %v6856_v12, %v1283_v43  ;;  %v1285_v47 = vpop.f32.mrb[105].mxu0  ;;  %v6359_v43 = vld [vmem:[%s8519_s0 + $0x3a4] ss:$8 sps:$4 sm:$0xff]  }
 0x1e6   :  { %v1286_v48 = vpop.f32.mrb[106].mxu0  ;;  %v7331_v47 = vld [vmem:[%s8521_s2] ss:$0 sm:$0xff] }
 0x1e7   :  { %v1702_v62 = vmax.f32 %v1284_v46, 0.0  ;;  %v1287_v26 = vadd.f32 %v6856_v12, %v1286_v48  ;;  %v1288_v16 = vpop.f32.mrb[107].mxu0  ;;  %v7247_v50 = vsel %vm1935_vm1, %v2490_v54, %v2492_v23 }
 0x1e8   :  { %5753 = vmatmul.mubr.msk.bf16.vlgmr.msra.gmra.mrb[80].mxu1 %vm1957_vm2, %v7124_v10 }
 0x1e9   :  { %5773 = vmatpush3.bf16.msra.mxu1 %v6313_v44  ;;  %5756 = vmatprep.mubr.msk.bf16.mxu1 %vm6544_vm0, %v6543_v53  ;;  %v1703_v55 = vmax.f32 %v1287_v26, 0.0 }
 0x1ea   :  { %5774 = vmatprep.subr.bf16.mxu1 %v6543_v53  ;;  %1498 = vmatmul.mubr.bf16.gmra.mrb[212].mxu0 %v6343_v61 }
 0x1eb   :  { %v7260_v56 = vpack.c.bf16 %v1703_v55, %v1702_v62  ;;  %1505 = vmatprep.mubr.bf16.mxu0 %v6345_v51  ;;  %v6361_v62 = vld [vmem:[%s8519_s0 + $0x3a0] ss:$8 sps:$4 sm:$0xff]  }
 0x1ec   :  { %v1291_v59 = vpop.f32.mrb[108].mxu0  ;;  %v6337_v55 = vld [vmem:[%s8522_s3 + $0x68] sm:$0xff]  }
 0x1ed   :  { %5775 = vmatpush3.bf16.msra.mxu1 %v6320_v52  ;;  %v2494_v60 = vrot.slane %v7260_v56, 4  ;;  %v1292_v10 = vadd.f32 %v6856_v12, %v1291_v59  ;;  %v1293_v34 = vpop.f32.mrb[109].mxu0  ;;  %v6363_v52 = vld [vmem:[%s8519_s0 + $0x3b4] ss:$8 sps:$4 sm:$0xff]  }
 0x1ee   :  { %5796 = vmatprep.subr.bf16.mxu1 %v6543_v53  ;;  %v1294_v0 = vpop.f32.mrb[110].mxu0 }
 0x1ef   :  { %v7271_v4 = vsel %vm1935_vm1, %v2492_v23, %v2494_v60  ;;  %v1704_v6 = vmax.f32 %v1292_v10, 0.0  ;;  %v1295_v7 = vadd.f32 %v6856_v12, %v1294_v0  ;;  %v1296_v8 = vpop.f32.mrb[111].mxu0 }
 0x1f0   :  { %5757 = vmatmul.mubr.msk.bf16.gmra.mrb[84].mxu1 %vm1957_vm2, %v7138_v22 }
 0x1f1   :  { %5760 = vmatprep.mubr.msk.bf16.mxu1 %vm6544_vm0, %v6543_v53  ;;  %v1705_v9 = vmax.f32 %v1295_v7, 0.0 }
 0x1f2   :  { %1506 = vmatmul.mubr.bf16.gmra.mrb[216].mxu0 %v6347_v3 }
 0x1f3   :  { %v7281_v45 = vpack.c.bf16 %v1705_v9, %v1704_v6  ;;  %1513 = vmatprep.mubr.bf16.mxu0 %v6349_v41  ;;  %v6365_v6 = vld [vmem:[%s8519_s0 + $0x3b0] ss:$8 sps:$4 sm:$0xff]   ;;  %v6366_v9 = vld [vmem:[%s8519_s0 + $0x3c4] ss:$8 sps:$4 sm:$0xff]  }
 0x1f4   :  { %v1299_v11 = vpop.f32.mrb[112].mxu0 }
 0x1f5   :  { %v1300_v13 = vadd.f32 %v6856_v12, %v1299_v11  ;;  %v1301_v14 = vpop.f32.mrb[113].mxu0 }
 0x1f6   :  { %v1302_v15 = vpop.f32.mrb[114].mxu0 }
 0x1f7   :  { %v1706_v18 = vmax.f32 %v1300_v13, 0.0  ;;  %v1303_v22 = vadd.f32 %v6856_v12, %v1302_v15  ;;  %v1304_v42 = vpop.f32.mrb[115].mxu0 }
 0x1f8   :  { %5761 = vmatmul.mubr.msk.bf16.gmra.mrb[88].mxu1 %vm1957_vm2, %v7152_v35 }
 0x1f9   :  { %5764 = vmatprep.mubr.msk.bf16.mxu1 %vm6544_vm0, %v6543_v53  ;;  %v1707_v20 = vmax.f32 %v1303_v22, 0.0 }
 0x1fa   :  { %1514 = vmatmul.mubr.bf16.gmra.mrb[220].mxu0 %v6351_v17 }
 0x1fb   :  { %v7295_v21 = vpack.c.bf16 %v1707_v20, %v1706_v18  ;;  %1521 = vmatprep.mubr.bf16.mxu0 %v6353_v19 }
 0x1fc   :  { %v1307_v57 = vpop.f32.mrb[116].mxu0 }
 0x1fd   :  { %v1308_v24 = vadd.f32 %v6856_v12, %v1307_v57  ;;  %v1309_v25 = vpop.f32.mrb[117].mxu0  ;;  %v6368_v57 = vld [vmem:[%s8519_s0 + $0x3c0] ss:$8 sps:$4 sm:$0xff]  }
 0x1fe   :  { %v1310_v27 = vpop.f32.mrb[118].mxu0 }
 0x1ff   :  { %v1708_v30 = vmax.f32 %v1308_v24, 0.0  ;;  %v1311_v35 = vadd.f32 %v6856_v12, %v1310_v27  ;;  %v1312_v54 = vpop.f32.mrb[119].mxu0  ;;  %v6370_v27 = vld [vmem:[%s8519_s0 + $0x3d4] ss:$8 sps:$4 sm:$0xff]  }
 0x200   :  { %5765 = vmatmul.mubr.msk.bf16.gmra.mrb[92].mxu1 %vm1957_vm2, %v7176_v49 }
 0x201   :  { %5768 = vmatprep.mubr.msk.bf16.mxu1 %vm6544_vm0, %v6543_v53  ;;  %v1709_v32 = vmax.f32 %v1311_v35, 0.0 }
 0x202   :  { %1522 = vmatmul.mubr.bf16.gmra.mrb[224].mxu0 %v6355_v29 }
 0x203   :  { %v7309_v33 = vpack.c.bf16 %v1709_v32, %v1708_v30  ;;  %1529 = vmatprep.mubr.bf16.mxu0 %v6356_v31 }
 0x204   :  { %v1315_v36 = vpop.f32.mrb[120].mxu0 }
 0x205   :  { %v1316_v37 = vadd.f32 %v6856_v12, %v1315_v36  ;;  %v1317_v28 = vpop.f32.mrb[121].mxu0 }
 0x206   :  { %v1318_v5 = vpop.f32.mrb[122].mxu0 }
 0x207   :  { %v1710_v2 = vmax.f32 %v1316_v37, 0.0  ;;  %v1319_v49 = vadd.f32 %v6856_v12, %v1318_v5  ;;  %v1320_v40 = vpop.f32.mrb[123].mxu0  ;;  %v6330_v12 = vld [vmem:[%s8522_s3 + $0x60] sm:$0xff]  }
 0x208   :  { %5769 = vmatmul.mubr.msk.bf16.gmra.mrb[96].mxu1 %vm1957_vm2, %v7192_v63 }
 0x209   :  { %5776 = vmatprep.mubr.msk.bf16.mxu1 %vm6544_vm0, %v6543_v53  ;;  %v1711_v44 = vmax.f32 %v1319_v49, 0.0  ;;  %v6372_v49 = vld [vmem:[%s8519_s0 + $0x3d0] ss:$8 sps:$4 sm:$0xff]  }
 0x20a   :  { %1530 = vmatmul.mubr.bf16.gmra.mrb[228].mxu0 %v6358_v39 }
 0x20b   :  { %v7323_v23 = vpack.c.bf16 %v1711_v44, %v1710_v2  ;;  %1537 = vmatprep.mubr.bf16.mxu0 %v6359_v43  ;;  %v6373_v43 = vld [vmem:[%s8519_s0 + $0x3e4] ss:$8 sps:$4 sm:$0xff]  }
 0x20c   :  { %v1323_v46 = vpop.f32.mrb[124].mxu0 }
 0x20d   :  { %v1324_v63 = vadd.f32 %v7331_v47, %v1323_v46  ;;  %v1325_v48 = vpop.f32.mrb[125].mxu0 }
 0x20e   :  { %v1326_v61 = vpop.f32.mrb[126].mxu0 }
 0x20f   :  { %v1712_v26 = vmax.f32 %v1324_v63, 0.0  ;;  %v1327_v16 = vadd.f32 %v7331_v47, %v1326_v61  ;;  %v1328_v51 = vpop.f32.mrb[127].mxu0 }
 0x210   :  { %5777 = vmatmul.mubr.msk.bf16.vlgmr.msra.gmra.mrb[100].mxu1 %vm1957_vm2, %v7212_v58 }
 0x211   :  { %5797 = vmatpush3.bf16.msra.mxu1 %v6330_v12  ;;  %5780 = vmatprep.mubr.msk.bf16.mxu1 %vm6544_vm0, %v6543_v53  ;;  %v1713_v59 = vmax.f32 %v1327_v16, 0.0 }
 0x212   :  { %5798 = vmatprep.subr.bf16.mxu1 %v6543_v53  ;;  %1538 = vmatmul.mubr.bf16.gmra.mrb[232].mxu0 %v6361_v62 }
 0x213   :  { %v7349_v10 = vpack.c.bf16 %v1713_v59, %v1712_v26  ;;  %1545 = vmatprep.mubr.bf16.mxu0 %v6363_v52 }
 0x214   :  { %v1331_v34 = vpop.f32.mrb[128].mxu0 }
 0x215   :  { %5799 = vmatpush3.bf16.msra.mxu1 %v6337_v55  ;;  %v1332_v0 = vadd.f32 %v7331_v47, %v1331_v34  ;;  %v1333_v58 = vpop.f32.mrb[129].mxu0  ;;  %v2717_v14 = vrot.slane %v7349_v10, 4  ;;  %v6375_v34 = vld [vmem:[%s8519_s0 + $0x3e0] ss:$8 sps:$4 sm:$0xff]  }
 0x216   :  { %5820 = vmatprep.subr.bf16.mxu1 %v6543_v53  ;;  %v1334_v3 = vpop.f32.mrb[130].mxu0  ;;  %v6377_v58 = vld [vmem:[%s8519_s0 + $0x3f4] ss:$8 sps:$4 sm:$0xff]  }
 0x217   :  { %v1714_v7 = vmax.f32 %v1332_v0, 0.0  ;;  %v1335_v8 = vadd.f32 %v7331_v47, %v1334_v3  ;;  %v1336_v41 = vpop.f32.mrb[131].mxu0 }
 0x218   :  { %5781 = vmatmul.mubr.msk.bf16.gmra.mrb[104].mxu1 %vm1957_vm2, %v7228_v38 }
 0x219   :  { %5784 = vmatprep.mubr.msk.bf16.mxu1 %vm6544_vm0, %v6543_v53  ;;  %v1715_v11 = vmax.f32 %v1335_v8, 0.0 }
 0x21a   :  { %1546 = vmatmul.mubr.bf16.gmra.mrb[236].mxu0 %v6365_v6 }
 0x21b   :  { %v7364_v13 = vpop.f32.mrb[0].mxu1  ;;  %v1826_v15 = vpack.c.bf16 %v1715_v11, %v1714_v7  ;;  %1553 = vmatprep.mubr.bf16.mxu0 %v6366_v9 }
 0x21c   :  { %v5658_v17 = vpop.f32.mrb[1].mxu1 }
 0x21d   :  { %v7367_v18 = vpop.f32.mrb[2].mxu1  ;;  %v2718_v22 = vrot.slane %v1826_v15, 4  ;;  %v1339_v42 = vpop.f32.mrb[132].mxu0 }
 0x21e   :  { %v5659_v19 = vpop.f32.mrb[3].mxu1  ;;  %v1340_v20 = vadd.f32 %v7331_v47, %v1339_v42  ;;  %v1341_v38 = vpop.f32.mrb[133].mxu0 }
 0x21f   :  { %v7374_v24 = vsel %vm1935_vm1, %v2717_v14, %v2718_v22  ;;  %v1342_v25 = vpop.f32.mrb[134].mxu0 }
 0x220   :  { %5785 = vmatmul.mubr.msk.bf16.gmra.mrb[108].mxu1 %vm1957_vm2, %v7247_v50  ;;  %v1716_v29 = vmax.f32 %v1340_v20, 0.0  ;;  %v1343_v30 = vadd.f32 %v7331_v47, %v1342_v25  ;;  %v1344_v35 = vpop.f32.mrb[135].mxu0  ;;  %v6379_v20 = vld [vmem:[%s8519_s0 + $0x3f0] ss:$8 sps:$4 sm:$0xff]  }
 0x221   :  { %5788 = vmatprep.mubr.msk.bf16.mxu1 %vm6544_vm0, %v6543_v53  ;;  %v6352_v35 = vld [vmem:[%s8522_s3 + $0x78] sm:$0xff]  }
 0x222   :  { %v1717_v54 = vmax.f32 %v1343_v30, 0.0  ;;  %1554 = vmatmul.mubr.bf16.gmra.mrb[240].mxu0 %v6368_v57  ;;  %v6382_v57 = vld [vmem:[%s8519_s0 + $0x404] ss:$8 sps:$4 sm:$0xff]  }
 0x223   :  { %v7384_v31 = vpop.f32.mrb[4].mxu1  ;;  %1561 = vmatprep.mubr.bf16.mxu0 %v6370_v27 }
 0x224   :  { %v5662_v32 = vpop.f32.mrb[5].mxu1  ;;  %v1827_v36 = vpack.c.bf16 %v1717_v54, %v1716_v29 }
 0x225   :  { %v7386_v37 = vpop.f32.mrb[6].mxu1  ;;  %v1347_v28 = vpop.f32.mrb[136].mxu0 }
 0x226   :  { %v5663_v5 = vpop.f32.mrb[7].mxu1  ;;  %v2720_v39 = vrot.slane %v1827_v36, 4  ;;  %v1348_v50 = vadd.f32 %v7331_v47, %v1347_v28  ;;  %v1349_v2 = vpop.f32.mrb[137].mxu0 }
 0x227   :  { %v1350_v40 = vpop.f32.mrb[138].mxu0 }
 0x228   :  { %5789 = vmatmul.mubr.msk.bf16.gmra.mrb[112].mxu1 %vm1957_vm2, %v7271_v4  ;;  %v1718_v44 = vmax.f32 %v1348_v50, 0.0  ;;  %v1351_v46 = vadd.f32 %v7331_v47, %v1350_v40  ;;  %v1352_v12 = vpop.f32.mrb[139].mxu0  ;;  %v7399_v63 = vsel %vm1935_vm1, %v2718_v22, %v2720_v39 }
 0x229   :  { %5792 = vmatprep.mubr.msk.bf16.mxu1 %vm6544_vm0, %v6543_v53 }
 0x22a   :  { %v1719_v48 = vmax.f32 %v1351_v46, 0.0  ;;  %1562 = vmatmul.mubr.bf16.gmra.mrb[244].mxu0 %v6372_v49  ;;  %v6380_v49 = vld [vmem:[%s8519_s0 + $0x400] ss:$8 sps:$4 sm:$0xff]  }
 0x22b   :  { %v7403_v61 = vpop.f32.mrb[8].mxu1  ;;  %1569 = vmatprep.mubr.bf16.mxu0 %v6373_v43  ;;  %v6386_v43 = vld [vmem:[%s8519_s0 + $0x414] ss:$8 sps:$4 sm:$0xff]  }
 0x22c   :  { %v5666_v62 = vpop.f32.mrb[9].mxu1  ;;  %v1828_v26 = vpack.c.bf16 %v1719_v48, %v1718_v44 }
 0x22d   :  { %v7405_v16 = vpop.f32.mrb[10].mxu1  ;;  %v1355_v4 = vpop.f32.mrb[140].mxu0 }
 0x22e   :  { %v5667_v51 = vpop.f32.mrb[11].mxu1  ;;  %v2722_v52 = vrot.slane %v1828_v26, 4  ;;  %v1356_v55 = vadd.f32 %v7331_v47, %v1355_v4  ;;  %v1357_v59 = vpop.f32.mrb[141].mxu0 }
 0x22f   :  { %v1358_v0 = vpop.f32.mrb[142].mxu0 }
 0x230   :  { %5793 = vmatmul.mubr.msk.bf16.gmra.mrb[116].mxu1 %vm1957_vm2, %v2494_v60  ;;  %v1720_v3 = vmax.f32 %v1356_v55, 0.0  ;;  %v1359_v6 = vadd.f32 %v7331_v47, %v1358_v0  ;;  %v1360_v7 = vpop.f32.mrb[143].mxu0  ;;  %v7419_v8 = vsel %vm1935_vm1, %v2720_v39, %v2722_v52  ;;  %v6344_v60 = vld [vmem:[%s8522_s3 + $0x70] sm:$0xff]  }
 0x231   :  { %5800 = vmatprep.mubr.msk.bf16.mxu1 %vm6544_vm0, %v6543_v53 }
 0x232   :  { %v1721_v41 = vmax.f32 %v1359_v6, 0.0  ;;  %1570 = vmatmul.mubr.bf16.gmra.mrb[248].mxu0 %v6375_v34 }
 0x233   :  { %v7423_v9 = vpop.f32.mrb[12].mxu1  ;;  %1577 = vmatprep.mubr.bf16.mxu0 %v6377_v58  ;;  %v6384_v58 = vld [vmem:[%s8519_s0 + $0x410] ss:$8 sps:$4 sm:$0xff]  }
 0x234   :  { %v5670_v11 = vpop.f32.mrb[13].mxu1  ;;  %v7425_v14 = vpack.c.bf16 %v1721_v41, %v1720_v3 }
 0x235   :  { %v7427_v56 = vpop.f32.mrb[14].mxu1  ;;  %v1363_v15 = vpop.f32.mrb[144].mxu0 }
 0x236   :  { %v5671_v17 = vpop.f32.mrb[15].mxu1  ;;  %v2724_v22 = vrot.slane %v7425_v14, 4  ;;  %v1364_v42 = vadd.f32 %v7331_v47, %v1363_v15  ;;  %v1365_v19 = vpop.f32.mrb[145].mxu0 }
 0x237   :  { %v1366_v38 = vpop.f32.mrb[146].mxu0 }
 0x238   :  { %5801 = vmatmul.mubr.msk.bf16.vlgmr.msra.gmra.mrb[120].mxu1 %vm1957_vm2, %v7281_v45  ;;  %v7445_v25 = vsel %vm1935_vm1, %v2722_v52, %v2724_v22  ;;  %v1722_v27 = vmax.f32 %v1364_v42, 0.0  ;;  %v1367_v29 = vadd.f32 %v7331_v47, %v1366_v38  ;;  %v1368_v30 = vpop.f32.mrb[147].mxu0 }
 0x239   :  { %5821 = vmatpush3.bf16.msra.mxu1 %v6344_v60  ;;  %5804 = vmatprep.mubr.msk.bf16.mxu1 %vm6544_vm0, %v6543_v53 }
 0x23a   :  { %5822 = vmatprep.subr.bf16.mxu1 %v6543_v53  ;;  %v1723_v45 = vmax.f32 %v1367_v29, 0.0  ;;  %1578 = vmatmul.mubr.bf16.gmra.mrb[252].mxu0 %v6379_v20 }
 0x23b   :  { %v7454_v54 = vpop.f32.mrb[16].mxu1  ;;  %1585 = vmatprep.mubr.bf16.mxu0 %v6382_v57 }
 0x23c   :  { %v5674_v32 = vpop.f32.mrb[17].mxu1  ;;  %v7456_v36 = vpack.c.bf16 %v1723_v45, %v1722_v27  ;;  %v6387_v27 = vld [vmem:[%s8519_s0 + $0x420] ss:$8 sps:$4 sm:$0xff]  }
 0x23d   :  { %v2042_v28 = vpop.f32.mrb[18].mxu1  ;;  %5823 = vmatpush3.bf16.msra.mxu1 %v6352_v35  ;;  %v1371_v5 = vpop.f32.mrb[148].mxu0  ;;  %v6404_v45 = vld [vmem:[%s8524_s5 + $0x28] sm:$0xff]  }
 0x23e   :  { %v5675_v39 = vpop.f32.mrb[19].mxu1  ;;  %5844 = vmatprep.subr.bf16.mxu1 %v6543_v53  ;;  %v1372_v50 = vadd.f32 %v7331_v47, %v1371_v5  ;;  %v1373_v2 = vpop.f32.mrb[149].mxu0  ;;  %6039 = vmatpush3.bf16.msra.mxu0 %v6404_v45 }
 0x23f   :  { %v1374_v40 = vpop.f32.mrb[150].mxu0  ;;  %6040 = vmatprep.subr.bf16.mxu0 %v6543_v53 }
 0x240   :  { %5805 = vmatmul.mubr.msk.bf16.gmra.mrb[124].mxu1 %vm1957_vm2, %v7295_v21  ;;  %v1724_v44 = vmax.f32 %v1372_v50, 0.0  ;;  %v1375_v46 = vadd.f32 %v7331_v47, %v1374_v40  ;;  %v1376_v12 = vpop.f32.mrb[151].mxu0 }
 0x241   :  { %5808 = vmatprep.mubr.msk.bf16.mxu1 %vm6544_vm0, %v6543_v53  ;;  %v6396_v12 = vld [vmem:[%s8519_s0 + $0x444] ss:$8 sps:$4 sm:$0xff]  }
 0x242   :  { %v1725_v48 = vmax.f32 %v1375_v46, 0.0  ;;  %1586 = vmatmul.mubr.bf16.gmra.mrb[0].mxu0 %v6380_v49  ;;  %v6390_v46 = vld [vmem:[%s8519_s0 + $0x430] ss:$8 sps:$4 sm:$0xff]  }
 0x243   :  { %v2106_v62 = vpop.f32.mrb[20].mxu1  ;;  %1593 = vmatprep.mubr.bf16.mxu0 %v6386_v43 }
 0x244   :  { %v7472_v26 = vadd.f32 %v2106_v62, %v7364_v13  ;;  %v5682_v4 = vpop.f32.mrb[21].mxu1  ;;  %v7474_v51 = vpack.c.bf16 %v1725_v48, %v1724_v44  ;;  %v6389_v13 = vld [vmem:[%s8519_s0 + $0x424] ss:$8 sps:$4 sm:$0xff]  }
 0x245   :  { %v2109_v52 = vpop.f32.mrb[22].mxu1  ;;  %v1379_v55 = vpop.f32.mrb[152].mxu0 }
 0x246   :  { %v7477_v21 = vadd.f32 %v2109_v52, %v7367_v18  ;;  %v5683_v59 = vpop.f32.mrb[23].mxu1  ;;  %v1380_v34 = vadd.f32 %v7331_v47, %v1379_v55  ;;  %v1381_v0 = vpop.f32.mrb[153].mxu0 }
 0x247   :  { %v1382_v3 = vpop.f32.mrb[154].mxu0 }
 0x248   :  { %5809 = vmatmul.mubr.msk.bf16.gmra.mrb[128].mxu1 %vm1957_vm2, %v7309_v33  ;;  %v1726_v6 = vmax.f32 %v1380_v34, 0.0  ;;  %v1383_v18 = vadd.f32 %v7331_v47, %v1382_v3  ;;  %v1384_v7 = vpop.f32.mrb[155].mxu0 }
 0x249   :  { %5812 = vmatprep.mubr.msk.bf16.mxu1 %vm6544_vm0, %v6543_v53 }
 0x24a   :  { %v1727_v41 = vmax.f32 %v1383_v18, 0.0  ;;  %1594 = vmatmul.mubr.bf16.gmra.mrb[4].mxu0 %v6384_v58 }
 0x24b   :  { %v2114_v11 = vpop.f32.mrb[24].mxu1  ;;  %1601 = vmatprep.mubr.bf16.mxu0 %v6389_v13 }
 0x24c   :  { %v7492_v60 = vadd.f32 %v2114_v11, %v7384_v31  ;;  %v5686_v15 = vpop.f32.mrb[25].mxu1  ;;  %v7494_v17 = vpack.c.bf16 %v1727_v41, %v1726_v6  ;;  %v6392_v31 = vld [vmem:[%s8519_s0 + $0x434] ss:$8 sps:$4 sm:$0xff]  }
 0x24d   :  { %v2117_v42 = vpop.f32.mrb[26].mxu1  ;;  %v1387_v19 = vpop.f32.mrb[156].mxu0  ;;  %v6399_v41 = vld [vmem:[%s8519_s0 + $0x454] ss:$8 sps:$4 sm:$0xff]  }
 0x24e   :  { %v7497_v33 = vadd.f32 %v2117_v42, %v7386_v37  ;;  %v5687_v20 = vpop.f32.mrb[27].mxu1  ;;  %v1388_v38 = vadd.f32 %v7331_v47, %v1387_v19  ;;  %v1389_v57 = vpop.f32.mrb[157].mxu0  ;;  %v6369_v42 = vld [vmem:[%s8522_s3 + $0x88] sm:$0xff]  }
 0x24f   :  { %v1390_v29 = vpop.f32.mrb[158].mxu0 }
 0x250   :  { %5813 = vmatmul.mubr.msk.bf16.gmra.mrb[132].mxu1 %vm1957_vm2, %v7323_v23  ;;  %v1728_v30 = vmax.f32 %v1388_v38, 0.0  ;;  %v1391_v37 = vadd.f32 %v7331_v47, %v1390_v29  ;;  %v1392_v35 = vpop.f32.mrb[159].mxu0 }
 0x251   :  { %5816 = vmatprep.mubr.msk.bf16.mxu1 %vm6544_vm0, %v6543_v53 }
 0x252   :  { %v1729_v32 = vmax.f32 %v1391_v37, 0.0  ;;  %1602 = vmatmul.mubr.bf16.gmra.mrb[8].mxu0 %v6387_v27 }
 0x253   :  { %v2122_v28 = vpop.f32.mrb[28].mxu1  ;;  %1609 = vmatprep.mubr.bf16.mxu0 %v6392_v31 }
 0x254   :  { %v7515_v5 = vadd.f32 %v2122_v28, %v7403_v61  ;;  %v5690_v23 = vpop.f32.mrb[29].mxu1  ;;  %v7517_v39 = vpack.c.bf16 %v1729_v32, %v1728_v30  ;;  %v6397_v32 = vld [vmem:[%s8519_s0 + $0x450] ss:$8 sps:$4 sm:$0xff]   ;;  %v6403_v28 = vld [vmem:[%s8519_s0 + $0x464] ss:$8 sps:$4 sm:$0xff]  }
 0x255   :  { %v2125_v50 = vpop.f32.mrb[30].mxu1  ;;  %v1395_v2 = vpop.f32.mrb[160].mxu0 }
 0x256   :  { %v7521_v49 = vadd.f32 %v2125_v50, %v7405_v16  ;;  %v5691_v40 = vpop.f32.mrb[31].mxu1  ;;  %v1396_v43 = vadd.f32 %v7331_v47, %v1395_v2  ;;  %v1397_v44 = vpop.f32.mrb[161].mxu0 }
 0x257   :  { %v1398_v61 = vpop.f32.mrb[162].mxu0 }
 0x258   :  { %5817 = vmatmul.mubr.msk.bf16.gmra.mrb[136].mxu1 %vm1957_vm2, %v7349_v10  ;;  %v1730_v48 = vmax.f32 %v1396_v43, 0.0  ;;  %v1399_v16 = vadd.f32 %v7331_v47, %v1398_v61  ;;  %v1400_v62 = vpop.f32.mrb[163].mxu0  ;;  %v6362_v10 = vld [vmem:[%s8522_s3 + $0x80] sm:$0xff]  }
 0x259   :  { %5824 = vmatprep.mubr.msk.bf16.mxu1 %vm6544_vm0, %v6543_v53 }
 0x25a   :  { %v1731_v4 = vmax.f32 %v1399_v16, 0.0  ;;  %1610 = vmatmul.mubr.bf16.gmra.mrb[12].mxu0 %v6390_v46 }
 0x25b   :  { %v2130_v52 = vpop.f32.mrb[32].mxu1  ;;  %1617 = vmatprep.mubr.bf16.mxu0 %v6396_v12 }
 0x25c   :  { %v7536_v55 = vadd.f32 %v2130_v52, %v7423_v9  ;;  %v5694_v59 = vpop.f32.mrb[33].mxu1  ;;  %v7538_v34 = vpack.c.bf16 %v1731_v4, %v1730_v48  ;;  %v6394_v9 = vld [vmem:[%s8519_s0 + $0x440] ss:$8 sps:$4 sm:$0xff]  }
 0x25d   :  { %v2133_v0 = vpop.f32.mrb[34].mxu1  ;;  %v1403_v58 = vpop.f32.mrb[164].mxu0 }
 0x25e   :  { %v7544_v3 = vadd.f32 %v2133_v0, %v7427_v56  ;;  %v5695_v13 = vpop.f32.mrb[35].mxu1  ;;  %v1404_v6 = vadd.f32 %v7331_v47, %v1403_v58  ;;  %v1405_v18 = vpop.f32.mrb[165].mxu0  ;;  %v2947_v57 = vrot.slane %v7538_v34, 4  ;;  %v6401_v0 = vld [vmem:[%s8519_s0 + $0x460] ss:$8 sps:$4 sm:$0xff]  }
 0x25f   :  { %v1406_v7 = vpop.f32.mrb[166].mxu0 }
 0x260   :  { %5825 = vmatmul.mubr.msk.bf16.vlgmr.msra.gmra.mrb[140].mxu1 %vm1957_vm2, %v7374_v24  ;;  %v1732_v11 = vmax.f32 %v1404_v6, 0.0  ;;  %v1407_v56 = vadd.f32 %v7331_v47, %v1406_v7  ;;  %v1408_v15 = vpop.f32.mrb[167].mxu0 }
 0x261   :  { %5845 = vmatpush3.bf16.msra.mxu1 %v6362_v10  ;;  %5828 = vmatprep.mubr.msk.bf16.mxu1 %vm6544_vm0, %v6543_v53 }
 0x262   :  { %5846 = vmatprep.subr.bf16.mxu1 %v6543_v53  ;;  %v1733_v19 = vmax.f32 %v1407_v56, 0.0  ;;  %1618 = vmatmul.mubr.bf16.gmra.mrb[16].mxu0 %v6394_v9 }
 0x263   :  { %v2138_v20 = vpop.f32.mrb[36].mxu1  ;;  %1625 = vmatprep.mubr.bf16.mxu0 %v6399_v41 }
 0x264   :  { %v7563_v24 = vadd.f32 %v2138_v20, %v7454_v54  ;;  %v5698_v38 = vpop.f32.mrb[37].mxu1  ;;  %v1835_v27 = vpack.c.bf16 %v1733_v19, %v1732_v11 }
 0x265   :  { %v2141_v29 = vpop.f32.mrb[38].mxu1  ;;  %5847 = vmatpush3.bf16.msra.mxu1 %v6369_v42  ;;  %v1411_v31 = vpop.f32.mrb[168].mxu0 }
 0x266   :  { %v5699_v30 = vpop.f32.mrb[39].mxu1  ;;  %5868 = vmatprep.subr.bf16.mxu1 %v6543_v53  ;;  %v2948_v37 = vrot.slane %v1835_v27, 4  ;;  %v1412_v35 = vadd.f32 %v7331_v47, %v1411_v31  ;;  %v1413_v45 = vpop.f32.mrb[169].mxu0 }
 0x267   :  { %v1414_v54 = vpop.f32.mrb[170].mxu0 }
 0x268   :  { %5829 = vmatmul.mubr.msk.bf16.gmra.mrb[144].mxu1 %vm1957_vm2, %v7399_v63  ;;  %v7577_v23 = vsel %vm1935_vm1, %v2947_v57, %v2948_v37  ;;  %v1734_v50 = vmax.f32 %v1412_v35, 0.0  ;;  %v1415_v2 = vadd.f32 %v7331_v47, %v1414_v54  ;;  %v1416_v40 = vpop.f32.mrb[171].mxu0  ;;  %v6405_v57 = vld [vmem:[%s8519_s0 + $0x470] ss:$8 sps:$4 sm:$0xff]  }
 0x269   :  { %5832 = vmatprep.mubr.msk.bf16.mxu1 %vm6544_vm0, %v6543_v53 }
 0x26a   :  { %v1735_v43 = vmax.f32 %v1415_v2, 0.0  ;;  %1626 = vmatmul.mubr.bf16.gmra.mrb[20].mxu0 %v6397_v32 }
 0x26b   :  { %v2205_v44 = vpop.f32.mrb[40].mxu1  ;;  %1633 = vmatprep.mubr.bf16.mxu0 %v6403_v28 }
 0x26c   :  { %v7583_v46 = vadd.f32 %v2205_v44, %v7472_v26  ;;  %v5706_v61 = vpop.f32.mrb[41].mxu1  ;;  %v1836_v12 = vpack.c.bf16 %v1735_v43, %v1734_v50  ;;  %v6407_v26 = vld [vmem:[%s8519_s0 + $0x474] ss:$8 sps:$4 sm:$0xff]  }
 0x26d   :  { %v2208_v63 = vpop.f32.mrb[42].mxu1  ;;  %v1419_v48 = vpop.f32.mrb[172].mxu0 }
 0x26e   :  { %v7586_v16 = vadd.f32 %v2208_v63, %v7477_v21  ;;  %v5707_v62 = vpop.f32.mrb[43].mxu1  ;;  %v2950_v4 = vrot.slane %v1836_v12, 4  ;;  %v1420_v52 = vadd.f32 %v7331_v47, %v1419_v48  ;;  %v1421_v59 = vpop.f32.mrb[173].mxu0 }
 0x26f   :  { %v1422_v10 = vpop.f32.mrb[174].mxu0 }
 0x270   :  { %5833 = vmatmul.mubr.msk.bf16.gmra.mrb[148].mxu1 %vm1957_vm2, %v7419_v8  ;;  %v1736_v58 = vmax.f32 %v1420_v52, 0.0  ;;  %v1423_v21 = vadd.f32 %v7331_v47, %v1422_v10  ;;  %v1424_v13 = vpop.f32.mrb[175].mxu0  ;;  %v7599_v6 = vsel %vm1935_vm1, %v2948_v37, %v2950_v4  ;;  %v6376_v52 = vld [vmem:[%s8522_s3 + $0x90] sm:$0xff]  }
 0x271   :  { %5836 = vmatprep.mubr.msk.bf16.mxu1 %vm6544_vm0, %v6543_v53 }
 0x272   :  { %v1737_v18 = vmax.f32 %v1423_v21, 0.0  ;;  %1634 = vmatmul.mubr.bf16.gmra.mrb[24].mxu0 %v6401_v0 }
 0x273   :  { %v2213_v9 = vpop.f32.mrb[44].mxu1  ;;  %1641 = vmatprep.mubr.bf16.mxu0 %v6407_v26 }
 0x274   :  { %v7604_v7 = vadd.f32 %v2213_v9, %v7492_v60  ;;  %v5710_v41 = vpop.f32.mrb[45].mxu1  ;;  %v1837_v11 = vpack.c.bf16 %v1737_v18, %v1736_v58 }
 0x275   :  { %v2216_v8 = vpop.f32.mrb[46].mxu1  ;;  %v1427_v56 = vpop.f32.mrb[176].mxu0 }
 0x276   :  { %v7607_v15 = vadd.f32 %v2216_v8, %v7497_v33  ;;  %v5711_v42 = vpop.f32.mrb[47].mxu1  ;;  %v2952_v19 = vrot.slane %v1837_v11, 4  ;;  %v1428_v20 = vadd.f32 %v7331_v47, %v1427_v56  ;;  %v1429_v38 = vpop.f32.mrb[177].mxu0 }
 0x277   :  { %v1430_v27 = vpop.f32.mrb[178].mxu0 }
 0x278   :  { %5837 = vmatmul.mubr.msk.bf16.gmra.mrb[152].mxu1 %vm1957_vm2, %v7445_v25  ;;  %v1738_v60 = vmax.f32 %v1428_v20, 0.0  ;;  %v1431_v29 = vadd.f32 %v7331_v47, %v1430_v27  ;;  %v1432_v31 = vpop.f32.mrb[179].mxu0  ;;  %v7617_v33 = vsel %vm1935_vm1, %v2950_v4, %v2952_v19 }
 0x279   :  { %5840 = vmatprep.mubr.msk.bf16.mxu1 %vm6544_vm0, %v6543_v53 }
 0x27a   :  { %v1739_v30 = vmax.f32 %v1431_v29, 0.0  ;;  %1642 = vmatmul.mubr.bf16.gmra.mrb[28].mxu0 %v6405_v57 }
 0x27b   :  { %v2221_v37 = vpop.f32.mrb[48].mxu1  ;;  %6044 = vmatprep.mubr.msk.bf16.mxu0 %vm6544_vm0, %v6543_v53 }
 0x27c   :  { %v7624_v35 = vadd.f32 %v2221_v37, %v7515_v5  ;;  %v5714_v25 = vpop.f32.mrb[49].mxu1  ;;  %v7626_v45 = vpack.c.bf16 %v1739_v30, %v1738_v60 }
 0x27d   :  { %v2224_v32 = vpop.f32.mrb[50].mxu1  ;;  %v1435_v54 = vpop.f32.mrb[180].mxu0 }
 0x27e   :  { %v7629_v28 = vadd.f32 %v2224_v32, %v7521_v49  ;;  %v5715_v50 = vpop.f32.mrb[51].mxu1  ;;  %v2954_v2 = vrot.slane %v7626_v45, 4  ;;  %v1436_v40 = vadd.f32 %v7331_v47, %v1435_v54  ;;  %v1437_v43 = vpop.f32.mrb[181].mxu0  ;;  %v6408_v45 = vld [vmem:[%s8522_s3 + $0xb0] sm:$0xff]  }
 0x27f   :  { %v1438_v44 = vpop.f32.mrb[182].mxu0 }
 0x280   :  { %5841 = vmatmul.mubr.msk.bf16.gmra.mrb[156].mxu1 %vm1957_vm2, %v2724_v22  ;;  %v7639_v5 = vsel %vm1935_vm1, %v2952_v19, %v2954_v2  ;;  %v1740_v61 = vmax.f32 %v1436_v40, 0.0  ;;  %v1439_v49 = vadd.f32 %v7331_v47, %v1438_v44  ;;  %v1440_v12 = vpop.f32.mrb[183].mxu0 }
 0x281   :  { %5848 = vmatprep.mubr.msk.bf16.mxu1 %vm6544_vm0, %v6543_v53 }
 0x282   :  { %v1741_v63 = vmax.f32 %v1439_v49, 0.0 }
 0x283   :  { %v2229_v48 = vpop.f32.mrb[52].mxu1 }
 0x284   :  { %v7645_v62 = vadd.f32 %v2229_v48, %v7536_v55  ;;  %v5718_v14 = vpop.f32.mrb[53].mxu1  ;;  %v7647_v4 = vpack.c.bf16 %v1741_v63, %v1740_v61 }
 0x285   :  { %v2232_v22 = vpop.f32.mrb[54].mxu1  ;;  %v1443_v59 = vpop.f32.mrb[184].mxu0 }
 0x286   :  { %v7653_v0 = vadd.f32 %v2232_v22, %v7544_v3  ;;  %v5719_v10 = vpop.f32.mrb[55].mxu1  ;;  %v1444_v26 = vadd.f32 %v7331_v47, %v1443_v59  ;;  %v1445_v58 = vpop.f32.mrb[185].mxu0  ;;  %v6383_v3 = vld [vmem:[%s8522_s3 + $0x98] sm:$0xff]  }
 0x287   :  { %v1446_v21 = vpop.f32.mrb[186].mxu0 }
 0x288   :  { %5849 = vmatmul.mubr.msk.bf16.vlgmr.msra.gmra.mrb[160].mxu1 %vm1957_vm2, %v7456_v36  ;;  %v1742_v55 = vmax.f32 %v1444_v26, 0.0  ;;  %v1447_v13 = vadd.f32 %v7331_v47, %v1446_v21  ;;  %v1448_v18 = vpop.f32.mrb[187].mxu0 }
 0x289   :  { %5869 = vmatpush3.bf16.msra.mxu1 %v6376_v52  ;;  %5852 = vmatprep.mubr.msk.bf16.mxu1 %vm6544_vm0, %v6543_v53 }
 0x28a   :  { %5870 = vmatprep.subr.bf16.mxu1 %v6543_v53  ;;  %v1743_v9 = vmax.f32 %v1447_v13, 0.0 }
 0x28b   :  { %v2237_v41 = vpop.f32.mrb[56].mxu1 }
 0x28c   :  { %v7666_v11 = vadd.f32 %v2237_v41, %v7563_v24  ;;  %v5722_v36 = vpop.f32.mrb[57].mxu1  ;;  %v7668_v8 = vpack.c.bf16 %v1743_v9, %v1742_v55 }
 0x28d   :  { %v2240_v56 = vpop.f32.mrb[58].mxu1  ;;  %5871 = vmatpush3.bf16.msra.mxu1 %v6383_v3  ;;  %v1451_v42 = vpop.f32.mrb[188].mxu0 }
 0x28e   :  { %v5723_v19 = vpop.f32.mrb[59].mxu1  ;;  %5892 = vmatprep.subr.bf16.mxu1 %v6543_v53  ;;  %v1452_v20 = vadd.f32 %v7331_v47, %v1451_v42  ;;  %v1453_v38 = vpop.f32.mrb[189].mxu0 }
 0x28f   :  { %v1454_v57 = vpop.f32.mrb[190].mxu0 }
 0x290   :  { %5853 = vmatmul.mubr.msk.bf16.gmra.mrb[164].mxu1 %vm1957_vm2, %v7474_v51  ;;  %v1744_v27 = vmax.f32 %v1452_v20, 0.0  ;;  %v1455_v24 = vadd.f32 %v7331_v47, %v1454_v57  ;;  %v1456_v60 = vpop.f32.mrb[191].mxu0 }
 0x291   :  { %5856 = vmatprep.mubr.msk.bf16.mxu1 %vm6544_vm0, %v6543_v53 }
 0x292   :  { %v1745_v29 = vmax.f32 %v1455_v24, 0.0 }
 0x293   :  { %v2327_v31 = vpop.f32.mrb[60].mxu1 }
 0x294   :  { %v7678_v30 = vadd.f32 %v2327_v31, %v7583_v46  ;;  %v5730_v37 = vpop.f32.mrb[61].mxu1  ;;  %v7680_v25 = vpack.c.bf16 %v1745_v29, %v1744_v27 }
 0x295   :  { %v2330_v32 = vpop.f32.mrb[62].mxu1  ;;  %v1459_v54 = vpop.f32.mrb[192].mxu0 }
 0x296   :  { %v7683_v50 = vadd.f32 %v2330_v32, %v7586_v16  ;;  %v5731_v51 = vpop.f32.mrb[63].mxu1  ;;  %v1460_v40 = vadd.f32 %v7331_v47, %v1459_v54  ;;  %v1461_v43 = vpop.f32.mrb[193].mxu0 }
 0x297   :  { %v1462_v44 = vpop.f32.mrb[194].mxu0 }
 0x298   :  { %5857 = vmatmul.mubr.msk.bf16.gmra.mrb[168].mxu1 %vm1957_vm2, %v7494_v17  ;;  %v1746_v61 = vmax.f32 %v1460_v40, 0.0  ;;  %v1463_v46 = vadd.f32 %v7331_v47, %v1462_v44  ;;  %v1464_v49 = vpop.f32.mrb[195].mxu0 }
 0x299   :  { %5860 = vmatprep.mubr.msk.bf16.mxu1 %vm6544_vm0, %v6543_v53 }
 0x29a   :  { %v1747_v12 = vmax.f32 %v1463_v46, 0.0 }
 0x29b   :  { %v2335_v63 = vpop.f32.mrb[64].mxu1 }
 0x29c   :  { %v7692_v16 = vadd.f32 %v2335_v63, %v7604_v7  ;;  %v5734_v48 = vpop.f32.mrb[65].mxu1  ;;  %v7694_v14 = vpack.c.bf16 %v1747_v12, %v1746_v61 }
 0x29d   :  { %v2338_v22 = vpop.f32.mrb[66].mxu1  ;;  %v1467_v52 = vpop.f32.mrb[196].mxu0 }
 0x29e   :  { %v7697_v59 = vadd.f32 %v2338_v22, %v7607_v15  ;;  %v5735_v17 = vpop.f32.mrb[67].mxu1  ;;  %v1468_v10 = vadd.f32 %v7331_v47, %v1467_v52  ;;  %v1469_v26 = vpop.f32.mrb[197].mxu0 }
 0x29f   :  { %v1470_v58 = vpop.f32.mrb[198].mxu0 }
 0x2a0   :  { %5861 = vmatmul.mubr.msk.bf16.gmra.mrb[172].mxu1 %vm1957_vm2, %v7517_v39  ;;  %v1748_v21 = vmax.f32 %v1468_v10, 0.0  ;;  %v1471_v7 = vadd.f32 %v7331_v47, %v1470_v58  ;;  %v1472_v55 = vpop.f32.mrb[199].mxu0 }
 0x2a1   :  { %5864 = vmatprep.mubr.msk.bf16.mxu1 %vm6544_vm0, %v6543_v53 }
 0x2a2   :  { %v1749_v13 = vmax.f32 %v1471_v7, 0.0 }
 0x2a3   :  { %v2343_v18 = vpop.f32.mrb[68].mxu1 }
 0x2a4   :  { %v5738_v3 = vpop.f32.mrb[69].mxu1  ;;  %v7706_v15 = vadd.f32 %v2343_v18, %v7624_v35  ;;  %v7708_v9 = vpack.c.bf16 %v1749_v13, %v1748_v21 }
 0x2a5   :  { %v2346_v41 = vpop.f32.mrb[70].mxu1  ;;  %v1475_v36 = vpop.f32.mrb[200].mxu0 }
 0x2a6   :  { %v5739_v56 = vpop.f32.mrb[71].mxu1  ;;  %v7711_v39 = vadd.f32 %v2346_v41, %v7629_v28  ;;  %v1476_v42 = vadd.f32 %v7331_v47, %v1475_v36  ;;  %v1477_v19 = vpop.f32.mrb[201].mxu0  ;;  %v3177_v29 = vrot.slane %v7708_v9, 4 }
 0x2a7   :  { %v1478_v20 = vpop.f32.mrb[202].mxu0 }
 0x2a8   :  { %5865 = vmatmul.mubr.msk.bf16.gmra.mrb[176].mxu1 %vm1957_vm2, %v7538_v34  ;;  %v1750_v38 = vmax.f32 %v1476_v42, 0.0  ;;  %v1479_v57 = vadd.f32 %v7331_v47, %v1478_v20  ;;  %v1480_v35 = vpop.f32.mrb[203].mxu0  ;;  %v6393_v34 = vld [vmem:[%s8522_s3 + $0xa0] sm:$0xff]  }
 0x2a9   :  { %5872 = vmatprep.mubr.msk.bf16.mxu1 %vm6544_vm0, %v6543_v53 }
 0x2aa   :  { %v1751_v27 = vmax.f32 %v1479_v57, 0.0 }
 0x2ab   :  { %v2351_v24 = vpop.f32.mrb[72].mxu1 }
 0x2ac   :  { %v5742_v60 = vpop.f32.mrb[73].mxu1  ;;  %v7720_v28 = vadd.f32 %v2351_v24, %v7645_v62  ;;  %v1844_v31 = vpack.c.bf16 %v1751_v27, %v1750_v38 }
 0x2ad   :  { %v2354_v37 = vpop.f32.mrb[74].mxu1  ;;  %v1483_v32 = vpop.f32.mrb[204].mxu0 }
 0x2ae   :  { %v5743_v54 = vpop.f32.mrb[75].mxu1  ;;  %v7727_v51 = vadd.f32 %v2354_v37, %v7653_v0  ;;  %v3178_v40 = vrot.slane %v1844_v31, 4  ;;  %v1484_v43 = vadd.f32 %v7331_v47, %v1483_v32  ;;  %v1485_v44 = vpop.f32.mrb[205].mxu0  ;;  %v6400_v0 = vld [vmem:[%s8522_s3 + $0xa8] sm:$0xff]  }
 0x2af   :  { %v1486_v61 = vpop.f32.mrb[206].mxu0 }
 0x2b0   :  { %5873 = vmatmul.mubr.msk.bf16.vlgmr.msra.gmra.mrb[180].mxu1 %vm1957_vm2, %v7577_v23  ;;  %v7733_v62 = vsel %vm1935_vm1, %v3177_v29, %v3178_v40  ;;  %v1752_v46 = vmax.f32 %v1484_v43, 0.0  ;;  %v1487_v49 = vadd.f32 %v7331_v47, %v1486_v61  ;;  %v1488_v12 = vpop.f32.mrb[207].mxu0 }
 0x2b1   :  { %5893 = vmatpush3.bf16.msra.mxu1 %v6393_v34  ;;  %5876 = vmatprep.mubr.msk.bf16.mxu1 %vm6544_vm0, %v6543_v53 }
 0x2b2   :  { %5894 = vmatprep.subr.bf16.mxu1 %v6543_v53  ;;  %v1753_v63 = vmax.f32 %v1487_v49, 0.0 }
 0x2b3   :  { %v2359_v48 = vpop.f32.mrb[76].mxu1 }
 0x2b4   :  { %v5746_v23 = vpop.f32.mrb[77].mxu1  ;;  %v7743_v22 = vadd.f32 %v2359_v48, %v7666_v11  ;;  %v1845_v52 = vpack.c.bf16 %v1753_v63, %v1752_v46 }
 0x2b5   :  { %v2362_v17 = vpop.f32.mrb[78].mxu1  ;;  %5895 = vmatpush3.bf16.msra.mxu1 %v6400_v0  ;;  %v1491_v10 = vpop.f32.mrb[208].mxu0 }
 0x2b6   :  { %v5747_v26 = vpop.f32.mrb[79].mxu1  ;;  %5916 = vmatprep.subr.bf16.mxu1 %v6543_v53  ;;  %v3180_v58 = vrot.slane %v1845_v52, 4  ;;  %v1492_v21 = vadd.f32 %v7331_v47, %v1491_v10  ;;  %v1493_v7 = vpop.f32.mrb[209].mxu0 }
 0x2b7   :  { %v1494_v55 = vpop.f32.mrb[210].mxu0 }
 0x2b8   :  { %5877 = vmatmul.mubr.msk.bf16.gmra.mrb[184].mxu1 %vm1957_vm2, %v7599_v6  ;;  %v1754_v13 = vmax.f32 %v1492_v21, 0.0  ;;  %v1495_v18 = vadd.f32 %v7331_v47, %v1494_v55  ;;  %v1496_v11 = vpop.f32.mrb[211].mxu0  ;;  %v7751_v3 = vsel %vm1935_vm1, %v3178_v40, %v3180_v58 }
 0x2b9   :  { %5880 = vmatprep.mubr.msk.bf16.mxu1 %vm6544_vm0, %v6543_v53 }
 0x2ba   :  { %v1755_v41 = vmax.f32 %v1495_v18, 0.0 }
 0x2bb   :  { %v2435_v36 = vpop.f32.mrb[80].mxu1 }
 0x2bc   :  { %v5754_v56 = vpop.f32.mrb[81].mxu1  ;;  %v7756_v42 = vadd.f32 %v2435_v36, %v7678_v30  ;;  %v1846_v19 = vpack.c.bf16 %v1755_v41, %v1754_v13 }
 0x2bd   :  { %v2438_v20 = vpop.f32.mrb[82].mxu1  ;;  %v1499_v38 = vpop.f32.mrb[212].mxu0 }
 0x2be   :  { %v5755_v6 = vpop.f32.mrb[83].mxu1  ;;  %v7759_v57 = vadd.f32 %v2438_v20, %v7683_v50  ;;  %v3182_v35 = vrot.slane %v1846_v19, 4  ;;  %v1500_v27 = vadd.f32 %v7331_v47, %v1499_v38  ;;  %v1501_v24 = vpop.f32.mrb[213].mxu0 }
 0x2bf   :  { %v1502_v60 = vpop.f32.mrb[214].mxu0 }
 0x2c0   :  { %5881 = vmatmul.mubr.msk.bf16.gmra.mrb[188].mxu1 %vm1957_vm2, %v7617_v33  ;;  %v1756_v29 = vmax.f32 %v1500_v27, 0.0  ;;  %v1503_v31 = vadd.f32 %v7331_v47, %v1502_v60  ;;  %v1504_v30 = vpop.f32.mrb[215].mxu0  ;;  %v7766_v37 = vsel %vm1935_vm1, %v3180_v58, %v3182_v35 }
 0x2c1   :  { %5884 = vmatprep.mubr.msk.bf16.mxu1 %vm6544_vm0, %v6543_v53 }
 0x2c2   :  { %v1757_v50 = vmax.f32 %v1503_v31, 0.0 }
 0x2c3   :  { %v2443_v34 = vpop.f32.mrb[84].mxu1 }
 0x2c4   :  { %v5758_v32 = vpop.f32.mrb[85].mxu1  ;;  %v7771_v54 = vadd.f32 %v2443_v34, %v7692_v16  ;;  %v7773_v40 = vpack.c.bf16 %v1757_v50, %v1756_v29 }
 0x2c5   :  { %v2446_v43 = vpop.f32.mrb[86].mxu1  ;;  %v1507_v33 = vpop.f32.mrb[216].mxu0 }
 0x2c6   :  { %v5759_v44 = vpop.f32.mrb[87].mxu1  ;;  %v7776_v61 = vadd.f32 %v2446_v43, %v7697_v59  ;;  %v3184_v46 = vrot.slane %v7773_v40, 4  ;;  %v1508_v49 = vadd.f32 %v7331_v47, %v1507_v33  ;;  %v1509_v12 = vpop.f32.mrb[217].mxu0  ;;  %v6412_v40 = vld [vmem:[%s8522_s3 + $0xd0] sm:$0xff]  }
 0x2c7   :  { %v1510_v0 = vpop.f32.mrb[218].mxu0 }
 0x2c8   :  { %5885 = vmatmul.mubr.msk.bf16.gmra.mrb[192].mxu1 %vm1957_vm2, %v7639_v5  ;;  %v7785_v16 = vsel %vm1935_vm1, %v3182_v35, %v3184_v46  ;;  %v1758_v63 = vmax.f32 %v1508_v49, 0.0  ;;  %v1511_v48 = vadd.f32 %v7331_v47, %v1510_v0  ;;  %v1512_v23 = vpop.f32.mrb[219].mxu0  ;;  %v7819_v35 = vld [vmem:[%s8521_s2] ss:$0 sm:$0xff] }
 0x2c9   :  { %5888 = vmatprep.mubr.msk.bf16.mxu1 %vm6544_vm0, %v6543_v53  ;;  %v6415_v23 = vld [vmem:[%s8524_s5 + $0x30] sm:$0xff]  }
 0x2ca   :  { %v1759_v59 = vmax.f32 %v1511_v48, 0.0  ;;  %6041 = vmatpush3.bf16.msra.mxu0 %v6415_v23 }
 0x2cb   :  { %v2451_v52 = vpop.f32.mrb[88].mxu1  ;;  %6042 = vmatprep.subr.bf16.mxu0 %v6543_v53 }
 0x2cc   :  { %v7791_v17 = vadd.f32 %v2451_v52, %v7706_v15  ;;  %v5762_v10 = vpop.f32.mrb[89].mxu1  ;;  %v7793_v26 = vpack.c.bf16 %v1759_v59, %v1758_v63 }
 0x2cd   :  { %v2454_v5 = vpop.f32.mrb[90].mxu1  ;;  %v1515_v58 = vpop.f32.mrb[220].mxu0 }
 0x2ce   :  { %v7796_v21 = vadd.f32 %v2454_v5, %v7711_v39  ;;  %v5763_v7 = vpop.f32.mrb[91].mxu1  ;;  %v1516_v55 = vadd.f32 %v7331_v47, %v1515_v58  ;;  %v1517_v13 = vpop.f32.mrb[221].mxu0 }
 0x2cf   :  { %v1518_v18 = vpop.f32.mrb[222].mxu0 }
 0x2d0   :  { %5889 = vmatmul.mubr.msk.bf16.gmra.mrb[196].mxu1 %vm1957_vm2, %v2954_v2  ;;  %v1760_v11 = vmax.f32 %v1516_v55, 0.0  ;;  %v1519_v15 = vadd.f32 %v7331_v47, %v1518_v18  ;;  %v1520_v41 = vpop.f32.mrb[223].mxu0 }
 0x2d1   :  { %5896 = vmatprep.mubr.msk.bf16.mxu1 %vm6544_vm0, %v6543_v53 }
 0x2d2   :  { %v1761_v36 = vmax.f32 %v1519_v15, 0.0 }
 0x2d3   :  { %v2459_v56 = vpop.f32.mrb[92].mxu1 }
 0x2d4   :  { %v7806_v39 = vadd.f32 %v2459_v56, %v7720_v28  ;;  %v5766_v19 = vpop.f32.mrb[93].mxu1  ;;  %v7808_v20 = vpack.c.bf16 %v1761_v36, %v1760_v11 }
 0x2d5   :  { %v2462_v38 = vpop.f32.mrb[94].mxu1  ;;  %v1523_v2 = vpop.f32.mrb[224].mxu0 }
 0x2d6   :  { %v7814_v47 = vadd.f32 %v2462_v38, %v7727_v51  ;;  %v5767_v6 = vpop.f32.mrb[95].mxu1  ;;  %v1524_v28 = vadd.f32 %v7819_v35, %v1523_v2  ;;  %v1525_v27 = vpop.f32.mrb[225].mxu0  ;;  %v6409_v51 = vld [vmem:[%s8522_s3 + $0xb8] sm:$0xff]  }
 0x2d7   :  { %v1526_v24 = vpop.f32.mrb[226].mxu0 }
 0x2d8   :  { %5897 = vmatmul.mubr.msk.bf16.vlgmr.msra.gmra.mrb[200].mxu1 %vm1957_vm2, %v7647_v4  ;;  %v1762_v60 = vmax.f32 %v1524_v28, 0.0  ;;  %v1527_v29 = vadd.f32 %v7819_v35, %v1526_v24  ;;  %v1528_v31 = vpop.f32.mrb[227].mxu0 }
 0x2d9   :  { %5917 = vmatpush3.bf16.msra.mxu1 %v6408_v45  ;;  %5900 = vmatprep.mubr.msk.bf16.mxu1 %vm6544_vm0, %v6543_v53 }
 0x2da   :  { %5918 = vmatprep.subr.bf16.mxu1 %v6543_v53  ;;  %v1763_v30 = vmax.f32 %v1527_v29, 0.0 }
 0x2db   :  { %v2467_v50 = vpop.f32.mrb[96].mxu1 }
 0x2dc   :  { %v7832_v34 = vadd.f32 %v2467_v50, %v7743_v22  ;;  %v5770_v4 = vpop.f32.mrb[97].mxu1  ;;  %v7834_v32 = vpack.c.bf16 %v1763_v30, %v1762_v60 }
 0x2dd   :  { %v2470_v43 = vpop.f32.mrb[98].mxu1  ;;  %5919 = vmatpush3.bf16.msra.mxu1 %v6409_v51  ;;  %v1531_v33 = vpop.f32.mrb[228].mxu0 }
 0x2de   :  { %v5771_v44 = vpop.f32.mrb[99].mxu1  ;;  %5940 = vmatprep.subr.bf16.mxu1 %v6543_v53  ;;  %v1532_v49 = vadd.f32 %v7819_v35, %v1531_v33  ;;  %v1533_v12 = vpop.f32.mrb[229].mxu0 }
 0x2df   :  { %v1534_v0 = vpop.f32.mrb[230].mxu0 }
 0x2e0   :  { %5901 = vmatmul.mubr.msk.bf16.gmra.mrb[204].mxu1 %vm1957_vm2, %v7668_v8  ;;  %v1764_v63 = vmax.f32 %v1532_v49, 0.0  ;;  %v1535_v22 = vadd.f32 %v7819_v35, %v1534_v0  ;;  %v1536_v48 = vpop.f32.mrb[231].mxu0 }
 0x2e1   :  { %5904 = vmatprep.mubr.msk.bf16.mxu1 %vm6544_vm0, %v6543_v53 }
 0x2e2   :  { %v1765_v59 = vmax.f32 %v1535_v22, 0.0 }
 0x2e3   :  { %v2557_v52 = vpop.f32.mrb[100].mxu1 }
 0x2e4   :  { %v7848_v10 = vadd.f32 %v2557_v52, %v7756_v42  ;;  %v5778_v8 = vpop.f32.mrb[101].mxu1  ;;  %v7850_v5 = vpack.c.bf16 %v1765_v59, %v1764_v63 }
 0x2e5   :  { %v2560_v58 = vpop.f32.mrb[102].mxu1  ;;  %v1539_v7 = vpop.f32.mrb[232].mxu0 }
 0x2e6   :  { %v7853_v55 = vadd.f32 %v2560_v58, %v7759_v57  ;;  %v5779_v13 = vpop.f32.mrb[103].mxu1  ;;  %v1540_v18 = vadd.f32 %v7819_v35, %v1539_v7  ;;  %v1541_v11 = vpop.f32.mrb[233].mxu0 }
 0x2e7   :  { %v1542_v15 = vpop.f32.mrb[234].mxu0 }
 0x2e8   :  { %5905 = vmatmul.mubr.msk.bf16.gmra.mrb[208].mxu1 %vm1957_vm2, %v7680_v25  ;;  %v1766_v41 = vmax.f32 %v1540_v18, 0.0  ;;  %v1543_v42 = vadd.f32 %v7819_v35, %v1542_v15  ;;  %v1544_v36 = vpop.f32.mrb[235].mxu0 }
 0x2e9   :  { %5908 = vmatprep.mubr.msk.bf16.mxu1 %vm6544_vm0, %v6543_v53 }
 0x2ea   :  { %v1767_v56 = vmax.f32 %v1543_v42, 0.0 }
 0x2eb   :  { %v2565_v19 = vpop.f32.mrb[104].mxu1 }
 0x2ec   :  { %v7862_v57 = vadd.f32 %v2565_v19, %v7771_v54  ;;  %v5782_v38 = vpop.f32.mrb[105].mxu1  ;;  %v7864_v45 = vpack.c.bf16 %v1767_v56, %v1766_v41 }
 0x2ed   :  { %v2568_v2 = vpop.f32.mrb[106].mxu1  ;;  %v1547_v6 = vpop.f32.mrb[236].mxu0 }
 0x2ee   :  { %v7867_v28 = vadd.f32 %v2568_v2, %v7776_v61  ;;  %v5783_v25 = vpop.f32.mrb[107].mxu1  ;;  %v1548_v27 = vadd.f32 %v7819_v35, %v1547_v6  ;;  %v1549_v24 = vpop.f32.mrb[237].mxu0  ;;  %v3407_v4 = vrot.slane %v7864_v45, 4 }
 0x2ef   :  { %v1550_v60 = vpop.f32.mrb[238].mxu0 }
 0x2f0   :  { %5909 = vmatmul.mubr.msk.bf16.gmra.mrb[212].mxu1 %vm1957_vm2, %v7694_v14  ;;  %v1768_v29 = vmax.f32 %v1548_v27, 0.0  ;;  %v1551_v54 = vadd.f32 %v7819_v35, %v1550_v60  ;;  %v1552_v31 = vpop.f32.mrb[239].mxu0 }
 0x2f1   :  { %5912 = vmatprep.mubr.msk.bf16.mxu1 %vm6544_vm0, %v6543_v53 }
 0x2f2   :  { %v1769_v51 = vmax.f32 %v1551_v54, 0.0 }
 0x2f3   :  { %v2573_v30 = vpop.f32.mrb[108].mxu1 }
 0x2f4   :  { %v7876_v61 = vadd.f32 %v2573_v30, %v7791_v17  ;;  %v5786_v50 = vpop.f32.mrb[109].mxu1  ;;  %v1853_v43 = vpack.c.bf16 %v1769_v51, %v1768_v29 }
 0x2f5   :  { %v2576_v33 = vpop.f32.mrb[110].mxu1  ;;  %v1555_v44 = vpop.f32.mrb[240].mxu0 }
 0x2f6   :  { %v7880_v14 = vadd.f32 %v2576_v33, %v7796_v21  ;;  %v5787_v49 = vpop.f32.mrb[111].mxu1  ;;  %v3408_v12 = vrot.slane %v1853_v43, 4  ;;  %v1556_v0 = vadd.f32 %v7819_v35, %v1555_v44  ;;  %v1557_v63 = vpop.f32.mrb[241].mxu0 }
 0x2f7   :  { %v1558_v22 = vpop.f32.mrb[242].mxu0 }
 0x2f8   :  { %5913 = vmatmul.mubr.msk.bf16.gmra.mrb[216].mxu1 %vm1957_vm2, %v7708_v9  ;;  %v7886_v17 = vsel %vm1935_vm1, %v3407_v4, %v3408_v12  ;;  %v1770_v48 = vmax.f32 %v1556_v0, 0.0  ;;  %v1559_v23 = vadd.f32 %v7819_v35, %v1558_v22  ;;  %v1560_v59 = vpop.f32.mrb[243].mxu0  ;;  %v6410_v9 = vld [vmem:[%s8522_s3 + $0xc0] sm:$0xff]  }
 0x2f9   :  { %5920 = vmatprep.mubr.msk.bf16.mxu1 %vm6544_vm0, %v6543_v53 }
 0x2fa   :  { %v1771_v21 = vmax.f32 %v1559_v23, 0.0 }
 0x2fb   :  { %v2581_v52 = vpop.f32.mrb[112].mxu1 }
 0x2fc   :  { %v7892_v8 = vadd.f32 %v2581_v52, %v7806_v39  ;;  %v5790_v58 = vpop.f32.mrb[113].mxu1  ;;  %v1854_v7 = vpack.c.bf16 %v1771_v21, %v1770_v48 }
 0x2fd   :  { %v2584_v13 = vpop.f32.mrb[114].mxu1  ;;  %v1563_v18 = vpop.f32.mrb[244].mxu0 }
 0x2fe   :  { %v7898_v11 = vadd.f32 %v2584_v13, %v7814_v47  ;;  %v5791_v15 = vpop.f32.mrb[115].mxu1  ;;  %v3410_v41 = vrot.slane %v1854_v7, 4  ;;  %v1564_v42 = vadd.f32 %v7819_v35, %v1563_v18  ;;  %v1565_v36 = vpop.f32.mrb[245].mxu0  ;;  %v6411_v47 = vld [vmem:[%s8522_s3 + $0xc8] sm:$0xff]  }
 0x2ff   :  { %v1566_v56 = vpop.f32.mrb[246].mxu0 }
 0x300   :  { %5921 = vmatmul.mubr.msk.bf16.vlgmr.msra.gmra.mrb[220].mxu1 %vm1957_vm2, %v7733_v62  ;;  %v7904_v39 = vsel %vm1935_vm1, %v3408_v12, %v3410_v41  ;;  %v1772_v19 = vmax.f32 %v1564_v42, 0.0  ;;  %v1567_v38 = vadd.f32 %v7819_v35, %v1566_v56  ;;  %v1568_v2 = vpop.f32.mrb[247].mxu0 }
 0x301   :  { %5941 = vmatpush3.bf16.msra.mxu1 %v6410_v9  ;;  %5924 = vmatprep.mubr.msk.bf16.mxu1 %vm6544_vm0, %v6543_v53 }
 0x302   :  { %5942 = vmatprep.subr.bf16.mxu1 %v6543_v53  ;;  %v1773_v6 = vmax.f32 %v1567_v38, 0.0 }
 0x303   :  { %v2589_v25 = vpop.f32.mrb[116].mxu1 }
 0x304   :  { %v7914_v62 = vadd.f32 %v2589_v25, %v7832_v34  ;;  %v5794_v27 = vpop.f32.mrb[117].mxu1  ;;  %v1855_v24 = vpack.c.bf16 %v1773_v6, %v1772_v19 }
 0x305   :  { %v2592_v60 = vpop.f32.mrb[118].mxu1  ;;  %5943 = vmatpush3.bf16.msra.mxu1 %v6411_v47  ;;  %v1571_v29 = vpop.f32.mrb[248].mxu0 }
 0x306   :  { %v5795_v54 = vpop.f32.mrb[119].mxu1  ;;  %5964 = vmatprep.subr.bf16.mxu1 %v6543_v53  ;;  %v3412_v31 = vrot.slane %v1855_v24, 4  ;;  %v1572_v51 = vadd.f32 %v7819_v35, %v1571_v29  ;;  %v1573_v30 = vpop.f32.mrb[249].mxu0 }
 0x307   :  { %v1574_v50 = vpop.f32.mrb[250].mxu0 }
 0x308   :  { %5925 = vmatmul.mubr.msk.bf16.gmra.mrb[224].mxu1 %vm1957_vm2, %v7751_v3  ;;  %v7921_v4 = vsel %vm1935_vm1, %v3410_v41, %v3412_v31  ;;  %v1774_v34 = vmax.f32 %v1572_v51, 0.0  ;;  %v1575_v43 = vadd.f32 %v7819_v35, %v1574_v50  ;;  %v1576_v33 = vpop.f32.mrb[251].mxu0 }
 0x309   :  { %5928 = vmatprep.mubr.msk.bf16.mxu1 %vm6544_vm0, %v6543_v53 }
 0x30a   :  { %v1775_v44 = vmax.f32 %v1575_v43, 0.0 }
 0x30b   :  { %v2665_v49 = vpop.f32.mrb[120].mxu1 }
 0x30c   :  { %v7927_v12 = vadd.f32 %v2665_v49, %v7848_v10  ;;  %v5802_v0 = vpop.f32.mrb[121].mxu1  ;;  %v7929_v63 = vpack.c.bf16 %v1775_v44, %v1774_v34 }
 0x30d   :  { %v2668_v22 = vpop.f32.mrb[122].mxu1  ;;  %v1579_v3 = vpop.f32.mrb[252].mxu0 }
 0x30e   :  { %v7932_v48 = vadd.f32 %v2668_v22, %v7853_v55  ;;  %v5803_v23 = vpop.f32.mrb[123].mxu1  ;;  %v3414_v59 = vrot.slane %v7929_v63, 4  ;;  %v1580_v21 = vadd.f32 %v7819_v35, %v1579_v3  ;;  %v1581_v52 = vpop.f32.mrb[253].mxu0  ;;  %v6418_v63 = vld [vmem:[%s8522_s3 + $0xf8] sm:$0xff]  }
 0x30f   :  { %v1582_v58 = vpop.f32.mrb[254].mxu0 }
 0x310   :  { %5929 = vmatmul.mubr.msk.bf16.gmra.mrb[228].mxu1 %vm1957_vm2, %v7766_v37  ;;  %v7941_v10 = vsel %vm1935_vm1, %v3412_v31, %v3414_v59  ;;  %v1776_v7 = vmax.f32 %v1580_v21, 0.0  ;;  %v1583_v13 = vadd.f32 %v7819_v35, %v1582_v58  ;;  %v1584_v55 = vpop.f32.mrb[255].mxu0 }
 0x311   :  { %5932 = vmatprep.mubr.msk.bf16.mxu1 %vm6544_vm0, %v6543_v53 }
 0x312   :  { %v1777_v9 = vmax.f32 %v1583_v13, 0.0 }
 0x313   :  { %v2673_v18 = vpop.f32.mrb[124].mxu1 }
 0x314   :  { %v7947_v15 = vadd.f32 %v2673_v18, %v7862_v57  ;;  %v5806_v41 = vpop.f32.mrb[125].mxu1  ;;  %v7949_v42 = vpack.c.bf16 %v1777_v9, %v1776_v7 }
 0x315   :  { %v2676_v37 = vpop.f32.mrb[126].mxu1  ;;  %v1587_v36 = vpop.f32.mrb[0].mxu0 }
 0x316   :  { %v7952_v56 = vadd.f32 %v2676_v37, %v7867_v28  ;;  %v5807_v19 = vpop.f32.mrb[127].mxu1  ;;  %v1588_v38 = vadd.f32 %v7819_v35, %v1587_v36  ;;  %v1589_v2 = vpop.f32.mrb[1].mxu0 }
 0x317   :  { %v1590_v47 = vpop.f32.mrb[2].mxu0 }
 0x318   :  { %5933 = vmatmul.mubr.msk.bf16.gmra.mrb[232].mxu1 %vm1957_vm2, %v7785_v16  ;;  %v1778_v6 = vmax.f32 %v1588_v38, 0.0  ;;  %v1591_v57 = vadd.f32 %v7819_v35, %v1590_v47  ;;  %v1592_v25 = vpop.f32.mrb[3].mxu0 }
 0x319   :  { %5936 = vmatprep.mubr.msk.bf16.mxu1 %vm6544_vm0, %v6543_v53 }
 0x31a   :  { %v1779_v27 = vmax.f32 %v1591_v57, 0.0 }
 0x31b   :  { %v2681_v24 = vpop.f32.mrb[128].mxu1 }
 0x31c   :  { %v7961_v28 = vadd.f32 %v2681_v24, %v7876_v61  ;;  %v5810_v60 = vpop.f32.mrb[129].mxu1  ;;  %v7963_v29 = vpack.c.bf16 %v1779_v27, %v1778_v6 }
 0x31d   :  { %v2684_v54 = vpop.f32.mrb[130].mxu1  ;;  %v1595_v31 = vpop.f32.mrb[4].mxu0 }
 0x31e   :  { %v7966_v51 = vadd.f32 %v2684_v54, %v7880_v14  ;;  %v5811_v16 = vpop.f32.mrb[131].mxu1  ;;  %v1596_v30 = vadd.f32 %v7819_v35, %v1595_v31  ;;  %v1597_v50 = vpop.f32.mrb[5].mxu0 }
 0x31f   :  { %v1598_v34 = vpop.f32.mrb[6].mxu0 }
 0x320   :  { %5937 = vmatmul.mubr.msk.bf16.gmra.mrb[236].mxu1 %vm1957_vm2, %v3184_v46  ;;  %v1780_v43 = vmax.f32 %v1596_v30, 0.0  ;;  %v1599_v61 = vadd.f32 %v7819_v35, %v1598_v34  ;;  %v1600_v33 = vpop.f32.mrb[7].mxu0 }
 0x321   :  { %5944 = vmatprep.mubr.msk.bf16.mxu1 %vm6544_vm0, %v6543_v53 }
 0x322   :  { %v1781_v44 = vmax.f32 %v1599_v61, 0.0 }
 0x323   :  { %v2689_v49 = vpop.f32.mrb[132].mxu1 }
 0x324   :  { %v7976_v14 = vadd.f32 %v2689_v49, %v7892_v8  ;;  %v5814_v0 = vpop.f32.mrb[133].mxu1  ;;  %v7978_v22 = vpack.c.bf16 %v1781_v44, %v1780_v43 }
 0x325   :  { %v2692_v3 = vpop.f32.mrb[134].mxu1  ;;  %v1603_v46 = vpop.f32.mrb[8].mxu0 }
 0x326   :  { %v7984_v23 = vadd.f32 %v2692_v3, %v7898_v11  ;;  %v5815_v21 = vpop.f32.mrb[135].mxu1  ;;  %v1604_v52 = vadd.f32 %v7819_v35, %v1603_v46  ;;  %v1605_v58 = vpop.f32.mrb[9].mxu0  ;;  %v6413_v11 = vld [vmem:[%s8522_s3 + $0xd8] sm:$0xff]  }
 0x327   :  { %v1606_v7 = vpop.f32.mrb[10].mxu0 }
 0x328   :  { %5945 = vmatmul.mubr.msk.bf16.vlgmr.msra.gmra.mrb[240].mxu1 %vm1957_vm2, %v7793_v26  ;;  %v1782_v8 = vmax.f32 %v1604_v52, 0.0  ;;  %v1607_v13 = vadd.f32 %v7819_v35, %v1606_v7  ;;  %v1608_v55 = vpop.f32.mrb[11].mxu0 }
 0x329   :  { %5965 = vmatpush3.bf16.msra.mxu1 %v6412_v40  ;;  %5948 = vmatprep.mubr.msk.bf16.mxu1 %vm6544_vm0, %v6543_v53 }
 0x32a   :  { %5966 = vmatprep.subr.bf16.mxu1 %v6543_v53  ;;  %v1783_v9 = vmax.f32 %v1607_v13, 0.0 }
 0x32b   :  { %v2697_v18 = vpop.f32.mrb[136].mxu1 }
 0x32c   :  { %v7997_v41 = vadd.f32 %v2697_v18, %v7914_v62  ;;  %v5818_v26 = vpop.f32.mrb[137].mxu1  ;;  %v7999_v37 = vpack.c.bf16 %v1783_v9, %v1782_v8 }
 0x32d   :  { %v2700_v36 = vpop.f32.mrb[138].mxu1  ;;  %5967 = vmatpush3.bf16.msra.mxu1 %v6413_v11  ;;  %v1611_v19 = vpop.f32.mrb[12].mxu0 }
 0x32e   :  { %v5819_v38 = vpop.f32.mrb[139].mxu1  ;;  %5988 = vmatprep.subr.bf16.mxu1 %v6543_v53  ;;  %v1612_v2 = vadd.f32 %v7819_v35, %v1611_v19  ;;  %v1613_v47 = vpop.f32.mrb[13].mxu0 }
 0x32f   :  { %v1614_v6 = vpop.f32.mrb[14].mxu0 }
 0x330   :  { %5949 = vmatmul.mubr.msk.bf16.gmra.mrb[244].mxu1 %vm1957_vm2, %v7808_v20  ;;  %v1784_v57 = vmax.f32 %v1612_v2, 0.0  ;;  %v1615_v62 = vadd.f32 %v7819_v35, %v1614_v6  ;;  %v1616_v25 = vpop.f32.mrb[15].mxu0 }
 0x331   :  { %5952 = vmatprep.mubr.msk.bf16.mxu1 %vm6544_vm0, %v6543_v53 }
 0x332   :  { %v1785_v27 = vmax.f32 %v1615_v62, 0.0 }
 0x333   :  { %v2787_v24 = vpop.f32.mrb[140].mxu1 }
 0x334   :  { %v8009_v60 = vadd.f32 %v2787_v24, %v7927_v12  ;;  %v5826_v54 = vpop.f32.mrb[141].mxu1  ;;  %v8011_v31 = vpack.c.bf16 %v1785_v27, %v1784_v57 }
 0x335   :  { %v2790_v16 = vpop.f32.mrb[142].mxu1  ;;  %v1619_v30 = vpop.f32.mrb[16].mxu0 }
 0x336   :  { %v8014_v50 = vadd.f32 %v2790_v16, %v7932_v48  ;;  %v5827_v20 = vpop.f32.mrb[143].mxu1  ;;  %v1620_v34 = vadd.f32 %v7819_v35, %v1619_v30  ;;  %v1621_v43 = vpop.f32.mrb[17].mxu0  ;;  %v3637_v40 = vrot.slane %v8011_v31, 4 }
 0x337   :  { %v1622_v61 = vpop.f32.mrb[18].mxu0 }
 0x338   :  { %5953 = vmatmul.mubr.msk.bf16.gmra.mrb[248].mxu1 %vm1957_vm2, %v7834_v32  ;;  %v1786_v33 = vmax.f32 %v1620_v34, 0.0  ;;  %v1623_v12 = vadd.f32 %v7819_v35, %v1622_v61  ;;  %v1624_v44 = vpop.f32.mrb[19].mxu0 }
 0x339   :  { %5956 = vmatprep.mubr.msk.bf16.mxu1 %vm6544_vm0, %v6543_v53 }
 0x33a   :  { %v1787_v49 = vmax.f32 %v1623_v12, 0.0 }
 0x33b   :  { %v2795_v0 = vpop.f32.mrb[144].mxu1 }
 0x33c   :  { %v8023_v48 = vadd.f32 %v2795_v0, %v7947_v15  ;;  %v5830_v3 = vpop.f32.mrb[145].mxu1  ;;  %v1862_v46 = vpack.c.bf16 %v1787_v49, %v1786_v33 }
 0x33d   :  { %v2798_v21 = vpop.f32.mrb[146].mxu1  ;;  %v1627_v52 = vpop.f32.mrb[20].mxu0 }
 0x33e   :  { %v8027_v32 = vadd.f32 %v2798_v21, %v7952_v56  ;;  %v5831_v58 = vpop.f32.mrb[147].mxu1  ;;  %v3638_v7 = vrot.slane %v1862_v46, 4  ;;  %v1628_v8 = vadd.f32 %v7819_v35, %v1627_v52  ;;  %v1629_v13 = vpop.f32.mrb[21].mxu0 }
 0x33f   :  { %v1630_v55 = vpop.f32.mrb[22].mxu0 }
 0x340   :  { %5957 = vmatmul.mubr.msk.bf16.gmra.mrb[252].mxu1 %vm1957_vm2, %v7850_v5  ;;  %v8033_v15 = vsel %vm1935_vm1, %v3637_v40, %v3638_v7  ;;  %v1788_v11 = vmax.f32 %v1628_v8, 0.0  ;;  %v1631_v9 = vadd.f32 %v7819_v35, %v1630_v55  ;;  %v1632_v18 = vpop.f32.mrb[23].mxu0 }
 0x341   :  { %5960 = vmatprep.mubr.msk.bf16.mxu1 %vm6544_vm0, %v6543_v53 }
 0x342   :  { %v1789_v56 = vmax.f32 %v1631_v9, 0.0 }
 0x343   :  { %v2803_v26 = vpop.f32.mrb[148].mxu1 }
 0x344   :  { %v8039_v36 = vadd.f32 %v2803_v26, %v7961_v28  ;;  %v5834_v19 = vpop.f32.mrb[149].mxu1  ;;  %v1863_v38 = vpack.c.bf16 %v1789_v56, %v1788_v11 }
 0x345   :  { %v2806_v2 = vpop.f32.mrb[150].mxu1  ;;  %v1635_v47 = vpop.f32.mrb[24].mxu0 }
 0x346   :  { %v8042_v5 = vadd.f32 %v2806_v2, %v7966_v51  ;;  %v5835_v6 = vpop.f32.mrb[151].mxu1  ;;  %v3640_v57 = vrot.slane %v1863_v38, 4  ;;  %v1636_v62 = vadd.f32 %v7819_v35, %v1635_v47  ;;  %v1637_v25 = vpop.f32.mrb[25].mxu0 }
 0x347   :  { %v1638_v27 = vpop.f32.mrb[26].mxu0 }
 0x348   :  { %5961 = vmatmul.mubr.msk.bf16.gmra.mrb[0].mxu1 %vm1957_vm2, %v7864_v45  ;;  %v8048_v24 = vsel %vm1935_vm1, %v3638_v7, %v3640_v57  ;;  %v1790_v28 = vmax.f32 %v1636_v62, 0.0  ;;  %v1639_v54 = vadd.f32 %v7819_v35, %v1638_v27  ;;  %v1640_v16 = vpop.f32.mrb[27].mxu0  ;;  %v6414_v45 = vld [vmem:[%s8522_s3 + $0xe0] sm:$0xff]  }
 0x349   :  { %5968 = vmatprep.mubr.msk.bf16.mxu1 %vm6544_vm0, %v6543_v53 }
 0x34a   :  { %v1791_v51 = vmax.f32 %v1639_v54, 0.0 }
 0x34b   :  { %v2811_v30 = vpop.f32.mrb[152].mxu1 }
 0x34c   :  { %v2831_v20 = vadd.f32 %v2811_v30, %v7976_v14  ;;  %v5838_v34 = vpop.f32.mrb[153].mxu1  ;;  %v1864_v43 = vpack.c.bf16 %v1791_v51, %v1790_v28 }
 0x34d   :  { %v2814_v61 = vpop.f32.mrb[154].mxu1  ;;  %v1643_v33 = vpop.f32.mrb[28].mxu0 }
 0x34e   :  { %v2832_v12 = vadd.f32 %v2814_v61, %v7984_v23  ;;  %v5839_v44 = vpop.f32.mrb[155].mxu1  ;;  %v3642_v49 = vrot.slane %v1864_v43, 4  ;;  %v1644_v0 = vadd.f32 %v7819_v35, %v1643_v33  ;;  %v1645_v3 = vpop.f32.mrb[29].mxu0  ;;  %v6416_v23 = vld [vmem:[%s8522_s3 + $0xe8] sm:$0xff]  }
 0x34f   :  { %v1646_v40 = vpop.f32.mrb[30].mxu0 }
 0x350   :  { %5969 = vmatmul.mubr.msk.bf16.vlgmr.msra.gmra.mrb[4].mxu1 %vm1957_vm2, %v7886_v17  ;;  %v8062_v14 = vsel %vm1935_vm1, %v3640_v57, %v3642_v49  ;;  %v1792_v46 = vmax.f32 %v1644_v0, 0.0  ;;  %v1647_v21 = vadd.f32 %v7819_v35, %v1646_v40  ;;  %v1648_v52 = vpop.f32.mrb[31].mxu0 }
 0x351   :  { %5989 = vmatpush3.bf16.msra.mxu1 %v6414_v45  ;;  %5972 = vmatprep.mubr.msk.bf16.mxu1 %vm6544_vm0, %v6543_v53 }
 0x352   :  { %5990 = vmatprep.subr.bf16.mxu1 %v6543_v53  ;;  %v1793_v58 = vmax.f32 %v1647_v21, 0.0 }
 0x353   :  { %v2819_v7 = vpop.f32.mrb[156].mxu1 }
 0x354   :  { %v2833_v17 = vadd.f32 %v2819_v7, %v7997_v41  ;;  %v5842_v8 = vpop.f32.mrb[157].mxu1  ;;  %v8072_v13 = vpack.c.bf16 %v1793_v58, %v1792_v46 }
 0x355   :  { %v2822_v55 = vpop.f32.mrb[158].mxu1  ;;  %5991 = vmatpush3.bf16.msra.mxu1 %v6416_v23 }
 0x356   :  { %v5843_v35 = vpop.f32.mrb[159].mxu1  ;;  %6012 = vmatprep.subr.bf16.mxu1 %v6543_v53  ;;  %v3644_v11 = vrot.slane %v8072_v13, 4 }
 0x358   :  { %5973 = vmatmul.mubr.msk.bf16.gmra.mrb[8].mxu1 %vm1957_vm2, %v7904_v39  ;;  %v8081_v9 = vsel %vm1935_vm1, %v3642_v49, %v3644_v11 }
 0x359   :  { %5976 = vmatprep.mubr.msk.bf16.mxu1 %vm6544_vm0, %v6543_v53 }
 0x35b   :  { %v2895_v41 = vpop.f32.mrb[160].mxu1 }
 0x35c   :  { %v2933_v18 = vadd.f32 %v2895_v41, %v8009_v60  ;;  %v5850_v56 = vpop.f32.mrb[161].mxu1 }
 0x35d   :  { %v2898_v26 = vpop.f32.mrb[162].mxu1 }
 0x35e   :  { %v2934_v19 = vadd.f32 %v2898_v26, %v8014_v50  ;;  %v5851_v38 = vpop.f32.mrb[163].mxu1 }
 0x360   :  { %5977 = vmatmul.mubr.msk.bf16.gmra.mrb[12].mxu1 %vm1957_vm2, %v7921_v4 }
 0x361   :  { %5980 = vmatprep.mubr.msk.bf16.mxu1 %vm6544_vm0, %v6543_v53 }
 0x363   :  { %v2903_v39 = vpop.f32.mrb[164].mxu1 }
 0x364   :  { %v2935_v2 = vadd.f32 %v2903_v39, %v8023_v48  ;;  %v5854_v47 = vpop.f32.mrb[165].mxu1  ;;  %v6419_v48 = vld [vmem:[%s8524_s5 + $0x38] sm:$0xff]  }
 0x365   :  { %v2906_v6 = vpop.f32.mrb[166].mxu1  ;;  %6043 = vmatpush3.bf16.msra.mxu0 %v6419_v48 }
 0x366   :  { %v2936_v57 = vadd.f32 %v2906_v6, %v8027_v32  ;;  %v5855_v62 = vpop.f32.mrb[167].mxu1  ;;  %6048 = vmatprep.subr.bf16.mxu0 %v6543_v53 }
 0x368   :  { %5981 = vmatmul.mubr.msk.bf16.gmra.mrb[16].mxu1 %vm1957_vm2, %v7941_v10 }
 0x369   :  { %5984 = vmatprep.mubr.msk.bf16.mxu1 %vm6544_vm0, %v6543_v53 }
 0x36b   :  { %v2911_v60 = vpop.f32.mrb[168].mxu1 }
 0x36c   :  { %v2937_v4 = vadd.f32 %v2911_v60, %v8039_v36  ;;  %v5858_v50 = vpop.f32.mrb[169].mxu1 }
 0x36d   :  { %v2914_v25 = vpop.f32.mrb[170].mxu1 }
 0x36e   :  { %v2938_v27 = vadd.f32 %v2914_v25, %v8042_v5  ;;  %v5859_v28 = vpop.f32.mrb[171].mxu1  ;;  %v6417_v5 = vld [vmem:[%s8522_s3 + $0xf0] sm:$0xff]  }
 0x370   :  { %5985 = vmatmul.mubr.msk.bf16.gmra.mrb[20].mxu1 %vm1957_vm2, %v3414_v59 }
 0x371   :  { %5992 = vmatprep.mubr.msk.bf16.mxu1 %vm6544_vm0, %v6543_v53 }
 0x373   :  { %v2919_v10 = vpop.f32.mrb[172].mxu1 }
 0x374   :  { %v2939_v32 = vadd.f32 %v2919_v10, %v2831_v20  ;;  %v5862_v36 = vpop.f32.mrb[173].mxu1 }
 0x375   :  { %v2922_v54 = vpop.f32.mrb[174].mxu1 }
 0x376   :  { %v2940_v16 = vadd.f32 %v2922_v54, %v2832_v12  ;;  %v5863_v51 = vpop.f32.mrb[175].mxu1 }
 0x378   :  { %5993 = vmatmul.mubr.msk.bf16.vlgmr.msra.gmra.mrb[24].mxu1 %vm1957_vm2, %v7949_v42 }
 0x379   :  { %6013 = vmatpush3.bf16.msra.mxu1 %v6417_v5  ;;  %5996 = vmatprep.mubr.msk.bf16.mxu1 %vm6544_vm0, %v6543_v53 }
 0x37a   :  { %6014 = vmatprep.subr.bf16.mxu1 %v6543_v53 }
 0x37b   :  { %v2927_v59 = vpop.f32.mrb[176].mxu1 }
 0x37c   :  { %v2941_v30 = vadd.f32 %v2927_v59, %v2833_v17  ;;  %v5866_v20 = vpop.f32.mrb[177].mxu1 }
 0x37d   :  { %v2930_v34 = vpop.f32.mrb[178].mxu1  ;;  %6015 = vmatpush3.bf16.msra.mxu1 %v6418_v63 }
 0x37e   :  { %v5867_v43 = vpop.f32.mrb[179].mxu1  ;;  %6072 = vmatprep.subr.bf16.mxu1 %v6543_v53 }
 0x380   :  { %5997 = vmatmul.mubr.msk.bf16.gmra.mrb[28].mxu1 %vm1957_vm2, %v7963_v29 }
 0x381   :  { %6000 = vmatprep.mubr.msk.bf16.mxu1 %vm6544_vm0, %v6543_v53 }
 0x383   :  { %v3017_v42 = vpop.f32.mrb[180].mxu1 }
 0x384   :  { %v3055_v61 = vadd.f32 %v3017_v42, %v2933_v18  ;;  %v5874_v45 = vpop.f32.mrb[181].mxu1 }
 0x385   :  { %v3020_v33 = vpop.f32.mrb[182].mxu1 }
 0x386   :  { %v3056_v12 = vadd.f32 %v3020_v33, %v2934_v19  ;;  %v5875_v44 = vpop.f32.mrb[183].mxu1 }
 0x388   :  { %6001 = vmatmul.mubr.msk.bf16.gmra.mrb[32].mxu1 %vm1957_vm2, %v7978_v22 }
 0x389   :  { %6004 = vmatprep.mubr.msk.bf16.mxu1 %vm6544_vm0, %v6543_v53 }
 0x38b   :  { %v3025_v49 = vpop.f32.mrb[184].mxu1 }
 0x38c   :  { %v3057_v0 = vadd.f32 %v3025_v49, %v2935_v2  ;;  %v5878_v3 = vpop.f32.mrb[185].mxu1 }
 0x38d   :  { %v3028_v40 = vpop.f32.mrb[186].mxu1 }
 0x38e   :  { %v3058_v29 = vadd.f32 %v3028_v40, %v2936_v57  ;;  %v5879_v46 = vpop.f32.mrb[187].mxu1 }
 0x390   :  { %6005 = vmatmul.mubr.msk.bf16.gmra.mrb[36].mxu1 %vm1957_vm2, %v7999_v37 }
 0x391   :  { %6008 = vmatprep.mubr.msk.bf16.mxu1 %vm6544_vm0, %v6543_v53 }
 0x393   :  { %v3033_v21 = vpop.f32.mrb[188].mxu1 }
 0x394   :  { %v3059_v52 = vadd.f32 %v3033_v21, %v2937_v4  ;;  %v5882_v23 = vpop.f32.mrb[189].mxu1 }
 0x395   :  { %v3036_v58 = vpop.f32.mrb[190].mxu1 }
 0x396   :  { %v3060_v22 = vadd.f32 %v3036_v58, %v2938_v27  ;;  %v5883_v7 = vpop.f32.mrb[191].mxu1 }
 0x398   :  { %6009 = vmatmul.mubr.msk.bf16.gmra.mrb[40].mxu1 %vm1957_vm2, %v8011_v31 }
 0x399   :  { %6016 = vmatprep.mubr.msk.bf16.mxu1 %vm6544_vm0, %v6543_v53 }
 0x39b   :  { %v3041_v17 = vpop.f32.mrb[192].mxu1 }
 0x39c   :  { %v3061_v8 = vadd.f32 %v3041_v17, %v2939_v32  ;;  %v5886_v55 = vpop.f32.mrb[193].mxu1 }
 0x39d   :  { %v3044_v35 = vpop.f32.mrb[194].mxu1 }
 0x39e   :  { %v3062_v37 = vadd.f32 %v3044_v35, %v2940_v16  ;;  %v5887_v41 = vpop.f32.mrb[195].mxu1 }
 0x3a0   :  { %6017 = vmatmul.mubr.msk.bf16.vlgmr.msra.gmra.mrb[44].mxu1 %vm1957_vm2, %v8033_v15 }
 0x3a1   :  { %6020 = vmatprep.mubr.msk.bf16.mxu1 %vm6544_vm0, %v6543_v53 }
 0x3a3   :  { %v3049_v18 = vpop.f32.mrb[196].mxu1 }
 0x3a4   :  { %v3063_v56 = vadd.f32 %v3049_v18, %v2941_v30  ;;  %v5890_v26 = vpop.f32.mrb[197].mxu1 }
 0x3a5   :  { %v3052_v19 = vpop.f32.mrb[198].mxu1  ;;  %v6421_v26 = vld [vmem:[%s8524_s5 + $0x68] sm:$0xff]  }
 0x3a6   :  { %v5891_v31 = vpop.f32.mrb[199].mxu1 }
 0x3a8   :  { %6021 = vmatmul.mubr.msk.bf16.gmra.mrb[48].mxu1 %vm1957_vm2, %v8048_v24 }
 0x3a9   :  { %6024 = vmatprep.mubr.msk.bf16.mxu1 %vm6544_vm0, %v6543_v53 }
 0x3ab   :  { %v3125_v38 = vpop.f32.mrb[200].mxu1 }
 0x3ac   :  { %v3163_v39 = vadd.f32 %v3125_v38, %v3055_v61  ;;  %v5898_v2 = vpop.f32.mrb[201].mxu1 }
 0x3ad   :  { %v3128_v47 = vpop.f32.mrb[202].mxu1 }
 0x3ae   :  { %v3164_v6 = vadd.f32 %v3128_v47, %v3056_v12  ;;  %v5899_v15 = vpop.f32.mrb[203].mxu1 }
 0x3b0   :  { %6025 = vmatmul.mubr.msk.bf16.gmra.mrb[52].mxu1 %vm1957_vm2, %v8062_v14 }
 0x3b1   :  { %6028 = vmatprep.mubr.msk.bf16.mxu1 %vm6544_vm0, %v6543_v53 }
 0x3b3   :  { %v3133_v57 = vpop.f32.mrb[204].mxu1 }
 0x3b4   :  { %v3165_v62 = vadd.f32 %v3133_v57, %v3057_v0  ;;  %v5902_v60 = vpop.f32.mrb[205].mxu1  ;;  %v6425_v57 = vld [vmem:[%s8524_s5 + $0x78] sm:$0xff]  }
 0x3b5   :  { %v3136_v4 = vpop.f32.mrb[206].mxu1 }
 0x3b6   :  { %v3166_v24 = vadd.f32 %v3136_v4, %v3058_v29  ;;  %v5903_v50 = vpop.f32.mrb[207].mxu1 }
 0x3b8   :  { %6029 = vmatmul.mubr.msk.bf16.gmra.mrb[56].mxu1 %vm1957_vm2, %v8081_v9 }
 0x3b9   :  { %6032 = vmatprep.mubr.msk.bf16.mxu1 %vm6544_vm0, %v6543_v53 }
 0x3bb   :  { %v3141_v25 = vpop.f32.mrb[208].mxu1 }
 0x3bc   :  { %v3167_v27 = vadd.f32 %v3141_v25, %v3059_v52  ;;  %v5906_v28 = vpop.f32.mrb[209].mxu1 }
 0x3bd   :  { %v3144_v48 = vpop.f32.mrb[210].mxu1 }
 0x3be   :  { %v3168_v14 = vadd.f32 %v3144_v48, %v3060_v22  ;;  %v5907_v10 = vpop.f32.mrb[211].mxu1 }
 0x3c0   :  { %6033 = vmatmul.mubr.msk.bf16.gmra.mrb[60].mxu1 %vm1957_vm2, %v3644_v11 }
 0x3c1   :  { %6080 = vmatprep.mubr.msk.bf16.mxu1 %vm6544_vm0, %v6543_v53 }
 0x3c3   :  { %v3149_v32 = vpop.f32.mrb[212].mxu1 }
 0x3c4   :  { %v3169_v36 = vadd.f32 %v3149_v32, %v3061_v8  ;;  %v5910_v54 = vpop.f32.mrb[213].mxu1 }
 0x3c5   :  { %v3152_v9 = vpop.f32.mrb[214].mxu1 }
 0x3c6   :  { %v3170_v5 = vadd.f32 %v3152_v9, %v3062_v37  ;;  %v5911_v16 = vpop.f32.mrb[215].mxu1 }
 0x3cb   :  { %v3157_v51 = vpop.f32.mrb[216].mxu1 }
 0x3cc   :  { %v3171_v63 = vadd.f32 %v3157_v51, %v3063_v56  ;;  %v5914_v59 = vpop.f32.mrb[217].mxu1  ;;  %v6420_v56 = vld [vmem:[%s8524_s5 + $0x60] sm:$0xff]  }
 0x3cd   :  { %v3160_v30 = vpop.f32.mrb[218].mxu1  ;;  %6073 = vmatpush3.bf16.msra.mxu1 %v6420_v56 }
 0x3ce   :  { %v5915_v20 = vpop.f32.mrb[219].mxu1  ;;  %6074 = vmatprep.subr.bf16.mxu1 %v6543_v53 }
 0x3d1   :  { %6075 = vmatpush3.bf16.msra.mxu1 %v6421_v26 }
 0x3d2   :  { %6076 = vmatprep.subr.bf16.mxu1 %v6543_v53 }
 0x3d3   :  { %v3247_v34 = vpop.f32.mrb[220].mxu1 }
 0x3d4   :  { %v3285_v43 = vadd.f32 %v3247_v34, %v3163_v39  ;;  %v5922_v42 = vpop.f32.mrb[221].mxu1 }
 0x3d5   :  { %v3250_v13 = vpop.f32.mrb[222].mxu1 }
 0x3d6   :  { %v3286_v61 = vadd.f32 %v3250_v13, %v3164_v6  ;;  %v5923_v11 = vpop.f32.mrb[223].mxu1  ;;  %v6423_v6 = vld [vmem:[%s8524_s5 + $0x70] sm:$0xff]  }
 0x3d7   :  { %6077 = vmatpush3.bf16.msra.mxu1 %v6423_v6 }
 0x3d8   :  { %6078 = vmatprep.subr.bf16.mxu1 %v6543_v53 }
 0x3db   :  { %v3255_v45 = vpop.f32.mrb[224].mxu1  ;;  %6079 = vmatpush3.bf16.msra.mxu1 %v6425_v57 }
 0x3dc   :  { %v3287_v33 = vadd.f32 %v3255_v45, %v3165_v62  ;;  %v5926_v12 = vpop.f32.mrb[225].mxu1  ;;  %6096 = vmatprep.subr.bf16.mxu1 %v6543_v53 }
 0x3dd   :  { %v3258_v44 = vpop.f32.mrb[226].mxu1 }
 0x3de   :  { %v3288_v49 = vadd.f32 %v3258_v44, %v3166_v24  ;;  %v5927_v0 = vpop.f32.mrb[227].mxu1 }
 0x3e3   :  { %v3263_v3 = vpop.f32.mrb[228].mxu1 }
 0x3e4   :  { %v3289_v40 = vadd.f32 %v3263_v3, %v3167_v27  ;;  %v5930_v29 = vpop.f32.mrb[229].mxu1 }
 0x3e5   :  { %v3266_v46 = vpop.f32.mrb[230].mxu1 }
 0x3e6   :  { %v3290_v21 = vadd.f32 %v3266_v46, %v3168_v14  ;;  %v5931_v52 = vpop.f32.mrb[231].mxu1 }
 0x3eb   :  { %v3271_v23 = vpop.f32.mrb[232].mxu1 }
 0x3ec   :  { %v3291_v58 = vadd.f32 %v3271_v23, %v3169_v36  ;;  %v5934_v22 = vpop.f32.mrb[233].mxu1 }
 0x3ed   :  { %v3274_v7 = vpop.f32.mrb[234].mxu1 }
 0x3ee   :  { %v3292_v17 = vadd.f32 %v3274_v7, %v3170_v5  ;;  %v5935_v8 = vpop.f32.mrb[235].mxu1 }
 0x3f3   :  { %v3279_v55 = vpop.f32.mrb[236].mxu1 }
 0x3f4   :  { %v3293_v35 = vadd.f32 %v3279_v55, %v3171_v63  ;;  %v5938_v37 = vpop.f32.mrb[237].mxu1 }
 0x3f5   :  { %v3282_v41 = vpop.f32.mrb[238].mxu1 }
 0x3f6   :  { %v5939_v18 = vpop.f32.mrb[239].mxu1 }
 0x3fb   :  { %v3355_v19 = vpop.f32.mrb[240].mxu1 }
 0x3fc   :  { %v3393_v31 = vadd.f32 %v3355_v19, %v3285_v43  ;;  %v5946_v38 = vpop.f32.mrb[241].mxu1 }
 0x3fd   :  { %v3358_v39 = vpop.f32.mrb[242].mxu1 }
 0x3fe   :  { %v3394_v2 = vadd.f32 %v3358_v39, %v3286_v61  ;;  %v5947_v47 = vpop.f32.mrb[243].mxu1 }
 0x403   :  { %v3363_v15 = vpop.f32.mrb[244].mxu1 }
 0x404   :  { %v3395_v62 = vadd.f32 %v3363_v15, %v3287_v33  ;;  %v5950_v60 = vpop.f32.mrb[245].mxu1 }
 0x405   :  { %v3366_v4 = vpop.f32.mrb[246].mxu1 }
 0x406   :  { %v3396_v24 = vadd.f32 %v3366_v4, %v3288_v49  ;;  %v5951_v50 = vpop.f32.mrb[247].mxu1 }
 0x40b   :  { %v3371_v25 = vpop.f32.mrb[248].mxu1 }
 0x40c   :  { %v3397_v27 = vadd.f32 %v3371_v25, %v3289_v40  ;;  %v5954_v28 = vpop.f32.mrb[249].mxu1 }
 0x40d   :  { %v3374_v48 = vpop.f32.mrb[250].mxu1 }
 0x40e   :  { %v3398_v14 = vadd.f32 %v3374_v48, %v3290_v21  ;;  %v5955_v10 = vpop.f32.mrb[251].mxu1 }
 0x413   :  { %v3379_v32 = vpop.f32.mrb[252].mxu1 }
 0x414   :  { %v3399_v36 = vadd.f32 %v3379_v32, %v3291_v58  ;;  %v5958_v54 = vpop.f32.mrb[253].mxu1 }
 0x415   :  { %v3382_v9 = vpop.f32.mrb[254].mxu1 }
 0x416   :  { %v3400_v5 = vadd.f32 %v3382_v9, %v3292_v17  ;;  %v5959_v16 = vpop.f32.mrb[255].mxu1 }
 0x41b   :  { %v3387_v51 = vpop.f32.mrb[0].mxu1 }
 0x41c   :  { %v3401_v63 = vadd.f32 %v3387_v51, %v3293_v35  ;;  %v5962_v59 = vpop.f32.mrb[1].mxu1 }
 0x41d   :  { %v3390_v30 = vpop.f32.mrb[2].mxu1  ;;  %v8182_v59 = vld [vmem:[%s8523_s4] ss:$0 sm:$0xff] }
 0x41e   :  { %v5963_v20 = vpop.f32.mrb[3].mxu1 }
 0x423   :  { %v3477_v34 = vpop.f32.mrb[4].mxu1 }
 0x424   :  { %v3515_v43 = vadd.f32 %v3477_v34, %v3393_v31  ;;  %v5970_v42 = vpop.f32.mrb[5].mxu1 }
 0x425   :  { %v3480_v13 = vpop.f32.mrb[6].mxu1 }
 0x426   :  { %v3516_v61 = vadd.f32 %v3480_v13, %v3394_v2  ;;  %v5971_v11 = vpop.f32.mrb[7].mxu1 }
 0x42b   :  { %v3485_v45 = vpop.f32.mrb[8].mxu1 }
 0x42c   :  { %v3517_v33 = vadd.f32 %v3485_v45, %v3395_v62  ;;  %v5974_v12 = vpop.f32.mrb[9].mxu1 }
 0x42d   :  { %v3488_v44 = vpop.f32.mrb[10].mxu1 }
 0x42e   :  { %v3518_v49 = vadd.f32 %v3488_v44, %v3396_v24  ;;  %v5975_v0 = vpop.f32.mrb[11].mxu1 }
 0x433   :  { %v3493_v3 = vpop.f32.mrb[12].mxu1 }
 0x434   :  { %v3519_v40 = vadd.f32 %v3493_v3, %v3397_v27  ;;  %v5978_v29 = vpop.f32.mrb[13].mxu1  ;;  %v6422_v3 = vld [vmem:[%s8524_s5] sm:$0xff]  }
 0x435   :  { %v3496_v46 = vpop.f32.mrb[14].mxu1 }
 0x436   :  { %v3520_v21 = vadd.f32 %v3496_v46, %v3398_v14  ;;  %v5979_v52 = vpop.f32.mrb[15].mxu1 }
 0x43b   :  { %v3501_v23 = vpop.f32.mrb[16].mxu1 }
 0x43c   :  { %v3521_v58 = vadd.f32 %v3501_v23, %v3399_v36  ;;  %v5982_v22 = vpop.f32.mrb[17].mxu1  ;;  %v6424_v23 = vld [vmem:[%s8524_s5 + $0x8] sm:$0xff]  }
 0x43d   :  { %v3504_v7 = vpop.f32.mrb[18].mxu1 }
 0x43e   :  { %v3522_v17 = vadd.f32 %v3504_v7, %v3400_v5  ;;  %v5983_v8 = vpop.f32.mrb[19].mxu1 }
 0x443   :  { %v3509_v55 = vpop.f32.mrb[20].mxu1 }
 0x444   :  { %v3523_v35 = vadd.f32 %v3509_v55, %v3401_v63  ;;  %v5986_v37 = vpop.f32.mrb[21].mxu1 }
 0x445   :  { %v3512_v41 = vpop.f32.mrb[22].mxu1  ;;  %v6426_v37 = vld [vmem:[%s8524_s5 + $0x10] sm:$0xff]  }
 0x446   :  { %v5987_v18 = vpop.f32.mrb[23].mxu1  ;;  %v6427_v41 = vld [vmem:[%s8524_s5 + $0xa0] sm:$0xff]  }
 0x44b   :  { %v3585_v56 = vpop.f32.mrb[24].mxu1 }
 0x44c   :  { %v3623_v26 = vadd.f32 %v3585_v56, %v3515_v43  ;;  %v5994_v19 = vpop.f32.mrb[25].mxu1 }
 0x44d   :  { %v3588_v31 = vpop.f32.mrb[26].mxu1 }
 0x44e   :  { %v3624_v38 = vadd.f32 %v3588_v31, %v3516_v61  ;;  %v5995_v39 = vpop.f32.mrb[27].mxu1 }
 0x44f   :  { %v6429_v39 = vld [vmem:[%s8524_s5 + $0xa8] sm:$0xff]  }
 0x453   :  { %v3593_v2 = vpop.f32.mrb[28].mxu1 }
 0x454   :  { %v3625_v47 = vadd.f32 %v3593_v2, %v3517_v33  ;;  %v5998_v6 = vpop.f32.mrb[29].mxu1 }
 0x455   :  { %v3596_v15 = vpop.f32.mrb[30].mxu1 }
 0x456   :  { %v3626_v57 = vadd.f32 %v3596_v15, %v3518_v49  ;;  %v5999_v62 = vpop.f32.mrb[31].mxu1 }
 0x45b   :  { %v3601_v60 = vpop.f32.mrb[32].mxu1 }
 0x45c   :  { %v3627_v4 = vadd.f32 %v3601_v60, %v3519_v40  ;;  %v6002_v24 = vpop.f32.mrb[33].mxu1 }
 0x45d   :  { %v3604_v50 = vpop.f32.mrb[34].mxu1  ;;  %v6431_v24 = vld [vmem:[%s8524_s5 + $0xb0] sm:$0xff]  }
 0x45e   :  { %v3628_v25 = vadd.f32 %v3604_v50, %v3520_v21  ;;  %v6003_v27 = vpop.f32.mrb[35].mxu1 }
 0x463   :  { %v3609_v28 = vpop.f32.mrb[36].mxu1 }
 0x464   :  { %v8173_v48 = vadd.f32 %v3609_v28, %v3521_v58  ;;  %v6006_v14 = vpop.f32.mrb[37].mxu1 }
 0x465   :  { %v3612_v10 = vpop.f32.mrb[38].mxu1  ;;  %v6433_v14 = vld [vmem:[%s8524_s5 + $0xb8] sm:$0xff]  }
 0x466   :  { %v8175_v32 = vadd.f32 %v3612_v10, %v3522_v17  ;;  %v6007_v36 = vpop.f32.mrb[39].mxu1 }
 0x46b   :  { %v3617_v54 = vpop.f32.mrb[40].mxu1 }
 0x46c   :  { %v8177_v9 = vadd.f32 %v3617_v54, %v3523_v35  ;;  %v6010_v5 = vpop.f32.mrb[41].mxu1 }
 0x46d   :  { %v3620_v16 = vpop.f32.mrb[42].mxu1 }
 0x46e   :  { %v6011_v51 = vpop.f32.mrb[43].mxu1 }
 0x46f   :  { %v6434_v51 = vld [vmem:[%s8524_s5 + $0x50] sm:$0xff]  }
 0x473   :  { %v3707_v63 = vpop.f32.mrb[44].mxu1 }
 0x474   :  { %v3745_v30 = vadd.f32 %v3707_v63, %v3623_v26  ;;  %v6018_v20 = vpop.f32.mrb[45].mxu1  ;;  %v6435_v63 = vld [vmem:[%s8524_s5 + $0xe0] sm:$0xff]  }
 0x475   :  { %v3710_v34 = vpop.f32.mrb[46].mxu1 }
 0x476   :  { %v3761_v43 = vadd.f32 %v8182_v59, %v3745_v30  ;;  %v3746_v42 = vadd.f32 %v3710_v34, %v3624_v38  ;;  %v6019_v13 = vpop.f32.mrb[47].mxu1  ;;  %v6428_v38 = vld [vmem:[%s8524_s5 + $0x18] sm:$0xff]  }
 0x477   :  { %v6439_v13 = vld [vmem:[%s8524_s5 + $0xf0] sm:$0xff]  }
 0x478   :  { %v3762_v61 = vadd.f32 %v8182_v59, %v3746_v42  ;;  %v3770_v11 = vmax.f32 %v3761_v43, 0.0  ;;  %v6436_v43 = vld [vmem:[%s8524_s5 + $0x58] sm:$0xff]   ;;  %v6437_v42 = vld [vmem:[%s8524_s5 + $0xe8] sm:$0xff]  }
 0x47a   :  { %v3771_v45 = vmax.f32 %v3762_v61, 0.0  ;;  %v6440_v61 = vld [vmem:[%s8524_s5 + $0x88] sm:$0xff]  }
 0x47b   :  { %v3715_v33 = vpop.f32.mrb[48].mxu1 }
 0x47c   :  { %v3779_v12 = vpack.c.bf16 %v3771_v45, %v3770_v11  ;;  %v3747_v44 = vadd.f32 %v3715_v33, %v3625_v47  ;;  %v6022_v49 = vpop.f32.mrb[49].mxu1  ;;  %v6441_v11 = vld [vmem:[%s8524_s5 + $0xf8] sm:$0xff]   ;;  %v6442_v45 = vld [vmem:[%s8524_s5 + $0x90] sm:$0xff]  }
 0x47d   :  { %v3718_v0 = vpop.f32.mrb[50].mxu1  ;;  %v6445_v49 = vld [vmem:[%s8524_s5 + $0xc8] sm:$0xff]  }
 0x47e   :  { %v3857_v40 = vrot.slane %v3779_v12, 4  ;;  %v3763_v29 = vadd.f32 %v8182_v59, %v3747_v44  ;;  %v3748_v46 = vadd.f32 %v3718_v0, %v3626_v57  ;;  %v6023_v21 = vpop.f32.mrb[51].mxu1  ;;  %v6444_v44 = vld [vmem:[%s8524_s5 + $0xc0] sm:$0xff]   ;;  %v6446_v0 = vld [vmem:[%s8524_s5 + $0xd0] sm:$0xff]  }
 0x47f   :  { %v6451_v21 = vld [vmem:[%s8524_s5 + $0x118] sm:$0xff]  }
 0x480   :  { %v3764_v52 = vadd.f32 %v8182_v59, %v3748_v46  ;;  %6045 = vmatmul.mubr.msk.bf16.vlgmr.msra.gmra.mrb[32].mxu0 %vm3882_vm3, %v3857_v40  ;;  %v3772_v58 = vmax.f32 %v3763_v29, 0.0  ;;  %v6448_v40 = vld [vmem:[%s8524_s5 + $0x100] sm:$0xff]   ;;  %v6449_v29 = vld [vmem:[%s8524_s5 + $0x108] sm:$0xff]   ;;  %v6450_v46 = vld [vmem:[%s8524_s5 + $0x110] sm:$0xff]  }
 0x481   :  { %6049 = vmatpush3.bf16.msra.mxu0 %v6422_v3  ;;  %6056 = vmatprep.mubr.msk.bf16.mxu0 %vm6544_vm0, %v6543_v53  ;;  %v6447_v3 = vld [vmem:[%s8524_s5 + $0xd8] sm:$0xff]  }
 0x482   :  { %v3773_v22 = vmax.f32 %v3764_v52, 0.0  ;;  %6050 = vmatprep.subr.bf16.mxu0 %v6543_v53 }
 0x483   :  { %v3723_v7 = vpop.f32.mrb[52].mxu1 }
 0x484   :  { %v8198_v17 = vpack.c.bf16 %v3773_v22, %v3772_v58  ;;  %v3749_v8 = vadd.f32 %v3723_v7, %v3627_v4  ;;  %v6026_v55 = vpop.f32.mrb[53].mxu1  ;;  %v6430_v4 = vld [vmem:[%s8524_s5 + $0x40] sm:$0xff]  }
 0x485   :  { %6051 = vmatpush3.bf16.msra.mxu0 %v6424_v23  ;;  %v3726_v35 = vpop.f32.mrb[54].mxu1  ;;  %v6452_v58 = vld [vmem:[%s8526_s7] ss:$8 sps:$4 sm:$0xff]   ;;  %v6454_v22 = vld [vmem:[%s8526_s7 + $0x4] ss:$8 sps:$4 sm:$0xff]  }
 0x486   :  { %v4062_v18 = vrot.slane %v8198_v17, 4  ;;  %v3765_v56 = vadd.f32 %v8182_v59, %v3749_v8  ;;  %v3750_v26 = vadd.f32 %v3726_v35, %v3628_v25  ;;  %6052 = vmatprep.subr.bf16.mxu0 %v6543_v53  ;;  %v6027_v19 = vpop.f32.mrb[55].mxu1  ;;  %v6455_v7 = vld [vmem:[%s8526_s7 + $0x40] ss:$8 sps:$4 sm:$0xff]   ;;  %v6463_v8 = vld [vmem:[%s8526_s7 + $0x54] ss:$8 sps:$4 sm:$0xff]  }
 0x487   :  { %v6458_v55 = vld [vmem:[%s8526_s7 + $0x10] ss:$8 sps:$4 sm:$0xff]  }
 0x488   :  { %v3766_v31 = vadd.f32 %v8182_v59, %v3750_v26  ;;  %6081 = vmatmul.mubr.msk.bf16.vlgmr.msra.gmra.mrb[64].mxu1 %vm3882_vm3, %v4062_v18  ;;  %v3774_v2 = vmax.f32 %v3765_v56, 0.0  ;;  %v6461_v35 = vld [vmem:[%s8526_s7 + $0x50] ss:$8 sps:$4 sm:$0xff]   ;;  %v6469_v18 = vld [vmem:[%s8526_s7 + $0x64] ss:$8 sps:$4 sm:$0xff]  }
 0x489   :  { %6053 = vmatpush3.bf16.msra.mxu0 %v6426_v37  ;;  %6097 = vmatpush3.bf16.msra.mxu1 %v6427_v41  ;;  %v6466_v37 = vld [vmem:[%s8526_s7 + $0x24] ss:$8 sps:$4 sm:$0xff]   ;;  %v6464_v41 = vld [vmem:[%s8526_s7 + $0x20] ss:$8 sps:$4 sm:$0xff]   ;;  %v6472_v26 = vld [vmem:[%s8526_s7 + $0x34] ss:$8 sps:$4 sm:$0xff]  }
 0x48a   :  { %v3775_v47 = vmax.f32 %v3766_v31, 0.0  ;;  %6054 = vmatprep.subr.bf16.mxu0 %v6543_v53  ;;  %6098 = vmatprep.subr.bf16.mxu1 %v6543_v53  ;;  %v6467_v56 = vld [vmem:[%s8526_s7 + $0x60] ss:$8 sps:$4 sm:$0xff]   ;;  %v6470_v19 = vld [vmem:[%s8526_s7 + $0x30] ss:$8 sps:$4 sm:$0xff]  }
 0x48b   :  { %v3731_v6 = vpop.f32.mrb[56].mxu1  ;;  %6104 = vmatprep.mubr.msk.bf16.mxu1 %vm6544_vm0, %v6543_v53  ;;  %v6475_v31 = vld [vmem:[%s8526_s7 + $0x74] ss:$8 sps:$4 sm:$0xff]  }
 0x48c   :  { %v8221_v15 = vpack.c.bf16 %v3775_v47, %v3774_v2  ;;  %v3751_v57 = vadd.f32 %v3731_v6, %v8173_v48  ;;  %v6030_v62 = vpop.f32.mrb[57].mxu1  ;;  %v6432_v48 = vld [vmem:[%s8524_s5 + $0x48] sm:$0xff]  }
 0x48d   :  { %6055 = vmatpush3.bf16.msra.mxu0 %v6428_v38  ;;  %6099 = vmatpush3.bf16.msra.mxu1 %v6429_v39  ;;  %v3734_v60 = vpop.f32.mrb[58].mxu1  ;;  %v6473_v38 = vld [vmem:[%s8526_s7 + $0x70] ss:$8 sps:$4 sm:$0xff]   ;;  %v6478_v39 = vld [vmem:[%s8526_s7 + $0xc4] ss:$8 sps:$4 sm:$0xff]  }
 0x48e   :  { %v3767_v50 = vadd.f32 %v8182_v59, %v3751_v57  ;;  %v3752_v25 = vadd.f32 %v3734_v60, %v8175_v32  ;;  %6060 = vmatprep.subr.bf16.mxu0 %v6543_v53  ;;  %6100 = vmatprep.subr.bf16.mxu1 %v6543_v53  ;;  %v6031_v27 = vpop.f32.mrb[59].mxu1  ;;  %v4200_v20 = vrot.slane %v8221_v15, 4  ;;  %v6481_v2 = vld [vmem:[%s8526_s7 + $0x84] ss:$8 sps:$4 sm:$0xff]  }
 0x490   :  { %v3768_v28 = vadd.f32 %v8182_v59, %v3752_v25  ;;  %6057 = vmatmul.mubr.msk.bf16.vlgmr.msra.gmra.mrb[36].mxu0 %vm3882_vm3, %v3779_v12  ;;  %v3776_v10 = vmax.f32 %v3767_v50, 0.0  ;;  %v6443_v12 = vld [vmem:[%s8524_s5 + $0x98] sm:$0xff]  }
 0x491   :  { %6061 = vmatpush3.bf16.msra.mxu0 %v6430_v4  ;;  %6101 = vmatpush3.bf16.msra.mxu1 %v6431_v24 }
 0x492   :  { %v3777_v32 = vmax.f32 %v3768_v28, 0.0  ;;  %6062 = vmatprep.subr.bf16.mxu0 %v6543_v53  ;;  %6102 = vmatprep.subr.bf16.mxu1 %v6543_v53 }
 0x493   :  { %v3739_v36 = vpop.f32.mrb[60].mxu1  ;;  %6068 = vmatprep.mubr.msk.bf16.mxu0 %vm6544_vm0, %v6543_v53 }
 0x494   :  { %v3782_v54 = vpack.c.bf16 %v3777_v32, %v3776_v10  ;;  %v3753_v5 = vadd.f32 %v3739_v36, %v8177_v9  ;;  %v6034_v16 = vpop.f32.mrb[61].mxu1 }
 0x495   :  { %6063 = vmatpush3.bf16.msra.mxu0 %v6432_v48  ;;  %6103 = vmatpush3.bf16.msra.mxu1 %v6433_v14  ;;  %v3742_v30 = vpop.f32.mrb[62].mxu1 }
 0x496   :  { %v8255_v34 = vadd.f32 %v8182_v59, %v3753_v5  ;;  %6064 = vmatprep.subr.bf16.mxu0 %v6543_v53  ;;  %6120 = vmatprep.subr.bf16.mxu1 %v6543_v53  ;;  %v6035_v9 = vpop.f32.mrb[63].mxu1  ;;  %v6438_v59 = vld [vmem:[%s8524_s5 + $0x80] sm:$0xff]   ;;  %v4338_v33 = vrot.slane %v3782_v54, 4 }
 0x498   :  { %6105 = vmatmul.mubr.msk.bf16.vlgmr.msra.gmra.mrb[68].mxu1 %vm3882_vm3, %v4200_v20  ;;  %v3778_v52 = vmax.f32 %v8255_v34, 0.0 }
 0x499   :  { %6065 = vmatpush3.bf16.msra.mxu0 %v6434_v51  ;;  %6121 = vmatpush3.bf16.msra.mxu1 %v6435_v63 }
 0x49a   :  { %6066 = vmatprep.subr.bf16.mxu0 %v6543_v53  ;;  %6122 = vmatprep.subr.bf16.mxu1 %v6543_v53  ;;  %v3783_v23 = vpack.c.bf16 %v3778_v52, %v3778_v52 }
 0x49b   :  { %6128 = vmatprep.mubr.msk.bf16.mxu1 %vm6544_vm0, %v6543_v53 }
 0x49d   :  { %6067 = vmatpush3.bf16.msra.mxu0 %v6436_v43  ;;  %6123 = vmatpush3.bf16.msra.mxu1 %v6437_v42 }
 0x49e   :  { %6084 = vmatprep.subr.bf16.mxu0 %v6543_v53  ;;  %6124 = vmatprep.subr.bf16.mxu1 %v6543_v53 }
 0x4a0   :  { %6069 = vmatmul.mubr.msk.bf16.vlgmr.msra.gmra.mrb[40].mxu0 %vm3882_vm3, %v8198_v17  ;;  %v6460_v17 = vld [vmem:[%s8526_s7 + $0x14] ss:$8 sps:$4 sm:$0xff]  }
 0x4a1   :  { %6085 = vmatpush3.bf16.msra.mxu0 %v6438_v59  ;;  %6125 = vmatpush3.bf16.msra.mxu1 %v6439_v13 }
 0x4a2   :  { %6086 = vmatprep.subr.bf16.mxu0 %v6543_v53  ;;  %6126 = vmatprep.subr.bf16.mxu1 %v6543_v53 }
 0x4a3   :  { %6092 = vmatprep.mubr.msk.bf16.mxu0 %vm6544_vm0, %v6543_v53 }
 0x4a5   :  { %6087 = vmatpush3.bf16.msra.mxu0 %v6440_v61  ;;  %6127 = vmatpush3.bf16.msra.mxu1 %v6441_v11 }
 0x4a6   :  { %6088 = vmatprep.subr.bf16.mxu0 %v6543_v53 }
 0x4a8   :  { %6129 = vmatmul.mubr.msk.bf16.vlgmr.msra.gmra.mrb[72].mxu1 %vm3882_vm3, %v4338_v33 }
 0x4a9   :  { %6089 = vmatpush3.bf16.msra.mxu0 %v6442_v45  ;;  %4595 = vmatprep.mubr.bf16.mxu1 %v6542_v1 }
 0x4aa   :  { %6090 = vmatprep.subr.bf16.mxu0 %v6543_v53 }
 0x4ad   :  { %6091 = vmatpush3.bf16.msra.mxu0 %v6443_v12 }
 0x4ae   :  { %6108 = vmatprep.subr.bf16.mxu0 %v6543_v53 }
 0x4b0   :  { %6093 = vmatmul.mubr.msk.bf16.vlgmr.msra.gmra.mrb[44].mxu0 %vm3882_vm3, %v8221_v15 }
 0x4b1   :  { %6109 = vmatpush3.bf16.msra.mxu0 %v6444_v44  ;;  %6116 = vmatprep.mubr.msk.bf16.mxu0 %vm6544_vm0, %v6543_v53 }
 0x4b2   :  { %6110 = vmatprep.subr.bf16.mxu0 %v6543_v53 }
 0x4b5   :  { %6111 = vmatpush3.bf16.msra.mxu0 %v6445_v49 }
 0x4b6   :  { %6112 = vmatprep.subr.bf16.mxu0 %v6543_v53 }
 0x4b9   :  { %6113 = vmatpush3.bf16.msra.mxu0 %v6446_v0 }
 0x4ba   :  { %6114 = vmatprep.subr.bf16.mxu0 %v6543_v53 }
 0x4bd   :  { %6115 = vmatpush3.bf16.msra.mxu0 %v6447_v3 }
 0x4be   :  { %6132 = vmatprep.subr.bf16.mxu0 %v6543_v53 }
 0x4c0   :  { %6117 = vmatmul.mubr.msk.bf16.vlgmr.msra.gmra.mrb[48].mxu0 %vm3882_vm3, %v3782_v54 }
 0x4c1   :  { %6133 = vmatpush3.bf16.msra.mxu0 %v6448_v40  ;;  %6140 = vmatprep.mubr.msk.bf16.mxu0 %vm6544_vm0, %v6543_v53 }
 0x4c2   :  { %6134 = vmatprep.subr.bf16.mxu0 %v6543_v53 }
 0x4c5   :  { %6135 = vmatpush3.bf16.msra.mxu0 %v6449_v29  ;;  %v5419_v29 = vld [vmem:[%s8525_s6] ss:$0 sm:$0xff] }
 0x4c6   :  { %6136 = vmatprep.subr.bf16.mxu0 %v6543_v53 }
 0x4c9   :  { %6137 = vmatpush3.bf16.msra.mxu0 %v6450_v46 }
 0x4ca   :  { %6138 = vmatprep.subr.bf16.mxu0 %v6543_v53  ;;  %v6457_v53 = vld [vmem:[%s8526_s7 + $0x44] ss:$8 sps:$4 sm:$0xff]  }
 0x4cb   :  { %4563 = vmatprep.subr.bf16.mxu1 %v6457_v53 }
 0x4cc   :  { %4564 = vmatpush1.bf16.msra.mxu1 %v6455_v7  ;;  %v6476_v7 = vld [vmem:[%s8526_s7 + $0xc0] ss:$8 sps:$4 sm:$0xff]  }
 0x4cd   :  { %6139 = vmatpush3.bf16.msra.mxu0 %v6451_v21  ;;  %4565 = vmatprep.subr.bf16.mxu1 %v6463_v8  ;;  %v6479_v8 = vld [vmem:[%s8526_s7 + $0x80] ss:$8 sps:$4 sm:$0xff]  }
 0x4ce   :  { %4647 = vmatprep.subr.bf16.mxu0 %v6454_v22 }
 0x4d0   :  { %6141 = vmatmul.mubr.msk.bf16.vlgmr.msra.gmra.mrb[52].mxu0 %vm3882_vm3, %v3783_v23  ;;  %4566 = vmatpush1.bf16.msra.mxu1 %v6461_v35  ;;  %v6487_v35 = vld [vmem:[%s8526_s7 + $0x94] ss:$8 sps:$4 sm:$0xff]  }
 0x4d1   :  { %4679 = vmatprep.mubr.bf16.mxu0 %v6542_v1  ;;  %4648 = vmatpush1.bf16.msra.mxu0 %v6452_v58 }
 0x4d2   :  { %4649 = vmatprep.subr.bf16.mxu0 %v6460_v17  ;;  %4567 = vmatprep.subr.bf16.mxu1 %v6469_v18  ;;  %v6484_v17 = vld [vmem:[%s8526_s7 + $0xd4] ss:$8 sps:$4 sm:$0xff]   ;;  %v6485_v18 = vld [vmem:[%s8526_s7 + $0x90] ss:$8 sps:$4 sm:$0xff]  }
 0x4d4   :  { %4568 = vmatpush1.bf16.msra.mxu1 %v6467_v56  ;;  %v6493_v56 = vld [vmem:[%s8526_s7 + $0xa4] ss:$8 sps:$4 sm:$0xff]  }
 0x4d5   :  { %4650 = vmatpush1.bf16.msra.mxu0 %v6458_v55  ;;  %4569 = vmatprep.subr.bf16.mxu1 %v6475_v31  ;;  %v6499_v31 = vld [vmem:[%s8526_s7 + $0xb4] ss:$8 sps:$4 sm:$0xff]  }
 0x4d6   :  { %4651 = vmatprep.subr.bf16.mxu0 %v6466_v37  ;;  %v6482_v37 = vld [vmem:[%s8526_s7 + $0xd0] ss:$8 sps:$4 sm:$0xff]  }
 0x4d8   :  { %4570 = vmatpush1.bf16.msra.mxu1 %v6473_v38  ;;  %v6494_v38 = vld [vmem:[%s8526_s7 + $0xf0] ss:$8 sps:$4 sm:$0xff]  }
 0x4d9   :  { %4652 = vmatpush1.bf16.msra.mxu0 %v6464_v41  ;;  %4732 = vmatprep.subr.bf16.mxu1 %v6481_v2  ;;  %v6490_v41 = vld [vmem:[%s8526_s7 + $0xe4] ss:$8 sps:$4 sm:$0xff]  }
 0x4da   :  { %4653 = vmatprep.subr.bf16.mxu0 %v6472_v26  ;;  %v6488_v26 = vld [vmem:[%s8526_s7 + $0xe0] ss:$8 sps:$4 sm:$0xff]  }
 0x4db   :  { %v6500_v2 = vld [vmem:[%s8528_s9 + $0x40] sm:$0xff]  }
 0x4dd   :  { %4654 = vmatpush1.bf16.msra.mxu0 %v6470_v19  ;;  %v6496_v19 = vld [vmem:[%s8526_s7 + $0xf4] ss:$8 sps:$4 sm:$0xff]  }
 0x4de   :  { %4819 = vmatprep.subr.bf16.mxu0 %v6478_v39  ;;  %v6497_v39 = vld [vmem:[%s8526_s7 + $0xb0] ss:$8 sps:$4 sm:$0xff]  }
 0x553   :  { %v3920_v47 = vpop.f32.mrb[32].mxu0 }
 0x554   :  { %v6046_v6 = vpop.f32.mrb[33].mxu0 }
 0x555   :  { %v3923_v15 = vpop.f32.mrb[34].mxu0 }
 0x556   :  { %v6047_v57 = vpop.f32.mrb[35].mxu0  ;;  %v6501_v15 = vld [vmem:[%s8528_s9] sm:$0xff]  }
 0x557   :  { %v6502_v57 = vld [vmem:[%s8528_s9 + $0x48] sm:$0xff]  }
 0x55b   :  { %v4124_v62 = vpop.f32.mrb[64].mxu1 }
 0x55c   :  { %v6082_v60 = vpop.f32.mrb[65].mxu1 }
 0x55d   :  { %v4127_v4 = vpop.f32.mrb[66].mxu1  ;;  %v6504_v60 = vld [vmem:[%s8528_s9 + $0x50] sm:$0xff]  }
 0x55e   :  { %v6083_v24 = vpop.f32.mrb[67].mxu1  ;;  %v6505_v4 = vld [vmem:[%s8528_s9 + $0x10] sm:$0xff]  }
 0x55f   :  { %v6506_v24 = vld [vmem:[%s8528_s9 + $0x58] sm:$0xff]  }
 0x563   :  { %v3987_v50 = vpop.f32.mrb[36].mxu0 }
 0x564   :  { %v3988_v25 = vadd.f32 %v3987_v50, %v3920_v47  ;;  %v6058_v27 = vpop.f32.mrb[37].mxu0  ;;  %v6507_v50 = vld [vmem:[%s8528_s9 + $0x18] sm:$0xff]  }
 0x565   :  { %v3990_v28 = vpop.f32.mrb[38].mxu0  ;;  %v6509_v27 = vld [vmem:[%s8528_s9 + $0x20] sm:$0xff]  }
 0x566   :  { %v6059_v48 = vpop.f32.mrb[39].mxu0  ;;  %v6510_v28 = vld [vmem:[%s8528_s9 + $0x68] sm:$0xff]  }
 0x567   :  { %v6511_v48 = vld [vmem:[%s8528_s9 + $0x28] sm:$0xff]  }
 0x56b   :  { %v4262_v14 = vpop.f32.mrb[68].mxu1 }
 0x56c   :  { %v6106_v10 = vpop.f32.mrb[69].mxu1 }
 0x56d   :  { %v4265_v32 = vpop.f32.mrb[70].mxu1  ;;  %v6513_v10 = vld [vmem:[%s8528_s9 + $0x30] sm:$0xff]  }
 0x56e   :  { %v6107_v36 = vpop.f32.mrb[71].mxu1  ;;  %v6514_v32 = vld [vmem:[%s8528_s9 + $0x78] sm:$0xff]  }
 0x56f   :  { %v6515_v36 = vld [vmem:[%s8528_s9 + $0x38] sm:$0xff]  }
 0x573   :  { %v4054_v54 = vpop.f32.mrb[40].mxu0 }
 0x574   :  { %v4060_v5 = vadd.f32 %v4054_v54, %v3988_v25  ;;  %v6070_v16 = vpop.f32.mrb[41].mxu0  ;;  %v6508_v25 = vld [vmem:[%s8528_s9 + $0x60] sm:$0xff]  }
 0x575   :  { %v4057_v51 = vpop.f32.mrb[42].mxu0 }
 0x576   :  { %v6071_v63 = vpop.f32.mrb[43].mxu0  ;;  %v4130_v30 = vadd.f32 %v4124_v62, %v4060_v5  ;;  %v6503_v62 = vld [vmem:[%s8528_s9 + $0x8] sm:$0xff]  }
 0x57b   :  { %v4400_v20 = vpop.f32.mrb[72].mxu1 }
 0x57c   :  { %v6130_v34 = vpop.f32.mrb[73].mxu1 }
 0x57d   :  { %v4403_v9 = vpop.f32.mrb[74].mxu1 }
 0x57e   :  { %v6131_v43 = vpop.f32.mrb[75].mxu1 }
 0x583   :  { %v4192_v42 = vpop.f32.mrb[44].mxu0 }
 0x584   :  { %v4198_v59 = vadd.f32 %v4192_v42, %v4130_v30  ;;  %v6094_v13 = vpop.f32.mrb[45].mxu0  ;;  %v4864_v42 = vlaneseq }
 0x585   :  { %v4195_v61 = vpop.f32.mrb[46].mxu0 }
 0x586   :  { %v6095_v11 = vpop.f32.mrb[47].mxu0  ;;  %v4268_v45 = vadd.f32 %v4262_v14, %v4198_v59  ;;  %v6512_v14 = vld [vmem:[%s8528_s9 + $0x70] sm:$0xff]   ;;  %v4865_v59 = vshrl.u32 %v4864_v42, 7 }
 0x587   :  { %v4862_v11 = vld [vmem:[%s8527_s8] sm:$0x3] }
 0x588   :  { %v4866_v13 = vsub.s32 0, %v4865_v59 }
 0x593   :  { %v4330_v33 = vpop.f32.mrb[48].mxu0 }
 0x594   :  { %v4336_v12 = vadd.f32 %v4330_v33, %v4268_v45  ;;  %v6118_v44 = vpop.f32.mrb[49].mxu0  ;;  %v4870_v45 = vsub.s32 1, %v4865_v59 }
 0x595   :  { %v4333_v49 = vpop.f32.mrb[50].mxu0 }
 0x596   :  { %v6119_v0 = vpop.f32.mrb[51].mxu0  ;;  %v4406_v3 = vadd.f32 %v4400_v20, %v4336_v12 }
 0x597   :  { %v4867_v0 = vrot.slane %v4862_v11, %v4866_v13 }
 0x5a3   :  { %v4468_v40 = vpop.f32.mrb[52].mxu0 }
 0x5a4   :  { %v4474_v46 = vadd.f32 %v4468_v40, %v4406_v3  ;;  %v6142_v21 = vpop.f32.mrb[53].mxu0 }
 0x5a5   :  { %v4471_v52 = vpop.f32.mrb[54].mxu0 }
 0x5a6   :  { %v4482_v23 = vadd.f32 %v5419_v29, %v4474_v46  ;;  %v6143_v58 = vpop.f32.mrb[55].mxu0  ;;  %v4871_v46 = vrot.slane %v4862_v11, %v4870_v45 }
 0x5a8   :  { %v4483_v22 = vmax.f32 %v4482_v23, 0.0 }
 0x5aa   :  { %4484 = vst.msk [vmem:[%s8531_s12] sm:$0xff] %vm3882_vm3, %v4483_v22  ;;  %v4485_v53 = vpack.c.bf16 %v4483_v22, %v4483_v22  ;;  %s5088_s12 = sshll.u32 %s6546_s16, 4  ;;  %s5089_s12 = int_to_ptr.vmem [resolvable:$true] %s5088_s12 }
 0x5ab   :  { %s6518_s17 = scalar_lea.vmem %s5089_s12, 32  ;;  %p6523_p1 = scmp.lt.s32.totalorder %s5089_s12, %s5089_s12 }
 0x5ac   :  { %v4519_v55 = vrot.slane %v4485_v53, 1  ;;  %5437 = vmatmul.mubr.msk.bf16.vlgmr.msra.gmra.mrb[56].mxu0 %vm3882_vm3, %v4485_v53  ;;  %v4775_v47 = vrot.slane %v4485_v53, 3  ;;  %v4688_v6 = vrot.slane %v4485_v53, 2  ;;  %p6519_p0 = scmp.ne.s32.totalorder %s5089_s12, %s6518_s17  ;;  %p6524_p2 = scmp.lt.s32.totalorder %s6518_s17, %s6518_s17 }
 0x5ad   :  { %4820 = vmatpush1.bf16.msra.mxu0 %v6476_v7  ;;  %4851 = vmatprep.mubr.bf16.mxu0 %v6542_v1 }
 0x5ae   :  { %5428 = vmatmul.mubr.msk.bf16.vlgmr.msra.gmra.mrb[76].mxu1 %vm3882_vm3, %v4519_v55  ;;  %4821 = vmatprep.subr.bf16.mxu0 %v6484_v17  ;;  %p6525_p3 = por %p6524_p2, %p6523_p1 }
 0x5af   :  { %4733 = vmatpush1.bf16.msra.mxu1 %v6479_v8  ;;  %4764 = vmatprep.mubr.bf16.mxu1 %v6542_v1  ;;  %v6491_v1 = vld [vmem:[%s8526_s7 + $0xa0] ss:$8 sps:$4 sm:$0xff]  }
 0x5b0   :  { %4734 = vmatprep.subr.bf16.mxu1 %v6487_v35  ;;  %p6526_p4 = pnand %p6525_p3, %p6519_p0 }
 0x5b1   :  { %4822 = vmatpush1.bf16.msra.mxu0 %v6482_v37 }
 0x5b2   :  { %4823 = vmatprep.subr.bf16.mxu0 %v6490_v41  ;;  %v6545_v41 = vmov 6  }
 0x5b3   :  { %4735 = vmatpush1.bf16.msra.mxu1 %v6485_v18  ;;  %6151 = vset.pattern.permute.xlu0 %v6545_v41 }
 0x5b4   :  { %4736 = vmatprep.subr.bf16.mxu1 %v6493_v56  ;;  %v5456_v56 = vld [vmem:[%s8529_s10] ss:$0 sm:$0xff] }
 0x5b5   :  { %4824 = vmatpush1.bf16.msra.mxu0 %v6488_v26 }
 0x5b6   :  { %4825 = vmatprep.subr.bf16.mxu0 %v6496_v19 }
 0x5b7   :  { %4737 = vmatpush1.bf16.msra.mxu1 %v6491_v1 }
 0x5b8   :  { %4738 = vmatprep.subr.bf16.mxu1 %v6499_v31 }
 0x5b9   :  { %4826 = vmatpush1.bf16.msra.mxu0 %v6494_v38 }
 0x5bb   :  { %4739 = vmatpush1.bf16.msra.mxu1 %v6497_v39 }
 0x5bc   :  { %5455 = vmatmul.mubr.msk.bf16.vlgmr.msra.gmra.mrb[60].mxu0 %vm3882_vm3, %v4775_v47  ;;  %5630 = vmatprep.subr.bf16.mxu1 %v6500_v2 }
 0x5be   :  { %5446 = vmatmul.mubr.msk.bf16.vlgmr.msra.gmra.mrb[80].mxu1 %vm3882_vm3, %v4688_v6 }
 0x5bf   :  { %5631 = vmatpush3.bf16.msra.mxu1 %v6501_v15 }
 0x5c0   :  { %5632 = vmatprep.subr.bf16.mxu1 %v6502_v57 }
 0x5c3   :  { %5633 = vmatpush3.bf16.msra.mxu1 %v6503_v62 }
 0x5c4   :  { %5634 = vmatprep.subr.bf16.mxu1 %v6504_v60 }
 0x5c7   :  { %5635 = vmatpush3.bf16.msra.mxu1 %v6505_v4 }
 0x5c8   :  { %5636 = vmatprep.subr.bf16.mxu1 %v6506_v24 }
 0x5cb   :  { %5637 = vmatpush3.bf16.msra.mxu1 %v6507_v50 }
 0x5cc   :  { %5638 = vmatprep.subr.bf16.mxu1 %v6508_v25 }
 0x5cf   :  { %5639 = vmatpush3.bf16.msra.mxu1 %v6509_v27 }
 0x5d0   :  { %5640 = vmatprep.subr.bf16.mxu1 %v6510_v28 }
 0x5d3   :  { %5641 = vmatpush3.bf16.msra.mxu1 %v6511_v48 }
 0x5d4   :  { %5642 = vmatprep.subr.bf16.mxu1 %v6512_v14 }
 0x5d7   :  { %5643 = vmatpush3.bf16.msra.mxu1 %v6513_v10 }
 0x5d8   :  { %5644 = vmatprep.subr.bf16.mxu1 %v6514_v32 }
 0x5db   :  { %5645 = vmatpush3.bf16.msra.mxu1 %v6515_v36 }
 0x67f   :  { %v4681_v54 = vpop.f32.mrb[56].mxu0 }
 0x680   :  { %v4683_v5 = vpop.f32.mrb[57].mxu0 }
 0x681   :  { %v4597_v16 = vpop.f32.mrb[76].mxu1  ;;  %v4685_v51 = vpop.f32.mrb[58].mxu0 }
 0x682   :  { %v4682_v63 = vadd.f32 %v4681_v54, %v4597_v16  ;;  %v4599_v30 = vpop.f32.mrb[77].mxu1  ;;  %v4686_v20 = vpop.f32.mrb[59].mxu0 }
 0x683   :  { %v4684_v34 = vadd.f32 %v4683_v5, %v4599_v30  ;;  %v4601_v9 = vpop.f32.mrb[78].mxu1 }
 0x684   :  { %v4602_v43 = vpop.f32.mrb[79].mxu1 }
 0x68f   :  { %v4853_v61 = vpop.f32.mrb[60].mxu0 }
 0x690   :  { %v4855_v33 = vpop.f32.mrb[61].mxu0 }
 0x691   :  { %v4766_v12 = vpop.f32.mrb[80].mxu1  ;;  %v4857_v44 = vpop.f32.mrb[62].mxu0 }
 0x692   :  { %v4773_v49 = vadd.f32 %v4766_v12, %v4682_v63  ;;  %v4768_v3 = vpop.f32.mrb[81].mxu1  ;;  %v4858_v40 = vpop.f32.mrb[63].mxu0 }
 0x693   :  { %v4774_v29 = vadd.f32 %v4768_v3, %v4684_v34  ;;  %v4770_v21 = vpop.f32.mrb[82].mxu1 }
 0x694   :  { %v4860_v52 = vadd.f32 %v4853_v61, %v4773_v49  ;;  %v4771_v23 = vpop.f32.mrb[83].mxu1 }
 0x695   :  { %v4861_v58 = vadd.f32 %v4855_v33, %v4774_v29 }
 0x696   :  { %v4874_v22 = vadd.f32 %v4867_v0, %v4860_v52 }
 0x697   :  { %v4875_v7 = vadd.f32 %v4871_v46, %v4861_v58 }
 0x698   :  { %vm4876_vm4 = vcmp.ge.f32.partialorder %v4874_v22, 0.0  ;;  %v4878_v53 = vmul.f32 0.01, %v4874_v22 }
 0x699   :  { %vm4877_vm5 = vcmp.ge.f32.partialorder %v4875_v7, 0.0  ;;  %v4879_v17 = vmul.f32 0.01, %v4875_v7 }
 0x69a   :  { %v4880_v8 = vsel %vm4876_vm4, %v4874_v22, %v4878_v53 }
 0x69b   :  { %v4881_v55 = vsel %vm4877_vm5, %v4875_v7, %v4879_v17  ;;  %v4882_v37 = vpack.c.bf16 %v4880_v8, %v4880_v8 }
 0x69c   :  { %v4883_v35 = vpack.c.bf16 %v4881_v55, %v4881_v55 }
 0x69e   :  { %5051 = vmatprep.mubr.bf16.mxu1 %v4883_v35 }
 0x69f   :  { %5052 = vmatmul.mubr.bf16.vlgmr.msra.gmra.mrb[84].mxu1 %v4882_v37 }
 0x772   :  { %v5646_v18 = vpop.f32.mrb[84].mxu1 }
 0x773   :  { %v5647_v26 = vpop.f32.mrb[85].mxu1 }
 0x774   :  { %v5648_v19 = vadd.f32 %v5647_v26, %v5646_v18  ;;  %v5649_v1 = vpop.f32.mrb[86].mxu1 }
 0x775   :  { %v5650_v31 = vpop.f32.mrb[87].mxu1 }
 0x776   :  { %v5054_v38 = vadd.f32 %v5648_v19, %v5456_v56 }
 0x778   :  { %v5060_v39 = vsel %vm5059_vm6, %v5054_v38, 0.0 }
 0x779   :  { %5061 = vadd.xlane.f32.xlu0 %v5060_v39 }
 0x78f   :  { %5077 = vperm.xlu0 %6151, %v5054_v38  }
 0x806   :  { %v5062_v2 = vpop.xlane.xlu0 %5061 }
 0x807   :  { %v5063_v47 = vrot.slane %v5062_v2, 4 }
 0x809   :  { %v5064_v6 = vadd.f32 %v5063_v47, %v5062_v2 }
 0x80b   :  { %v5065_v15 = vrot.slane %v5064_v6, 2 }
 0x80d   :  { %v5066_v57 = vadd.f32 %v5065_v15, %v5064_v6 }
 0x80e   :  { %v5078_v50 = vpop.permute.xlu0 %5077 }
 0x80f   :  { %v5067_v62 = vrot.slane %v5066_v57, 1 }
 0x811   :  { %v5068_v60 = vadd.f32 %v5067_v62, %v5066_v57 }
 0x813   :  { %6144 = vpush %v5068_v60 }
 0x844   :  { %s6145_s15 = spop %6144 }
 0x845   :  { %s5072_s10 = smul.f32 0.083333336, %s6145_s15 }
 0x847   :  { %v5073_v4 = vstv %s5072_s10 }
 0x848   :  { %v5074_v24 = vsub.f32 %v5054_v38, %v5073_v4 }
 0x84a   :  { %v5080_v25 = vadd.f32 %v5078_v50, %v5074_v24 }
 0x84c   :  { %5081 = vst.msk [vmem:[#allocation2] sm:$0x3] %vm5059_vm6, %v5080_v25 }
 0x84d   :  { %6529 = shalt.err (!%p6526_p4)
}
 0x84e   :  { %s6530_s19 = scalar_lea.hbm %s8530_s11, 32 }
 0x84f   :  { %p6531_p5 = scmp.ne.s32.totalorder %s8530_s11, %s6530_s19  ;;  %p6534_p6 = scmp.lt.u32.totalorder %s6530_s19, %s8530_s11 }
 0x851   :  { %p6536_p7 = pnand %p6534_p6, %p6531_p5 }
 0x853   :  { %6539 = shalt.err (!%p6536_p7)
}
 0x854   :  { %5091 = dma.vmem_to_hbm [thread:$0]  %s5089_s12, 32, %s8530_s11, [#allocation3]  }
 0x855   :  { %6540 = dma.done.wait [#allocation3], 32  }
 0x856   :  { %6541 = vsyncadd [#allocation3], 4294967264 }
 0x857   :  { %5099 = vsyncpa [#allocation3], 1 }

</bundles_post_ra>
